<compile_context>
chip_gen: v6e
topology: v6e:2x2x1
jax: 0.10.0
libtpu: 0.0.40
codegen_flags: <defaults>
</compile_context>

<pallas_src>
import functools
import warnings

import numpy as np
import jax
import jax.numpy as jnp
from jax.experimental import pallas as pl
from jax.experimental.pallas import tpu as pltpu


def _round_up(x, m):
    return ((x + m - 1) // m) * m


def _largest_divisor_leq(n, cap):
    cap = max(1, min(cap, n))
    for g in range(cap, 0, -1):
        if n % g == 0:
            return g
    return 1


def _maybe_buffered(block_shape, index_map, buffers):
    """BlockSpec with deeper pipelining when this jax version supports it."""
    if buffers is not None:
        try:
            return pl.BlockSpec(block_shape, index_map,
                                pipeline_mode=pl.Buffered(buffers))
        except (TypeError, AttributeError):
            pass
    return pl.BlockSpec(block_shape, index_map)


# --------------------- lane-dense (row-folded) kernel -----------------------

def _folded_select_kernel(src_row, x_ref, o_ref):
    # x_ref: (bm, g*K_in) lane-dense tile, g original rows folded per row.
    # o_ref: (bm, g*k)    lane-dense tile.
    # src_row is a trace-time constant lane map:
    #   out lane p = a*k + b  <-  in lane a*K_in + b*dilation.
    src = jnp.asarray(src_row, dtype=jnp.int32)
    src = jnp.broadcast_to(src[None, :], o_ref.shape)
    o_ref[...] = jnp.take_along_axis(x_ref[...], src, axis=1)


def _dense_dilated_folded(flat, k, dilation, g, block_rows):
    R, K_in = flat.shape
    M = R // g
    w_in, w_out = g * K_in, g * k
    folded = flat.reshape(M, w_in)                # pure metadata reshape

    p = np.arange(w_out)
    src_row = (p // k) * K_in + (p % k) * dilation  # static lane gather map

    # Rows per grid step: ~8 MiB of pipeline buffers (3x in, 2x out, gather
    # temporaries), >=4 grid steps when possible (v7x megacore + overlap),
    # sublane (8) aligned.  Partial last block is handled by Pallas (masked).
    bytes_per_row = 4 * (3 * w_in + 4 * w_out)
    bm = min(block_rows, max(1, (8 << 20) // bytes_per_row), max(1, pl.cdiv(M, 4)))
    bm = max(8, _round_up(bm, 8))
    grid = (pl.cdiv(M, bm),)

    out = pl.pallas_call(
        functools.partial(_folded_select_kernel, src_row),
        out_shape=jax.ShapeDtypeStruct((M, w_out), flat.dtype),
        grid=grid,
        in_specs=[_maybe_buffered((bm, w_in), lambda i: (i, 0), buffers=3)],
        out_specs=pl.BlockSpec((bm, w_out), lambda i: (i, 0)),
        compiler_params=pltpu.CompilerParams(dimension_semantics=("parallel",)),
        cost_estimate=pl.CostEstimate(flops=0, transcendentals=0,
                                      bytes_accessed=R * (K_in + k) * 4),
    )(folded)
    return out.reshape(R, k)


# ------------------- narrow (K-on-lanes) fallback kernel --------------------

def _narrow_select_kernel(k, dilation, x_ref, o_ref):
    # Uses only unit-stride lane slices + concatenate (maximally portable).
    x = x_ref[...]
    cols = [x[:, b * dilation: b * dilation + 1] for b in range(k)]
    o_ref[...] = jnp.concatenate(cols, axis=1)


def _dense_dilated_narrow(flat, k, dilation):
    R, K_in = flat.shape
    rt = min(2048, max(1, pl.cdiv(R, 4)))
    rt = max(8, _round_up(rt, 8))
    grid = (pl.cdiv(R, rt),)                      # no padding: masked last block
    return pl.pallas_call(
        functools.partial(_narrow_select_kernel, k, dilation),
        out_shape=jax.ShapeDtypeStruct((R, k), flat.dtype),
        grid=grid,
        in_specs=[pl.BlockSpec((rt, K_in), lambda i: (i, 0))],
        out_specs=pl.BlockSpec((rt, k), lambda i: (i, 0)),
        compiler_params=pltpu.CompilerParams(dimension_semantics=("parallel",)),
    )(flat)


# --------------------------------- wrapper ----------------------------------

_FOLDED_PATH_OK = None   # one-time probe: lane-gather lowering available?


def dense_dilated(edge_index, k=9, dilation=1, stochastic=False, epsilon=0.0,
                  block_rows=256):
    """Pallas DenseDilated.forward (deterministic / eval-mode semantics).

    edge_index: (2, B, N, K_in) integer array, K_in >= (k-1)*dilation + 1
                (normally K_in == k*dilation).
    returns   : (2, B, N, k) == edge_index[:, :, :, :k*dilation:dilation]
    """
    global _FOLDED_PATH_OK
    if stochastic:
        # TODO(synk): stochastic=True training path (torch.rand/randperm
        # neighbor subsampling) is a host-side random branch; eval-mode
        # deterministic selection is used instead.
        warnings.warn("DenseDilated: stochastic training path not implemented; "
                      "using deterministic dilated selection (eval semantics).")
    del epsilon

    two, B, N, K_in = edge_index.shape
    assert two == 2
    assert K_in >= (k - 1) * dilation + 1, "not enough neighbors for dilation"

    # Neighbor indices never need 64 bits; halves HBM traffic when x64 is on.
    if jnp.issubdtype(edge_index.dtype, jnp.integer) and edge_index.dtype.itemsize > 4:
        edge_index = edge_index.astype(jnp.int32)

    # Common case: dilation == 1 is a contiguous prefix slice -> no kernel.
    if dilation == 1:
        return edge_index if K_in == k else edge_index[..., :k]

    R = two * B * N
    flat = edge_index.reshape(R, K_in)            # pure metadata reshape

    # Fold g rows into the lane axis.  g is the largest divisor of R (so no
    # padding / HBM round trips), capped so a folded row stays a few KiB.
    g_cap = max(1, min(128, 4096 // max(K_in, k)))
    g = _largest_divisor_leq(R, g_cap)

    out = None
    if g >= 8 and _FOLDED_PATH_OK is not False:
        if _FOLDED_PATH_OK:
            out = _dense_dilated_folded(flat, k, dilation, g, block_rows)
        else:
            # One-time eager probe; lane-gather lowering support varies across
            # jax/libtpu versions.  (Probe assumes eager execution, as here.)
            try:
                out = jax.block_until_ready(
                    _dense_dilated_folded(flat, k, dilation, g, block_rows))
                _FOLDED_PATH_OK = True
            except Exception as e:  # noqa: BLE001 - fall back on any lowering issue
                warnings.warn("DenseDilated: lane-dense kernel unavailable "
                              f"({type(e).__name__}); using narrow-layout kernel.")
                _FOLDED_PATH_OK = False
                out = None
    if out is None:
        out = _dense_dilated_narrow(flat, k, dilation)
    return out.reshape(two, B, N, k)


if __name__ == "__main__":
    def ref(ei, kk, dd):
        return ei[:, :, :, : kk * dd : dd]

    # 1) Contract shape (K_in == k*dilation), R % 128 == 0, multi-step grid.
    k1, d1, B1, N1 = 9, 2, 2, 512
    e1 = jax.random.randint(jax.random.PRNGKey(0), (2, B1, N1, k1 * d1),
                            minval=0, maxval=N1, dtype=jnp.int32)
    o1 = jax.block_until_ready(dense_dilated(e1, k=k1, dilation=d1))
    assert o1.shape == (2, B1, N1, k1), o1.shape
    assert o1.dtype == e1.dtype
    assert bool(jnp.all(o1 == ref(e1, k1, d1))), "mismatch (lane-dense path)"

    # 2) dilation == 1 fast path (no kernel launch).
    k2, B2, N2 = 4, 2, 16
    e2 = jax.random.randint(jax.random.PRNGKey(1), (2, B2, N2, k2),
                            minval=0, maxval=N2, dtype=jnp.int32)
    o2 = jax.block_until_ready(dense_dilated(e2, k=k2, dilation=1))
    assert o2.shape == (2, B2, N2, k2) and bool(jnp.all(o2 == e2))

    # 3) Non power-of-two row count (R=400 -> g=100, partial block) and
    #    K_in > k*dilation clamp path.
    k3, d3, B3, N3 = 3, 3, 2, 100
    e3 = jax.random.randint(jax.random.PRNGKey(2), (2, B3, N3, 10),
                            minval=0, maxval=N3, dtype=jnp.int32)
    o3 = jax.block_until_ready(dense_dilated(e3, k=k3, dilation=d3))
    assert o3.shape == (2, B3, N3, k3), o3.shape
    assert bool(jnp.all(o3 == ref(e3, k3, d3))), "mismatch (divisor/clamp path)"

    # 4) Exercise the narrow kernel directly (it is also the safety net used
    #    when the lane-dense gather is unavailable on this jax/libtpu).
    flat3 = e3.reshape(-1, e3.shape[-1])
    o4 = jax.block_until_ready(_dense_dilated_narrow(flat3, k3, d3))
    assert bool(jnp.all(o4.reshape(2, B3, N3, k3) == ref(e3, k3, d3))), \
        "mismatch (narrow path)"

    print("KERNEL_OK")
</pallas_src>

<mosaic_0001>
module attributes {stable_mosaic.version = 11 : i64} {
  func.func @_narrow_select_kernel(%arg0: i32, %arg1: memref<512x18xi32, #tpu.memory_space<vmem>>, %arg2: memref<512x9xi32, #tpu.memory_space<vmem>>) attributes {dimension_semantics = [#tpu.dimension_semantics<parallel>], iteration_bounds = array<i64: 4>, scalar_prefetch = 0 : i64, scratch_operands = 0 : i64, tpu.core_type = #tpu.core_type<tc>, window_params = [{transform_indices = @transform_0, window_bounds = array<i64: 512, 18>}, {transform_indices = @transform_1, window_bounds = array<i64: 512, 9>}]} {
    %c0 = arith.constant 0 : index
    %c0_0 = arith.constant 0 : index
    %0 = vector.load %arg1[%c0, %c0_0] : memref<512x18xi32, #tpu.memory_space<vmem>>, vector<512x18xi32>
    %1 = vector.extract_strided_slice %0 {offsets = [0, 0], sizes = [512, 1], strides = [1, 1]} : vector<512x18xi32> to vector<512x1xi32>
    %2 = vector.extract_strided_slice %0 {offsets = [0, 2], sizes = [512, 1], strides = [1, 1]} : vector<512x18xi32> to vector<512x1xi32>
    %3 = vector.extract_strided_slice %0 {offsets = [0, 4], sizes = [512, 1], strides = [1, 1]} : vector<512x18xi32> to vector<512x1xi32>
    %4 = vector.extract_strided_slice %0 {offsets = [0, 6], sizes = [512, 1], strides = [1, 1]} : vector<512x18xi32> to vector<512x1xi32>
    %5 = vector.extract_strided_slice %0 {offsets = [0, 8], sizes = [512, 1], strides = [1, 1]} : vector<512x18xi32> to vector<512x1xi32>
    %6 = vector.extract_strided_slice %0 {offsets = [0, 10], sizes = [512, 1], strides = [1, 1]} : vector<512x18xi32> to vector<512x1xi32>
    %7 = vector.extract_strided_slice %0 {offsets = [0, 12], sizes = [512, 1], strides = [1, 1]} : vector<512x18xi32> to vector<512x1xi32>
    %8 = vector.extract_strided_slice %0 {offsets = [0, 14], sizes = [512, 1], strides = [1, 1]} : vector<512x18xi32> to vector<512x1xi32>
    %9 = vector.extract_strided_slice %0 {offsets = [0, 16], sizes = [512, 1], strides = [1, 1]} : vector<512x18xi32> to vector<512x1xi32>
    %10 = tpu.concatenate %1, %2, %3, %4, %5, %6, %7, %8, %9 in 1 : vector<512x1xi32>, vector<512x1xi32>, vector<512x1xi32>, vector<512x1xi32>, vector<512x1xi32>, vector<512x1xi32>, vector<512x1xi32>, vector<512x1xi32>, vector<512x1xi32> -> vector<512x9xi32>
    %c0_1 = arith.constant 0 : index
    %c0_2 = arith.constant 0 : index
    %11 = vector.load %arg2[%c0_1, %c0_2] : memref<512x9xi32, #tpu.memory_space<vmem>>, vector<512x9xi32>
    tpu.vector_store %arg2[%c0_1, %c0_2], %10 {strides = array<i32>} : memref<512x9xi32, #tpu.memory_space<vmem>>, vector<512x9xi32>,
    return
  }
  func.func @transform_0(%arg0: i32) -> (i32, i32) {
    %c0_i32 = arith.constant 0 : i32
    %c0_i32_0 = arith.constant 0 : i32
    return %arg0, %c0_i32 : i32, i32
  }
  func.func @transform_1(%arg0: i32) -> (i32, i32) {
    %c0_i32 = arith.constant 0 : i32
    %c0_i32_0 = arith.constant 0 : i32
    return %arg0, %c0_i32 : i32, i32
  }
}

</mosaic_0001>

<bundles_post_ra>
// kernel: tpu_custom_call.1
= control target key start
LH: loop header
LB: loop body
LE: loop exit
PB: predicated region body
PF: predicated region fallthrough
CT: control target
= control target key end

     0   :  { %s2023_s6 = smov 0   ;;  %s5507_s0 = inlined_call_operand.vmem [shape: s32[2048,18], index: 0, kind: input, shape index: {}]   ;;  %s5508_s1 = inlined_call_operand.vmem [shape: s32[2048,9], index: 1, kind: output, shape index: {}]  }
   0x1 LB: > { %s1849_s7 = sadd.s32 4294967295, %s2003_s6   ;;  %p1853_p0 = scmp.ge.s32.totalorder %s2003_s6, 1  ;;  %s2003_s6 = sphi %s2023_s6, %s11_s6  }
   0x2   : > { %p88_p1 = scmp.lt.s32.totalorder %s2003_s6, 5 }
   0x4   : > { %p89_p2 = pnand %p1853_p0, %p88_p1 }
   0x6   : > { %92 = sbr.rel (%p89_p2) target bundleno = 1184 (0x4a0), region = 24 }
   0xb   : > { %s1854_s8 = sshll.u32 %s1849_s7, 6  ;;  %s2005_s13 = smov 127   ;;  %vm1208_vm0 = vcmask 7168   ;;  %vm1273_vm1 = vcmask 15360   ;;  %vm1338_vm2 = vcmask 23552   ;;  %vm1403_vm3 = vcmask 31744  }
   0xc   : > { %p109_p3 = scmp.lt.s32.totalorder %s1854_s8, 255  ;;  %s2006_s14 = smov 126   ;;  %vm1468_vm4 = vcmask 39936   ;;  %vm1533_vm5 = vcmask 48128   ;;  %vm1598_vm6 = vcmask 56320   ;;  %vm1663_vm7 = vcmask 64512  }
   0xd   : > { %s2007_s15 = smov 125   ;;  %s2008_s16 = smov 124   ;;  %vm1728_vm8 = vcmask 72704  }
   0xe   : > { %s6428_s8 = smov (!%p109_p3, %s1854_s8), 255  ;;  %s2009_s17 = smov 123  }
   0xf   : > { %s1855_s9 = sshll.u32 %s6428_s8, 3  ;;  %s2010_s18 = smov 122  }
  0x10   : > { %s2039_s12 = scalar_lea.vmem %s5507_s0, %s1855_s9  ;;  %s2011_s19 = smov 121  }
  0x11   : > { %v2042_v0 = vld [vmem:[%s2039_s12 + $0x10] sm:$0xff]  ;;  %v2045_v1 = vld [vmem:[%s2039_s12] sm:$0xff]  ;;  %v2052_v2 = vld [vmem:[%s2039_s12 + $0x18] sm:$0xff]  ;;  %s2012_s20 = smov 120   ;;  %s4383_s23 = scalar_lea.vmem %s5508_s1, %s1855_s9 }
  0x12   : > { %5553 = vst [vmem:[#allocation2_spill] sm:$0xff] %v2045_v1  ;;  %188 = vrot.lane.b32.xlu1 %v2042_v0, %s2005_s13  ;;  %184 = vrot.lane.b32.xlu0 %v2045_v1, %s2005_s13  ;;  %v2055_v3 = vld [vmem:[%s2039_s12 + $0x8] sm:$0xff]  ;;  %v2065_v5 = vld [vmem:[%s2039_s12 + $0x20] sm:$0xff] }
  0x13   : > { %v2062_v4 = vld [vmem:[%s2039_s12 + $0x28] sm:$0xff]  ;;  %v2072_v6 = vld [vmem:[%s2039_s12 + $0x38] sm:$0xff]  ;;  %v2075_v7 = vld [vmem:[%s2039_s12 + $0x30] sm:$0xff] }
  0x14   : > { %v2082_v8 = vld [vmem:[%s2039_s12 + $0x48] sm:$0xff]  ;;  %v2085_v9 = vld [vmem:[%s2039_s12 + $0x40] sm:$0xff]  ;;  %v2092_v10 = vld [vmem:[%s2039_s12 + $0x58] sm:$0xff] }
  0x15   : > { %v2095_v11 = vld [vmem:[%s2039_s12 + $0x50] sm:$0xff]  ;;  %v2102_v12 = vld [vmem:[%s2039_s12 + $0x68] sm:$0xff]  ;;  %v2105_v13 = vld [vmem:[%s2039_s12 + $0x60] sm:$0xff] }
  0x16   : > { %190 = vrot.lane.b32.xlu1 %v2052_v2, %s2005_s13  ;;  %186 = vrot.lane.b32.xlu0 %v2055_v3, %s2005_s13  ;;  %v2112_v14 = vld [vmem:[%s2039_s12 + $0x78] sm:$0xff]  ;;  %v2115_v15 = vld [vmem:[%s2039_s12 + $0x70] sm:$0xff] }
  0x17   : > { %v2122_v16 = vld [vmem:[%s2039_s12 + $0x88] sm:$0xff]  ;;  %v2125_v17 = vld [vmem:[%s2039_s12 + $0x80] sm:$0xff]  ;;  %v2132_v18 = vld [vmem:[%s2039_s12 + $0x98] sm:$0xff] }
  0x18   : > { %v2135_v19 = vld [vmem:[%s2039_s12 + $0x90] sm:$0xff]  ;;  %v2142_v20 = vld [vmem:[%s2039_s12 + $0xa8] sm:$0xff]  ;;  %v2145_v21 = vld [vmem:[%s2039_s12 + $0xa0] sm:$0xff] }
  0x19   : > { %v2152_v22 = vld [vmem:[%s2039_s12 + $0xb8] sm:$0xff]  ;;  %v2155_v23 = vld [vmem:[%s2039_s12 + $0xb0] sm:$0xff]  ;;  %v2162_v24 = vld [vmem:[%s2039_s12 + $0xc8] sm:$0xff] }
  0x1a   : > { %194 = vrot.lane.b32.xlu1 %v2062_v4, %s2005_s13  ;;  %192 = vrot.lane.b32.xlu0 %v2065_v5, %s2005_s13  ;;  %v2165_v25 = vld [vmem:[%s2039_s12 + $0xc0] sm:$0xff]  ;;  %v2172_v26 = vld [vmem:[%s2039_s12 + $0xd8] sm:$0xff] }
  0x1b   : > { %v2175_v27 = vld [vmem:[%s2039_s12 + $0xd0] sm:$0xff]  ;;  %v2182_v28 = vld [vmem:[%s2039_s12 + $0xe8] sm:$0xff]  ;;  %v2185_v29 = vld [vmem:[%s2039_s12 + $0xe0] sm:$0xff] }
  0x1c   : > { %v2192_v30 = vld [vmem:[%s2039_s12 + $0xf8] sm:$0xff]  ;;  %v2195_v31 = vld [vmem:[%s2039_s12 + $0xf0] sm:$0xff]  ;;  %v2202_v32 = vld [vmem:[%s2039_s12 + $0x108] sm:$0xff] }
  0x1d   : > { %v2205_v33 = vld [vmem:[%s2039_s12 + $0x100] sm:$0xff]  ;;  %v2212_v34 = vld [vmem:[%s2039_s12 + $0x118] sm:$0xff]  ;;  %v2215_v35 = vld [vmem:[%s2039_s12 + $0x110] sm:$0xff] }
  0x1e   : > { %198 = vrot.lane.b32.xlu1 %v2072_v6, %s2005_s13  ;;  %196 = vrot.lane.b32.xlu0 %v2075_v7, %s2005_s13  ;;  %v2222_v36 = vld [vmem:[%s2039_s12 + $0x128] sm:$0xff]  ;;  %v2225_v37 = vld [vmem:[%s2039_s12 + $0x120] sm:$0xff] }
  0x1f   : > { %v2232_v38 = vld [vmem:[%s2039_s12 + $0x138] sm:$0xff]  ;;  %v2235_v39 = vld [vmem:[%s2039_s12 + $0x130] sm:$0xff]  ;;  %v2242_v40 = vld [vmem:[%s2039_s12 + $0x148] sm:$0xff] }
  0x20   : > { %v2245_v41 = vld [vmem:[%s2039_s12 + $0x140] sm:$0xff]  ;;  %v2252_v42 = vld [vmem:[%s2039_s12 + $0x158] sm:$0xff]  ;;  %v2255_v43 = vld [vmem:[%s2039_s12 + $0x150] sm:$0xff] }
  0x21   : > { %v2262_v44 = vld [vmem:[%s2039_s12 + $0x168] sm:$0xff]  ;;  %v2265_v45 = vld [vmem:[%s2039_s12 + $0x160] sm:$0xff]  ;;  %v2272_v46 = vld [vmem:[%s2039_s12 + $0x178] sm:$0xff] }
  0x22   : > { %202 = vrot.lane.b32.xlu1 %v2082_v8, %s2005_s13  ;;  %200 = vrot.lane.b32.xlu0 %v2085_v9, %s2005_s13  ;;  %v2275_v47 = vld [vmem:[%s2039_s12 + $0x170] sm:$0xff]  ;;  %v2282_v48 = vld [vmem:[%s2039_s12 + $0x188] sm:$0xff] }
  0x23   : > { %5554 = vst [vmem:[#allocation3_spill] sm:$0xff] %v2282_v48  ;;  %v2285_v49 = vld [vmem:[%s2039_s12 + $0x180] sm:$0xff]  ;;  %v2292_v50 = vld [vmem:[%s2039_s12 + $0x198] sm:$0xff]  ;;  %v2295_v51 = vld [vmem:[%s2039_s12 + $0x190] sm:$0xff] }
  0x24   : > { %5555 = vst [vmem:[#allocation4_spill] sm:$0xff] %v2285_v49  ;;  %5556 = vst [vmem:[#allocation5_spill] sm:$0xff] %v2292_v50  ;;  %v2302_v52 = vld [vmem:[%s2039_s12 + $0x1a8] sm:$0xff]  ;;  %v2305_v53 = vld [vmem:[%s2039_s12 + $0x1a0] sm:$0xff] }
  0x25   : > { %5557 = vst [vmem:[#allocation6_spill] sm:$0xff] %v2295_v51  ;;  %5558 = vst [vmem:[#allocation7_spill] sm:$0xff] %v2302_v52  ;;  %v2312_v54 = vld [vmem:[%s2039_s12 + $0x1b8] sm:$0xff]  ;;  %v2315_v55 = vld [vmem:[%s2039_s12 + $0x1b0] sm:$0xff] }
  0x26   : > { %206 = vrot.lane.b32.xlu1 %v2092_v10, %s2005_s13  ;;  %204 = vrot.lane.b32.xlu0 %v2095_v11, %s2005_s13  ;;  %5559 = vst [vmem:[#allocation8_spill] sm:$0xff] %v2305_v53  ;;  %5560 = vst [vmem:[#allocation9_spill] sm:$0xff] %v2312_v54  ;;  %v2322_v56 = vld [vmem:[%s2039_s12 + $0x1c8] sm:$0xff]  ;;  %v2325_v57 = vld [vmem:[%s2039_s12 + $0x1c0] sm:$0xff] }
  0x27   : > { %5561 = vst [vmem:[#allocation10_spill] sm:$0xff] %v2315_v55  ;;  %5562 = vst [vmem:[#allocation11_spill] sm:$0xff] %v2322_v56  ;;  %v2332_v58 = vld [vmem:[%s2039_s12 + $0x1d8] sm:$0xff]  ;;  %v2335_v59 = vld [vmem:[%s2039_s12 + $0x1d0] sm:$0xff] }
  0x28   : > { %5563 = vst [vmem:[#allocation12_spill] sm:$0xff] %v2325_v57  ;;  %5564 = vst [vmem:[#allocation13_spill] sm:$0xff] %v2332_v58  ;;  %v2346_v62 = vld [vmem:[%s2039_s12 + $0x1e8] sm:$0xff]  ;;  %v2349_v63 = vld [vmem:[%s2039_s12 + $0x1e0] sm:$0xff] }
  0x29   : > { %5565 = vst [vmem:[#allocation14_spill] sm:$0xff] %v2335_v59 }
  0x2a   : > { %210 = vrot.lane.b32.xlu1 %v2102_v12, %s2005_s13  ;;  %208 = vrot.lane.b32.xlu0 %v2105_v13, %s2005_s13 }
  0x2e   : > { %214 = vrot.lane.b32.xlu1 %v2112_v14, %s2005_s13  ;;  %212 = vrot.lane.b32.xlu0 %v2115_v15, %s2005_s13 }
  0x32   : > { %218 = vrot.lane.b32.xlu1 %v2122_v16, %s2005_s13  ;;  %216 = vrot.lane.b32.xlu0 %v2125_v17, %s2005_s13 }
  0x36   : > { %222 = vrot.lane.b32.xlu1 %v2132_v18, %s2005_s13  ;;  %220 = vrot.lane.b32.xlu0 %v2135_v19, %s2005_s13 }
  0x3a   : > { %226 = vrot.lane.b32.xlu1 %v2142_v20, %s2005_s13  ;;  %224 = vrot.lane.b32.xlu0 %v2145_v21, %s2005_s13 }
  0x3e   : > { %230 = vrot.lane.b32.xlu1 %v2152_v22, %s2005_s13  ;;  %228 = vrot.lane.b32.xlu0 %v2155_v23, %s2005_s13 }
  0x42   : > { %234 = vrot.lane.b32.xlu1 %v2162_v24, %s2005_s13  ;;  %232 = vrot.lane.b32.xlu0 %v2165_v25, %s2005_s13 }
  0x46   : > { %238 = vrot.lane.b32.xlu1 %v2172_v26, %s2005_s13  ;;  %236 = vrot.lane.b32.xlu0 %v2175_v27, %s2005_s13 }
  0x4a   : > { %242 = vrot.lane.b32.xlu1 %v2182_v28, %s2005_s13  ;;  %240 = vrot.lane.b32.xlu0 %v2185_v29, %s2005_s13 }
  0x4e   : > { %246 = vrot.lane.b32.xlu1 %v2192_v30, %s2005_s13  ;;  %244 = vrot.lane.b32.xlu0 %v2195_v31, %s2005_s13 }
  0x52   : > { %250 = vrot.lane.b32.xlu1 %v2202_v32, %s2005_s13  ;;  %248 = vrot.lane.b32.xlu0 %v2205_v33, %s2005_s13 }
  0x56   : > { %254 = vrot.lane.b32.xlu1 %v2212_v34, %s2005_s13  ;;  %252 = vrot.lane.b32.xlu0 %v2215_v35, %s2005_s13 }
  0x5a   : > { %258 = vrot.lane.b32.xlu1 %v2222_v36, %s2005_s13  ;;  %256 = vrot.lane.b32.xlu0 %v2225_v37, %s2005_s13 }
  0x5e   : > { %262 = vrot.lane.b32.xlu1 %v2232_v38, %s2005_s13  ;;  %260 = vrot.lane.b32.xlu0 %v2235_v39, %s2005_s13 }
  0x62   : > { %266 = vrot.lane.b32.xlu1 %v2242_v40, %s2005_s13  ;;  %264 = vrot.lane.b32.xlu0 %v2245_v41, %s2005_s13 }
  0x66   : > { %270 = vrot.lane.b32.xlu1 %v2252_v42, %s2005_s13  ;;  %268 = vrot.lane.b32.xlu0 %v2255_v43, %s2005_s13 }
  0x6a   : > { %274 = vrot.lane.b32.xlu1 %v2262_v44, %s2005_s13  ;;  %272 = vrot.lane.b32.xlu0 %v2265_v45, %s2005_s13 }
  0x6e   : > { %278 = vrot.lane.b32.xlu1 %v2272_v46, %s2005_s13  ;;  %276 = vrot.lane.b32.xlu0 %v2275_v47, %s2005_s13 }
  0x72   : > { %282 = vrot.lane.b32.xlu1 %v2282_v48, %s2005_s13  ;;  %280 = vrot.lane.b32.xlu0 %v2285_v49, %s2005_s13 }
  0x76   : > { %286 = vrot.lane.b32.xlu1 %v2292_v50, %s2005_s13  ;;  %284 = vrot.lane.b32.xlu0 %v2295_v51, %s2005_s13 }
  0x7a   : > { %290 = vrot.lane.b32.xlu1 %v2302_v52, %s2005_s13  ;;  %288 = vrot.lane.b32.xlu0 %v2305_v53, %s2005_s13 }
  0x7e   : > { %294 = vrot.lane.b32.xlu1 %v2312_v54, %s2005_s13  ;;  %292 = vrot.lane.b32.xlu0 %v2315_v55, %s2005_s13 }
  0x82   : > { %298 = vrot.lane.b32.xlu1 %v2322_v56, %s2005_s13  ;;  %296 = vrot.lane.b32.xlu0 %v2325_v57, %s2005_s13 }
  0x84   : > { %v2337_v60 = vpop.permute.xlu1 %188  ;;  %v2339_v61 = vpop.permute.xlu0 %184 }
  0x85   : > { %5566 = vst [vmem:[#allocation15_spill] sm:$0xff] %v2337_v60  ;;  %5567 = vst [vmem:[#allocation16_spill] sm:$0xff] %v2339_v61  ;;  %v2360_v61 = vld [vmem:[%s2039_s12 + $0x1f8] sm:$0xff]  ;;  %v2363_v60 = vld [vmem:[%s2039_s12 + $0x1f0] sm:$0xff] }
  0x86   : > { %302 = vrot.lane.b32.xlu1 %v2332_v58, %s2005_s13  ;;  %300 = vrot.lane.b32.xlu0 %v2335_v59, %s2005_s13 }
  0x88   : > { %v2351_v56 = vpop.permute.xlu1 %190  ;;  %v2353_v57 = vpop.permute.xlu0 %186 }
  0x89   : > { %5568 = vst [vmem:[#allocation17_spill] sm:$0xff] %v2351_v56  ;;  %5569 = vst [vmem:[#allocation18_spill] sm:$0xff] %v2353_v57 }
  0x8a   : > { %306 = vrot.lane.b32.xlu1 %v2346_v62, %s2005_s13  ;;  %304 = vrot.lane.b32.xlu0 %v2349_v63, %s2005_s13 }
  0x8c   : > { %v2365_v58 = vpop.permute.xlu1 %194  ;;  %v2367_v59 = vpop.permute.xlu0 %192 }
  0x8d   : > { %5570 = vst [vmem:[#allocation19_spill] sm:$0xff] %v2365_v58  ;;  %5571 = vst [vmem:[#allocation20_spill] sm:$0xff] %v2367_v59 }
  0x8e   : > { %310 = vrot.lane.b32.xlu1 %v2360_v61, %s2005_s13  ;;  %308 = vrot.lane.b32.xlu0 %v2363_v60, %s2005_s13 }
  0x90   : > { %v2373_v57 = vpop.permute.xlu1 %198  ;;  %v2375_v56 = vpop.permute.xlu0 %196 }
  0x91   : > { %5572 = vst [vmem:[#allocation21_spill] sm:$0xff] %v2373_v57  ;;  %5573 = vst [vmem:[#allocation22_spill] sm:$0xff] %v2375_v56 }
  0x92   : > { %314 = vrot.lane.b32.xlu1 %v2055_v3, %s2006_s14  ;;  %312 = vrot.lane.b32.xlu0 %v2045_v1, %s2006_s14 }
  0x94   : > { %v2381_v58 = vpop.permute.xlu1 %202  ;;  %v2383_v59 = vpop.permute.xlu0 %200 }
  0x95   : > { %5574 = vst [vmem:[#allocation23_spill] sm:$0xff] %v2381_v58  ;;  %5575 = vst [vmem:[#allocation24_spill] sm:$0xff] %v2383_v59 }
  0x96   : > { %318 = vrot.lane.b32.xlu1 %v2052_v2, %s2006_s14  ;;  %316 = vrot.lane.b32.xlu0 %v2042_v0, %s2006_s14 }
  0x98   : > { %v2389_v57 = vpop.permute.xlu1 %206  ;;  %v2391_v56 = vpop.permute.xlu0 %204 }
  0x99   : > { %5576 = vst [vmem:[#allocation25_spill] sm:$0xff] %v2389_v57  ;;  %5577 = vst [vmem:[#allocation26_spill] sm:$0xff] %v2391_v56 }
  0x9a   : > { %322 = vrot.lane.b32.xlu1 %v2062_v4, %s2006_s14  ;;  %320 = vrot.lane.b32.xlu0 %v2065_v5, %s2006_s14 }
  0x9c   : > { %v2397_v1 = vpop.permute.xlu1 %210  ;;  %v2399_v58 = vpop.permute.xlu0 %208 }
  0x9d   : > { %5578 = vst [vmem:[#allocation27_spill] sm:$0xff] %v2397_v1  ;;  %5579 = vst [vmem:[#allocation28_spill] sm:$0xff] %v2399_v58 }
  0x9e   : > { %326 = vrot.lane.b32.xlu1 %v2072_v6, %s2006_s14  ;;  %324 = vrot.lane.b32.xlu0 %v2075_v7, %s2006_s14 }
  0xa0   : > { %v2405_v59 = vpop.permute.xlu1 %214  ;;  %v2407_v57 = vpop.permute.xlu0 %212 }
  0xa1   : > { %5580 = vst [vmem:[#allocation29_spill] sm:$0xff] %v2405_v59  ;;  %5581 = vst [vmem:[#allocation30_spill] sm:$0xff] %v2407_v57 }
  0xa2   : > { %330 = vrot.lane.b32.xlu1 %v2082_v8, %s2006_s14  ;;  %328 = vrot.lane.b32.xlu0 %v2085_v9, %s2006_s14 }
  0xa4   : > { %v2413_v56 = vpop.permute.xlu1 %218  ;;  %v2415_v1 = vpop.permute.xlu0 %216 }
  0xa5   : > { %5582 = vst [vmem:[#allocation31_spill] sm:$0xff] %v2413_v56  ;;  %5583 = vst [vmem:[#allocation32_spill] sm:$0xff] %v2415_v1 }
  0xa6   : > { %334 = vrot.lane.b32.xlu1 %v2092_v10, %s2006_s14  ;;  %332 = vrot.lane.b32.xlu0 %v2095_v11, %s2006_s14 }
  0xa8   : > { %v2421_v58 = vpop.permute.xlu1 %222  ;;  %v2423_v59 = vpop.permute.xlu0 %220 }
  0xa9   : > { %5584 = vst [vmem:[#allocation33_spill] sm:$0xff] %v2421_v58  ;;  %5585 = vst [vmem:[#allocation34_spill] sm:$0xff] %v2423_v59 }
  0xaa   : > { %338 = vrot.lane.b32.xlu1 %v2102_v12, %s2006_s14  ;;  %336 = vrot.lane.b32.xlu0 %v2105_v13, %s2006_s14 }
  0xac   : > { %v2429_v57 = vpop.permute.xlu1 %226  ;;  %v2431_v56 = vpop.permute.xlu0 %224 }
  0xad   : > { %5586 = vst [vmem:[#allocation35_spill] sm:$0xff] %v2429_v57  ;;  %5587 = vst [vmem:[#allocation36_spill] sm:$0xff] %v2431_v56 }
  0xae   : > { %342 = vrot.lane.b32.xlu1 %v2112_v14, %s2006_s14  ;;  %340 = vrot.lane.b32.xlu0 %v2115_v15, %s2006_s14 }
  0xb0   : > { %v2437_v1 = vpop.permute.xlu1 %230  ;;  %v2439_v58 = vpop.permute.xlu0 %228 }
  0xb1   : > { %5588 = vst [vmem:[#allocation37_spill] sm:$0xff] %v2437_v1  ;;  %5589 = vst [vmem:[#allocation38_spill] sm:$0xff] %v2439_v58 }
  0xb2   : > { %346 = vrot.lane.b32.xlu1 %v2122_v16, %s2006_s14  ;;  %344 = vrot.lane.b32.xlu0 %v2125_v17, %s2006_s14 }
  0xb4   : > { %v2445_v59 = vpop.permute.xlu1 %234  ;;  %v2447_v57 = vpop.permute.xlu0 %232 }
  0xb5   : > { %5590 = vst [vmem:[#allocation39_spill] sm:$0xff] %v2445_v59  ;;  %5591 = vst [vmem:[#allocation40_spill] sm:$0xff] %v2447_v57 }
  0xb6   : > { %350 = vrot.lane.b32.xlu1 %v2132_v18, %s2006_s14  ;;  %348 = vrot.lane.b32.xlu0 %v2135_v19, %s2006_s14 }
  0xb8   : > { %v2453_v56 = vpop.permute.xlu1 %238  ;;  %v2455_v1 = vpop.permute.xlu0 %236 }
  0xb9   : > { %5592 = vst [vmem:[#allocation41_spill] sm:$0xff] %v2453_v56  ;;  %5593 = vst [vmem:[#allocation42_spill] sm:$0xff] %v2455_v1 }
  0xba   : > { %354 = vrot.lane.b32.xlu1 %v2142_v20, %s2006_s14  ;;  %352 = vrot.lane.b32.xlu0 %v2145_v21, %s2006_s14 }
  0xbc   : > { %v2461_v58 = vpop.permute.xlu1 %242  ;;  %v2463_v59 = vpop.permute.xlu0 %240 }
  0xbd   : > { %5594 = vst [vmem:[#allocation43_spill] sm:$0xff] %v2461_v58  ;;  %5595 = vst [vmem:[#allocation44_spill] sm:$0xff] %v2463_v59 }
  0xbe   : > { %358 = vrot.lane.b32.xlu1 %v2152_v22, %s2006_s14  ;;  %356 = vrot.lane.b32.xlu0 %v2155_v23, %s2006_s14 }
  0xc0   : > { %v2469_v57 = vpop.permute.xlu1 %246  ;;  %v2471_v56 = vpop.permute.xlu0 %244 }
  0xc1   : > { %5596 = vst [vmem:[#allocation45_spill] sm:$0xff] %v2469_v57  ;;  %5597 = vst [vmem:[#allocation46_spill] sm:$0xff] %v2471_v56 }
  0xc2   : > { %362 = vrot.lane.b32.xlu1 %v2162_v24, %s2006_s14  ;;  %360 = vrot.lane.b32.xlu0 %v2165_v25, %s2006_s14 }
  0xc4   : > { %v2477_v1 = vpop.permute.xlu1 %250  ;;  %v2479_v58 = vpop.permute.xlu0 %248 }
  0xc5   : > { %5598 = vst [vmem:[#allocation47_spill] sm:$0xff] %v2477_v1  ;;  %5599 = vst [vmem:[#allocation48_spill] sm:$0xff] %v2479_v58 }
  0xc6   : > { %366 = vrot.lane.b32.xlu1 %v2172_v26, %s2006_s14  ;;  %364 = vrot.lane.b32.xlu0 %v2175_v27, %s2006_s14 }
  0xc8   : > { %v2485_v59 = vpop.permute.xlu1 %254  ;;  %v2487_v57 = vpop.permute.xlu0 %252 }
  0xc9   : > { %5600 = vst [vmem:[#allocation49_spill] sm:$0xff] %v2485_v59  ;;  %5601 = vst [vmem:[#allocation50_spill] sm:$0xff] %v2487_v57 }
  0xca   : > { %370 = vrot.lane.b32.xlu1 %v2182_v28, %s2006_s14  ;;  %368 = vrot.lane.b32.xlu0 %v2185_v29, %s2006_s14 }
  0xcc   : > { %v2493_v56 = vpop.permute.xlu1 %258  ;;  %v2495_v1 = vpop.permute.xlu0 %256 }
  0xcd   : > { %5602 = vst [vmem:[#allocation51_spill] sm:$0xff] %v2493_v56  ;;  %5603 = vst [vmem:[#allocation52_spill] sm:$0xff] %v2495_v1 }
  0xce   : > { %374 = vrot.lane.b32.xlu1 %v2192_v30, %s2006_s14  ;;  %372 = vrot.lane.b32.xlu0 %v2195_v31, %s2006_s14 }
  0xd0   : > { %v2501_v58 = vpop.permute.xlu1 %262  ;;  %v2503_v59 = vpop.permute.xlu0 %260 }
  0xd1   : > { %5604 = vst [vmem:[#allocation53_spill] sm:$0xff] %v2501_v58  ;;  %5605 = vst [vmem:[#allocation54_spill] sm:$0xff] %v2503_v59 }
  0xd2   : > { %378 = vrot.lane.b32.xlu1 %v2202_v32, %s2006_s14  ;;  %376 = vrot.lane.b32.xlu0 %v2205_v33, %s2006_s14 }
  0xd4   : > { %v2509_v57 = vpop.permute.xlu1 %266  ;;  %v2511_v56 = vpop.permute.xlu0 %264 }
  0xd5   : > { %5606 = vst [vmem:[#allocation55_spill] sm:$0xff] %v2509_v57  ;;  %5607 = vst [vmem:[#allocation56_spill] sm:$0xff] %v2511_v56 }
  0xd6   : > { %382 = vrot.lane.b32.xlu1 %v2212_v34, %s2006_s14  ;;  %380 = vrot.lane.b32.xlu0 %v2215_v35, %s2006_s14 }
  0xd8   : > { %v2517_v1 = vpop.permute.xlu1 %270  ;;  %v2519_v58 = vpop.permute.xlu0 %268 }
  0xd9   : > { %5608 = vst [vmem:[#allocation57_spill] sm:$0xff] %v2517_v1  ;;  %5609 = vst [vmem:[#allocation58_spill] sm:$0xff] %v2519_v58 }
  0xda   : > { %386 = vrot.lane.b32.xlu1 %v2222_v36, %s2006_s14  ;;  %384 = vrot.lane.b32.xlu0 %v2225_v37, %s2006_s14 }
  0xdc   : > { %v2525_v59 = vpop.permute.xlu1 %274  ;;  %v2527_v57 = vpop.permute.xlu0 %272 }
  0xdd   : > { %5610 = vst [vmem:[#allocation59_spill] sm:$0xff] %v2525_v59  ;;  %5611 = vst [vmem:[#allocation60_spill] sm:$0xff] %v2527_v57 }
  0xde   : > { %390 = vrot.lane.b32.xlu1 %v2232_v38, %s2006_s14  ;;  %388 = vrot.lane.b32.xlu0 %v2235_v39, %s2006_s14 }
  0xe0   : > { %v2533_v56 = vpop.permute.xlu1 %278  ;;  %v2535_v1 = vpop.permute.xlu0 %276 }
  0xe1   : > { %5612 = vst [vmem:[#allocation61_spill] sm:$0xff] %v2533_v56  ;;  %5613 = vst [vmem:[#allocation62_spill] sm:$0xff] %v2535_v1 }
  0xe2   : > { %394 = vrot.lane.b32.xlu1 %v2242_v40, %s2006_s14  ;;  %392 = vrot.lane.b32.xlu0 %v2245_v41, %s2006_s14 }
  0xe4   : > { %v2541_v58 = vpop.permute.xlu1 %282  ;;  %v2543_v59 = vpop.permute.xlu0 %280 }
  0xe5   : > { %5614 = vst [vmem:[#allocation63_spill] sm:$0xff] %v2541_v58  ;;  %5615 = vst [vmem:[#allocation64_spill] sm:$0xff] %v2543_v59 }
  0xe6   : > { %398 = vrot.lane.b32.xlu1 %v2252_v42, %s2006_s14  ;;  %396 = vrot.lane.b32.xlu0 %v2255_v43, %s2006_s14 }
  0xe8   : > { %v2549_v57 = vpop.permute.xlu1 %286  ;;  %v2551_v56 = vpop.permute.xlu0 %284 }
  0xe9   : > { %5616 = vst [vmem:[#allocation65_spill] sm:$0xff] %v2549_v57  ;;  %5617 = vst [vmem:[#allocation66_spill] sm:$0xff] %v2551_v56 }
  0xea   : > { %402 = vrot.lane.b32.xlu1 %v2262_v44, %s2006_s14  ;;  %400 = vrot.lane.b32.xlu0 %v2265_v45, %s2006_s14 }
  0xec   : > { %v2557_v1 = vpop.permute.xlu1 %290  ;;  %v2559_v58 = vpop.permute.xlu0 %288 }
  0xed   : > { %5618 = vst [vmem:[#allocation67_spill] sm:$0xff] %v2557_v1  ;;  %5619 = vst [vmem:[#allocation68_spill] sm:$0xff] %v2559_v58 }
  0xee   : > { %406 = vrot.lane.b32.xlu1 %v2272_v46, %s2006_s14  ;;  %404 = vrot.lane.b32.xlu0 %v2275_v47, %s2006_s14 }
  0xf0   : > { %v2565_v59 = vpop.permute.xlu1 %294  ;;  %v2567_v57 = vpop.permute.xlu0 %292 }
  0xf1   : > { %5620 = vst [vmem:[#allocation69_spill] sm:$0xff] %v2565_v59  ;;  %5621 = vst [vmem:[#allocation70_spill] sm:$0xff] %v2567_v57 }
  0xf2   : > { %410 = vrot.lane.b32.xlu1 %v2282_v48, %s2006_s14  ;;  %408 = vrot.lane.b32.xlu0 %v2285_v49, %s2006_s14 }
  0xf4   : > { %v2573_v56 = vpop.permute.xlu1 %298  ;;  %v2575_v1 = vpop.permute.xlu0 %296 }
  0xf5   : > { %5622 = vst [vmem:[#allocation71_spill] sm:$0xff] %v2573_v56  ;;  %5623 = vst [vmem:[#allocation72_spill] sm:$0xff] %v2575_v1 }
  0xf6   : > { %414 = vrot.lane.b32.xlu1 %v2292_v50, %s2006_s14  ;;  %412 = vrot.lane.b32.xlu0 %v2295_v51, %s2006_s14 }
  0xf8   : > { %v2581_v58 = vpop.permute.xlu1 %302  ;;  %v2583_v59 = vpop.permute.xlu0 %300 }
  0xf9   : > { %5624 = vst [vmem:[#allocation73_spill] sm:$0xff] %v2581_v58  ;;  %5625 = vst [vmem:[#allocation74_spill] sm:$0xff] %v2583_v59  ;;  %v5630_v59 = vld [vmem:[#allocation11_spill] sm:$0xff] }
  0xfa   : > { %418 = vrot.lane.b32.xlu1 %v2302_v52, %s2006_s14  ;;  %416 = vrot.lane.b32.xlu0 %v2305_v53, %s2006_s14  ;;  %v5631_v52 = vld [vmem:[#allocation12_spill] sm:$0xff] }
  0xfc   : > { %v2589_v57 = vpop.permute.xlu1 %306  ;;  %v2591_v56 = vpop.permute.xlu0 %304 }
  0xfd   : > { %5626 = vst [vmem:[#allocation75_spill] sm:$0xff] %v2589_v57  ;;  %5627 = vst [vmem:[#allocation76_spill] sm:$0xff] %v2591_v56  ;;  %v5634_v56 = vld [vmem:[#allocation13_spill] sm:$0xff] }
  0xfe   : > { %422 = vrot.lane.b32.xlu1 %v2312_v54, %s2006_s14  ;;  %420 = vrot.lane.b32.xlu0 %v2315_v55, %s2006_s14  ;;  %v5635_v54 = vld [vmem:[#allocation14_spill] sm:$0xff] }
 0x100   : > { %v2597_v1 = vpop.permute.xlu1 %310  ;;  %v2599_v58 = vpop.permute.xlu0 %308 }
 0x101   : > { %5628 = vst [vmem:[#allocation77_spill] sm:$0xff] %v2597_v1  ;;  %5629 = vst [vmem:[#allocation78_spill] sm:$0xff] %v2599_v58 }
 0x102   : > { %426 = vrot.lane.b32.xlu1 %v5630_v59, %s2006_s14  ;;  %424 = vrot.lane.b32.xlu0 %v5631_v52, %s2006_s14 }
 0x104   : > { %v2605_v53 = vpop.permute.xlu1 %314  ;;  %v2607_v57 = vpop.permute.xlu0 %312 }
 0x105   : > { %5632 = vst [vmem:[#allocation11_spill] sm:$0xff] %v2605_v53  ;;  %5633 = vst [vmem:[#allocation12_spill] sm:$0xff] %v2607_v57 }
 0x106   : > { %430 = vrot.lane.b32.xlu1 %v5634_v56, %s2006_s14  ;;  %428 = vrot.lane.b32.xlu0 %v5635_v54, %s2006_s14 }
 0x108   : > { %v2613_v55 = vpop.permute.xlu1 %318  ;;  %v2615_v1 = vpop.permute.xlu0 %316 }
 0x109   : > { %5636 = vst [vmem:[#allocation13_spill] sm:$0xff] %v2613_v55  ;;  %5637 = vst [vmem:[#allocation14_spill] sm:$0xff] %v2615_v1  ;;  %v5642_v1 = vld [vmem:[#allocation2_spill] sm:$0xff] }
 0x10a   : > { %434 = vrot.lane.b32.xlu1 %v2346_v62, %s2006_s14  ;;  %432 = vrot.lane.b32.xlu0 %v2349_v63, %s2006_s14 }
 0x10c   : > { %v2621_v58 = vpop.permute.xlu1 %322  ;;  %v2623_v53 = vpop.permute.xlu0 %320 }
 0x10d   : > { %5638 = vst [vmem:[#allocation79_spill] sm:$0xff] %v2621_v58  ;;  %5639 = vst [vmem:[#allocation80_spill] sm:$0xff] %v2623_v53 }
 0x10e   : > { %438 = vrot.lane.b32.xlu1 %v2360_v61, %s2006_s14  ;;  %436 = vrot.lane.b32.xlu0 %v2363_v60, %s2006_s14 }
 0x110   : > { %v2629_v57 = vpop.permute.xlu1 %326  ;;  %v2631_v55 = vpop.permute.xlu0 %324 }
 0x111   : > { %5640 = vst [vmem:[#allocation81_spill] sm:$0xff] %v2629_v57  ;;  %5641 = vst [vmem:[#allocation82_spill] sm:$0xff] %v2631_v55 }
 0x112   : > { %442 = vrot.lane.b32.xlu1 %v2055_v3, %s2007_s15  ;;  %440 = vrot.lane.b32.xlu0 %v5642_v1, %s2007_s15 }
 0x114   : > { %v2637_v58 = vpop.permute.xlu1 %330  ;;  %v2639_v53 = vpop.permute.xlu0 %328 }
 0x115   : > { %5643 = vst [vmem:[#allocation83_spill] sm:$0xff] %v2637_v58  ;;  %5644 = vst [vmem:[#allocation84_spill] sm:$0xff] %v2639_v53 }
 0x116   : > { %446 = vrot.lane.b32.xlu1 %v2052_v2, %s2007_s15  ;;  %444 = vrot.lane.b32.xlu0 %v2042_v0, %s2007_s15 }
 0x118   : > { %v2645_v57 = vpop.permute.xlu1 %334  ;;  %v2647_v55 = vpop.permute.xlu0 %332 }
 0x119   : > { %5645 = vst [vmem:[#allocation85_spill] sm:$0xff] %v2645_v57  ;;  %5646 = vst [vmem:[#allocation86_spill] sm:$0xff] %v2647_v55 }
 0x11a   : > { %450 = vrot.lane.b32.xlu1 %v2062_v4, %s2007_s15  ;;  %448 = vrot.lane.b32.xlu0 %v2065_v5, %s2007_s15 }
 0x11c   : > { %v2653_v1 = vpop.permute.xlu1 %338  ;;  %v2655_v58 = vpop.permute.xlu0 %336 }
 0x11d   : > { %5647 = vst [vmem:[#allocation87_spill] sm:$0xff] %v2653_v1  ;;  %5648 = vst [vmem:[#allocation88_spill] sm:$0xff] %v2655_v58 }
 0x11e   : > { %454 = vrot.lane.b32.xlu1 %v2072_v6, %s2007_s15  ;;  %452 = vrot.lane.b32.xlu0 %v2075_v7, %s2007_s15 }
 0x120   : > { %v2661_v53 = vpop.permute.xlu1 %342  ;;  %v2663_v57 = vpop.permute.xlu0 %340 }
 0x121   : > { %5649 = vst [vmem:[#allocation89_spill] sm:$0xff] %v2661_v53  ;;  %5650 = vst [vmem:[#allocation90_spill] sm:$0xff] %v2663_v57 }
 0x122   : > { %458 = vrot.lane.b32.xlu1 %v2082_v8, %s2007_s15  ;;  %456 = vrot.lane.b32.xlu0 %v2085_v9, %s2007_s15 }
 0x124   : > { %v2669_v55 = vpop.permute.xlu1 %346  ;;  %v2671_v1 = vpop.permute.xlu0 %344 }
 0x125   : > { %5651 = vst [vmem:[#allocation91_spill] sm:$0xff] %v2669_v55  ;;  %5652 = vst [vmem:[#allocation92_spill] sm:$0xff] %v2671_v1 }
 0x126   : > { %462 = vrot.lane.b32.xlu1 %v2092_v10, %s2007_s15  ;;  %460 = vrot.lane.b32.xlu0 %v2095_v11, %s2007_s15 }
 0x128   : > { %v2677_v58 = vpop.permute.xlu1 %350  ;;  %v2679_v53 = vpop.permute.xlu0 %348 }
 0x129   : > { %5653 = vst [vmem:[#allocation93_spill] sm:$0xff] %v2677_v58  ;;  %5654 = vst [vmem:[#allocation94_spill] sm:$0xff] %v2679_v53 }
 0x12a   : > { %466 = vrot.lane.b32.xlu1 %v2102_v12, %s2007_s15  ;;  %464 = vrot.lane.b32.xlu0 %v2105_v13, %s2007_s15 }
 0x12c   : > { %v2685_v57 = vpop.permute.xlu1 %354  ;;  %v2687_v55 = vpop.permute.xlu0 %352 }
 0x12d   : > { %5655 = vst [vmem:[#allocation95_spill] sm:$0xff] %v2685_v57  ;;  %5656 = vst [vmem:[#allocation96_spill] sm:$0xff] %v2687_v55 }
 0x12e   : > { %470 = vrot.lane.b32.xlu1 %v2112_v14, %s2007_s15  ;;  %468 = vrot.lane.b32.xlu0 %v2115_v15, %s2007_s15 }
 0x130   : > { %v2693_v1 = vpop.permute.xlu1 %358  ;;  %v2695_v58 = vpop.permute.xlu0 %356 }
 0x131   : > { %5657 = vst [vmem:[#allocation97_spill] sm:$0xff] %v2693_v1  ;;  %5658 = vst [vmem:[#allocation98_spill] sm:$0xff] %v2695_v58 }
 0x132   : > { %474 = vrot.lane.b32.xlu1 %v2122_v16, %s2007_s15  ;;  %472 = vrot.lane.b32.xlu0 %v2125_v17, %s2007_s15 }
 0x134   : > { %v2701_v53 = vpop.permute.xlu1 %362  ;;  %v2703_v57 = vpop.permute.xlu0 %360 }
 0x135   : > { %5659 = vst [vmem:[#allocation99_spill] sm:$0xff] %v2701_v53  ;;  %5660 = vst [vmem:[#allocation100_spill] sm:$0xff] %v2703_v57 }
 0x136   : > { %478 = vrot.lane.b32.xlu1 %v2132_v18, %s2007_s15  ;;  %476 = vrot.lane.b32.xlu0 %v2135_v19, %s2007_s15 }
 0x138   : > { %v2709_v55 = vpop.permute.xlu1 %366  ;;  %v2711_v1 = vpop.permute.xlu0 %364 }
 0x139   : > { %5661 = vst [vmem:[#allocation101_spill] sm:$0xff] %v2709_v55  ;;  %5662 = vst [vmem:[#allocation102_spill] sm:$0xff] %v2711_v1 }
 0x13a   : > { %482 = vrot.lane.b32.xlu1 %v2142_v20, %s2007_s15  ;;  %480 = vrot.lane.b32.xlu0 %v2145_v21, %s2007_s15 }
 0x13c   : > { %v2717_v58 = vpop.permute.xlu1 %370  ;;  %v2719_v53 = vpop.permute.xlu0 %368 }
 0x13d   : > { %5663 = vst [vmem:[#allocation103_spill] sm:$0xff] %v2717_v58  ;;  %5664 = vst [vmem:[#allocation104_spill] sm:$0xff] %v2719_v53 }
 0x13e   : > { %486 = vrot.lane.b32.xlu1 %v2152_v22, %s2007_s15  ;;  %484 = vrot.lane.b32.xlu0 %v2155_v23, %s2007_s15 }
 0x140   : > { %v2725_v57 = vpop.permute.xlu1 %374  ;;  %v2727_v55 = vpop.permute.xlu0 %372 }
 0x141   : > { %5665 = vst [vmem:[#allocation105_spill] sm:$0xff] %v2725_v57  ;;  %5666 = vst [vmem:[#allocation106_spill] sm:$0xff] %v2727_v55 }
 0x142   : > { %490 = vrot.lane.b32.xlu1 %v2162_v24, %s2007_s15  ;;  %488 = vrot.lane.b32.xlu0 %v2165_v25, %s2007_s15 }
 0x144   : > { %v2733_v1 = vpop.permute.xlu1 %378  ;;  %v2735_v58 = vpop.permute.xlu0 %376 }
 0x145   : > { %5667 = vst [vmem:[#allocation107_spill] sm:$0xff] %v2733_v1  ;;  %5668 = vst [vmem:[#allocation108_spill] sm:$0xff] %v2735_v58 }
 0x146   : > { %494 = vrot.lane.b32.xlu1 %v2172_v26, %s2007_s15  ;;  %492 = vrot.lane.b32.xlu0 %v2175_v27, %s2007_s15 }
 0x148   : > { %v2741_v53 = vpop.permute.xlu1 %382  ;;  %v2743_v57 = vpop.permute.xlu0 %380 }
 0x149   : > { %5669 = vst [vmem:[#allocation109_spill] sm:$0xff] %v2741_v53  ;;  %5670 = vst [vmem:[#allocation110_spill] sm:$0xff] %v2743_v57 }
 0x14a   : > { %498 = vrot.lane.b32.xlu1 %v2182_v28, %s2007_s15  ;;  %496 = vrot.lane.b32.xlu0 %v2185_v29, %s2007_s15 }
 0x14c   : > { %v2749_v55 = vpop.permute.xlu1 %386  ;;  %v2751_v1 = vpop.permute.xlu0 %384 }
 0x14d   : > { %5671 = vst [vmem:[#allocation111_spill] sm:$0xff] %v2749_v55  ;;  %5672 = vst [vmem:[#allocation112_spill] sm:$0xff] %v2751_v1 }
 0x14e   : > { %502 = vrot.lane.b32.xlu1 %v2192_v30, %s2007_s15  ;;  %500 = vrot.lane.b32.xlu0 %v2195_v31, %s2007_s15 }
 0x150   : > { %v2757_v58 = vpop.permute.xlu1 %390  ;;  %v2759_v53 = vpop.permute.xlu0 %388 }
 0x151   : > { %5673 = vst [vmem:[#allocation113_spill] sm:$0xff] %v2757_v58  ;;  %5674 = vst [vmem:[#allocation114_spill] sm:$0xff] %v2759_v53 }
 0x152   : > { %506 = vrot.lane.b32.xlu1 %v2202_v32, %s2007_s15  ;;  %504 = vrot.lane.b32.xlu0 %v2205_v33, %s2007_s15 }
 0x154   : > { %v2765_v57 = vpop.permute.xlu1 %394  ;;  %v2767_v55 = vpop.permute.xlu0 %392 }
 0x155   : > { %5675 = vst [vmem:[#allocation115_spill] sm:$0xff] %v2765_v57  ;;  %5676 = vst [vmem:[#allocation116_spill] sm:$0xff] %v2767_v55 }
 0x156   : > { %510 = vrot.lane.b32.xlu1 %v2212_v34, %s2007_s15  ;;  %508 = vrot.lane.b32.xlu0 %v2215_v35, %s2007_s15 }
 0x158   : > { %v2773_v1 = vpop.permute.xlu1 %398  ;;  %v2775_v58 = vpop.permute.xlu0 %396 }
 0x159   : > { %5677 = vst [vmem:[#allocation117_spill] sm:$0xff] %v2773_v1  ;;  %5678 = vst [vmem:[#allocation118_spill] sm:$0xff] %v2775_v58 }
 0x15a   : > { %514 = vrot.lane.b32.xlu1 %v2222_v36, %s2007_s15  ;;  %512 = vrot.lane.b32.xlu0 %v2225_v37, %s2007_s15 }
 0x15c   : > { %v2781_v53 = vpop.permute.xlu1 %402  ;;  %v2783_v57 = vpop.permute.xlu0 %400 }
 0x15d   : > { %5679 = vst [vmem:[#allocation119_spill] sm:$0xff] %v2781_v53  ;;  %5680 = vst [vmem:[#allocation120_spill] sm:$0xff] %v2783_v57 }
 0x15e   : > { %518 = vrot.lane.b32.xlu1 %v2232_v38, %s2007_s15  ;;  %516 = vrot.lane.b32.xlu0 %v2235_v39, %s2007_s15 }
 0x160   : > { %v2789_v55 = vpop.permute.xlu1 %406  ;;  %v2791_v1 = vpop.permute.xlu0 %404 }
 0x161   : > { %5681 = vst [vmem:[#allocation121_spill] sm:$0xff] %v2789_v55  ;;  %5682 = vst [vmem:[#allocation122_spill] sm:$0xff] %v2791_v1 }
 0x162   : > { %522 = vrot.lane.b32.xlu1 %v2242_v40, %s2007_s15  ;;  %520 = vrot.lane.b32.xlu0 %v2245_v41, %s2007_s15 }
 0x164   : > { %v2797_v58 = vpop.permute.xlu1 %410  ;;  %v2799_v53 = vpop.permute.xlu0 %408 }
 0x165   : > { %5683 = vst [vmem:[#allocation123_spill] sm:$0xff] %v2797_v58  ;;  %5684 = vst [vmem:[#allocation124_spill] sm:$0xff] %v2799_v53 }
 0x166   : > { %526 = vrot.lane.b32.xlu1 %v2252_v42, %s2007_s15  ;;  %524 = vrot.lane.b32.xlu0 %v2255_v43, %s2007_s15 }
 0x168   : > { %v2805_v57 = vpop.permute.xlu1 %414  ;;  %v2807_v55 = vpop.permute.xlu0 %412 }
 0x169   : > { %5685 = vst [vmem:[#allocation125_spill] sm:$0xff] %v2805_v57  ;;  %5686 = vst [vmem:[#allocation126_spill] sm:$0xff] %v2807_v55 }
 0x16a   : > { %530 = vrot.lane.b32.xlu1 %v2262_v44, %s2007_s15  ;;  %528 = vrot.lane.b32.xlu0 %v2265_v45, %s2007_s15 }
 0x16c   : > { %v2813_v1 = vpop.permute.xlu1 %418  ;;  %v2815_v58 = vpop.permute.xlu0 %416 }
 0x16d   : > { %5687 = vst [vmem:[#allocation127_spill] sm:$0xff] %v2813_v1  ;;  %5688 = vst [vmem:[#allocation128_spill] sm:$0xff] %v2815_v58 }
 0x16e   : > { %534 = vrot.lane.b32.xlu1 %v2272_v46, %s2007_s15  ;;  %532 = vrot.lane.b32.xlu0 %v2275_v47, %s2007_s15 }
 0x170   : > { %v2821_v53 = vpop.permute.xlu1 %422  ;;  %v2823_v57 = vpop.permute.xlu0 %420 }
 0x171   : > { %5689 = vst [vmem:[#allocation129_spill] sm:$0xff] %v2821_v53  ;;  %5690 = vst [vmem:[#allocation130_spill] sm:$0xff] %v2823_v57  ;;  %v5695_v57 = vld [vmem:[#allocation7_spill] sm:$0xff] }
 0x172   : > { %538 = vrot.lane.b32.xlu1 %v2282_v48, %s2007_s15  ;;  %536 = vrot.lane.b32.xlu0 %v2285_v49, %s2007_s15  ;;  %v5696_v48 = vld [vmem:[#allocation8_spill] sm:$0xff] }
 0x174   : > { %v2829_v55 = vpop.permute.xlu1 %426  ;;  %v2831_v1 = vpop.permute.xlu0 %424 }
 0x175   : > { %5691 = vst [vmem:[#allocation131_spill] sm:$0xff] %v2829_v55  ;;  %5692 = vst [vmem:[#allocation132_spill] sm:$0xff] %v2831_v1  ;;  %v5699_v1 = vld [vmem:[#allocation9_spill] sm:$0xff] }
 0x176   : > { %542 = vrot.lane.b32.xlu1 %v2292_v50, %s2007_s15  ;;  %540 = vrot.lane.b32.xlu0 %v2295_v51, %s2007_s15  ;;  %v5700_v50 = vld [vmem:[#allocation10_spill] sm:$0xff] }
 0x178   : > { %v2837_v58 = vpop.permute.xlu1 %430  ;;  %v2839_v53 = vpop.permute.xlu0 %428 }
 0x179   : > { %5693 = vst [vmem:[#allocation133_spill] sm:$0xff] %v2837_v58  ;;  %5694 = vst [vmem:[#allocation134_spill] sm:$0xff] %v2839_v53 }
 0x17a   : > { %546 = vrot.lane.b32.xlu1 %v5695_v57, %s2007_s15  ;;  %544 = vrot.lane.b32.xlu0 %v5696_v48, %s2007_s15 }
 0x17c   : > { %v2845_v49 = vpop.permute.xlu1 %434  ;;  %v2847_v55 = vpop.permute.xlu0 %432 }
 0x17d   : > { %5697 = vst [vmem:[#allocation7_spill] sm:$0xff] %v2845_v49  ;;  %5698 = vst [vmem:[#allocation8_spill] sm:$0xff] %v2847_v55 }
 0x17e   : > { %550 = vrot.lane.b32.xlu1 %v5699_v1, %s2007_s15  ;;  %548 = vrot.lane.b32.xlu0 %v5700_v50, %s2007_s15 }
 0x180   : > { %v2853_v51 = vpop.permute.xlu1 %438  ;;  %v2855_v58 = vpop.permute.xlu0 %436 }
 0x181   : > { %5701 = vst [vmem:[#allocation9_spill] sm:$0xff] %v2853_v51  ;;  %5702 = vst [vmem:[#allocation10_spill] sm:$0xff] %v2855_v58 }
 0x182   : > { %554 = vrot.lane.b32.xlu1 %v5630_v59, %s2007_s15  ;;  %552 = vrot.lane.b32.xlu0 %v5631_v52, %s2007_s15 }
 0x184   : > { %v2861_v53 = vpop.permute.xlu1 %442  ;;  %v2863_v49 = vpop.permute.xlu0 %440 }
 0x185   : > { %5703 = vst [vmem:[#allocation135_spill] sm:$0xff] %v2861_v53  ;;  %5704 = vst [vmem:[#allocation136_spill] sm:$0xff] %v2863_v49 }
 0x186   : > { %558 = vrot.lane.b32.xlu1 %v5634_v56, %s2007_s15  ;;  %556 = vrot.lane.b32.xlu0 %v5635_v54, %s2007_s15 }
 0x188   : > { %v2869_v55 = vpop.permute.xlu1 %446  ;;  %v2871_v51 = vpop.permute.xlu0 %444 }
 0x189   : > { %5705 = vst [vmem:[#allocation137_spill] sm:$0xff] %v2869_v55  ;;  %5706 = vst [vmem:[#allocation138_spill] sm:$0xff] %v2871_v51  ;;  %v5711_v51 = vld [vmem:[#allocation2_spill] sm:$0xff] }
 0x18a   : > { %562 = vrot.lane.b32.xlu1 %v2346_v62, %s2007_s15  ;;  %560 = vrot.lane.b32.xlu0 %v2349_v63, %s2007_s15 }
 0x18c   : > { %v2877_v58 = vpop.permute.xlu1 %450  ;;  %v2879_v53 = vpop.permute.xlu0 %448 }
 0x18d   : > { %5707 = vst [vmem:[#allocation139_spill] sm:$0xff] %v2877_v58  ;;  %5708 = vst [vmem:[#allocation140_spill] sm:$0xff] %v2879_v53 }
 0x18e   : > { %566 = vrot.lane.b32.xlu1 %v2360_v61, %s2007_s15  ;;  %564 = vrot.lane.b32.xlu0 %v2363_v60, %s2007_s15 }
 0x190   : > { %v2885_v49 = vpop.permute.xlu1 %454  ;;  %v2887_v55 = vpop.permute.xlu0 %452 }
 0x191   : > { %5709 = vst [vmem:[#allocation141_spill] sm:$0xff] %v2885_v49  ;;  %5710 = vst [vmem:[#allocation142_spill] sm:$0xff] %v2887_v55 }
 0x192   : > { %570 = vrot.lane.b32.xlu1 %v2055_v3, %s2008_s16  ;;  %568 = vrot.lane.b32.xlu0 %v5711_v51, %s2008_s16 }
 0x194   : > { %v2893_v58 = vpop.permute.xlu1 %458  ;;  %v2895_v53 = vpop.permute.xlu0 %456 }
 0x195   : > { %5712 = vst [vmem:[#allocation2_spill] sm:$0xff] %v2893_v58  ;;  %5713 = vst [vmem:[#allocation143_spill] sm:$0xff] %v2895_v53 }
 0x196   : > { %574 = vrot.lane.b32.xlu1 %v2052_v2, %s2008_s16  ;;  %572 = vrot.lane.b32.xlu0 %v2042_v0, %s2008_s16 }
 0x198   : > { %v2901_v49 = vpop.permute.xlu1 %462  ;;  %v2903_v55 = vpop.permute.xlu0 %460 }
 0x199   : > { %5714 = vst [vmem:[#allocation144_spill] sm:$0xff] %v2901_v49  ;;  %5715 = vst [vmem:[#allocation145_spill] sm:$0xff] %v2903_v55 }
 0x19a   : > { %578 = vrot.lane.b32.xlu1 %v2062_v4, %s2008_s16  ;;  %576 = vrot.lane.b32.xlu0 %v2065_v5, %s2008_s16 }
 0x19c   : > { %v2909_v3 = vpop.permute.xlu1 %466  ;;  %v2911_v51 = vpop.permute.xlu0 %464 }
 0x19d   : > { %5716 = vst [vmem:[#allocation146_spill] sm:$0xff] %v2909_v3  ;;  %5717 = vst [vmem:[#allocation147_spill] sm:$0xff] %v2911_v51 }
 0x19e   : > { %582 = vrot.lane.b32.xlu1 %v2072_v6, %s2008_s16  ;;  %580 = vrot.lane.b32.xlu0 %v2075_v7, %s2008_s16 }
 0x1a0   : > { %v2917_v0 = vpop.permute.xlu1 %470  ;;  %v2919_v2 = vpop.permute.xlu0 %468 }
 0x1a1   : > { %5718 = vst [vmem:[#allocation148_spill] sm:$0xff] %v2917_v0  ;;  %5719 = vst [vmem:[#allocation149_spill] sm:$0xff] %v2919_v2 }
 0x1a2   : > { %586 = vrot.lane.b32.xlu1 %v2082_v8, %s2008_s16  ;;  %584 = vrot.lane.b32.xlu0 %v2085_v9, %s2008_s16 }
 0x1a4   : > { %v2925_v4 = vpop.permute.xlu1 %474  ;;  %v2927_v5 = vpop.permute.xlu0 %472 }
 0x1a5   : > { %5720 = vst [vmem:[#allocation150_spill] sm:$0xff] %v2925_v4  ;;  %5721 = vst [vmem:[#allocation151_spill] sm:$0xff] %v2927_v5 }
 0x1a6   : > { %590 = vrot.lane.b32.xlu1 %v2092_v10, %s2008_s16  ;;  %588 = vrot.lane.b32.xlu0 %v2095_v11, %s2008_s16 }
 0x1a8   : > { %v2933_v6 = vpop.permute.xlu1 %478  ;;  %v2935_v7 = vpop.permute.xlu0 %476 }
 0x1a9   : > { %5722 = vst [vmem:[#allocation152_spill] sm:$0xff] %v2933_v6  ;;  %5723 = vst [vmem:[#allocation153_spill] sm:$0xff] %v2935_v7 }
 0x1aa   : > { %594 = vrot.lane.b32.xlu1 %v2102_v12, %s2008_s16  ;;  %592 = vrot.lane.b32.xlu0 %v2105_v13, %s2008_s16 }
 0x1ac   : > { %v2941_v8 = vpop.permute.xlu1 %482  ;;  %v2943_v9 = vpop.permute.xlu0 %480 }
 0x1ad   : > { %5724 = vst [vmem:[#allocation154_spill] sm:$0xff] %v2941_v8  ;;  %5725 = vst [vmem:[#allocation155_spill] sm:$0xff] %v2943_v9 }
 0x1ae   : > { %598 = vrot.lane.b32.xlu1 %v2112_v14, %s2008_s16  ;;  %596 = vrot.lane.b32.xlu0 %v2115_v15, %s2008_s16 }
 0x1b0   : > { %v2949_v10 = vpop.permute.xlu1 %486  ;;  %v2951_v11 = vpop.permute.xlu0 %484 }
 0x1b1   : > { %5726 = vst [vmem:[#allocation156_spill] sm:$0xff] %v2949_v10  ;;  %5727 = vst [vmem:[#allocation157_spill] sm:$0xff] %v2951_v11 }
 0x1b2   : > { %602 = vrot.lane.b32.xlu1 %v2122_v16, %s2008_s16  ;;  %600 = vrot.lane.b32.xlu0 %v2125_v17, %s2008_s16 }
 0x1b4   : > { %v2957_v12 = vpop.permute.xlu1 %490  ;;  %v2959_v13 = vpop.permute.xlu0 %488 }
 0x1b5   : > { %5728 = vst [vmem:[#allocation158_spill] sm:$0xff] %v2957_v12  ;;  %5729 = vst [vmem:[#allocation159_spill] sm:$0xff] %v2959_v13 }
 0x1b6   : > { %606 = vrot.lane.b32.xlu1 %v2132_v18, %s2008_s16  ;;  %604 = vrot.lane.b32.xlu0 %v2135_v19, %s2008_s16 }
 0x1b8   : > { %v2965_v14 = vpop.permute.xlu1 %494  ;;  %v2967_v15 = vpop.permute.xlu0 %492 }
 0x1b9   : > { %5730 = vst [vmem:[#allocation160_spill] sm:$0xff] %v2965_v14  ;;  %5731 = vst [vmem:[#allocation161_spill] sm:$0xff] %v2967_v15  ;;  %v3272_v15 = vld [vmem:[%s2039_s12 + $0x98] sm:$0xff]  ;;  %v3277_v14 = vld [vmem:[%s2039_s12 + $0x90] sm:$0xff] }
 0x1ba   : > { %610 = vrot.lane.b32.xlu1 %v2142_v20, %s2008_s16  ;;  %608 = vrot.lane.b32.xlu0 %v2145_v21, %s2008_s16 }
 0x1bc   : > { %v2973_v16 = vpop.permute.xlu1 %498  ;;  %v2975_v17 = vpop.permute.xlu0 %496 }
 0x1bd   : > { %5732 = vst [vmem:[#allocation162_spill] sm:$0xff] %v2973_v16  ;;  %5733 = vst [vmem:[#allocation163_spill] sm:$0xff] %v2975_v17 }
 0x1be   : > { %614 = vrot.lane.b32.xlu1 %v2152_v22, %s2008_s16  ;;  %612 = vrot.lane.b32.xlu0 %v2155_v23, %s2008_s16 }
 0x1c0   : > { %v2981_v18 = vpop.permute.xlu1 %502  ;;  %v2983_v19 = vpop.permute.xlu0 %500 }
 0x1c1   : > { %5734 = vst [vmem:[#allocation164_spill] sm:$0xff] %v2981_v18  ;;  %5735 = vst [vmem:[#allocation165_spill] sm:$0xff] %v2983_v19  ;;  %v3258_v19 = vld [vmem:[%s2039_s12 + $0x88] sm:$0xff]  ;;  %v3263_v18 = vld [vmem:[%s2039_s12 + $0x80] sm:$0xff] }
 0x1c2   : > { %618 = vrot.lane.b32.xlu1 %v2162_v24, %s2008_s16  ;;  %616 = vrot.lane.b32.xlu0 %v2165_v25, %s2008_s16 }
 0x1c4   : > { %v2989_v20 = vpop.permute.xlu1 %506  ;;  %v2991_v21 = vpop.permute.xlu0 %504 }
 0x1c5   : > { %5736 = vst [vmem:[#allocation166_spill] sm:$0xff] %v2989_v20  ;;  %5737 = vst [vmem:[#allocation167_spill] sm:$0xff] %v2991_v21 }
 0x1c6   : > { %622 = vrot.lane.b32.xlu1 %v2172_v26, %s2008_s16  ;;  %620 = vrot.lane.b32.xlu0 %v2175_v27, %s2008_s16 }
 0x1c8   : > { %v2997_v22 = vpop.permute.xlu1 %510  ;;  %v2999_v23 = vpop.permute.xlu0 %508 }
 0x1c9   : > { %5738 = vst [vmem:[#allocation168_spill] sm:$0xff] %v2997_v22  ;;  %5739 = vst [vmem:[#allocation169_spill] sm:$0xff] %v2999_v23  ;;  %v3244_v23 = vld [vmem:[%s2039_s12 + $0x78] sm:$0xff]  ;;  %v3249_v22 = vld [vmem:[%s2039_s12 + $0x70] sm:$0xff] }
 0x1ca   : > { %626 = vrot.lane.b32.xlu1 %v2182_v28, %s2008_s16  ;;  %624 = vrot.lane.b32.xlu0 %v2185_v29, %s2008_s16 }
 0x1cc   : > { %v3005_v24 = vpop.permute.xlu1 %514  ;;  %v3007_v25 = vpop.permute.xlu0 %512 }
 0x1cd   : > { %5740 = vst [vmem:[#allocation170_spill] sm:$0xff] %v3005_v24  ;;  %5741 = vst [vmem:[#allocation171_spill] sm:$0xff] %v3007_v25 }
 0x1ce   : > { %630 = vrot.lane.b32.xlu1 %v2192_v30, %s2008_s16  ;;  %628 = vrot.lane.b32.xlu0 %v2195_v31, %s2008_s16 }
 0x1d0   : > { %v3013_v26 = vpop.permute.xlu1 %518  ;;  %v3015_v27 = vpop.permute.xlu0 %516 }
 0x1d1   : > { %5742 = vst [vmem:[#allocation172_spill] sm:$0xff] %v3013_v26  ;;  %5743 = vst [vmem:[#allocation173_spill] sm:$0xff] %v3015_v27  ;;  %v3230_v27 = vld [vmem:[%s2039_s12 + $0x68] sm:$0xff]  ;;  %v3235_v26 = vld [vmem:[%s2039_s12 + $0x60] sm:$0xff] }
 0x1d2   : > { %634 = vrot.lane.b32.xlu1 %v2202_v32, %s2008_s16  ;;  %632 = vrot.lane.b32.xlu0 %v2205_v33, %s2008_s16 }
 0x1d4   : > { %v3021_v28 = vpop.permute.xlu1 %522  ;;  %v3023_v29 = vpop.permute.xlu0 %520 }
 0x1d5   : > { %5744 = vst [vmem:[#allocation174_spill] sm:$0xff] %v3021_v28  ;;  %5745 = vst [vmem:[#allocation175_spill] sm:$0xff] %v3023_v29 }
 0x1d6   : > { %638 = vrot.lane.b32.xlu1 %v2212_v34, %s2008_s16  ;;  %636 = vrot.lane.b32.xlu0 %v2215_v35, %s2008_s16 }
 0x1d8   : > { %v3029_v30 = vpop.permute.xlu1 %526  ;;  %v3031_v31 = vpop.permute.xlu0 %524 }
 0x1d9   : > { %5746 = vst [vmem:[#allocation176_spill] sm:$0xff] %v3029_v30  ;;  %5747 = vst [vmem:[#allocation177_spill] sm:$0xff] %v3031_v31  ;;  %v3216_v31 = vld [vmem:[%s2039_s12 + $0x58] sm:$0xff]  ;;  %v3221_v30 = vld [vmem:[%s2039_s12 + $0x50] sm:$0xff] }
 0x1da   : > { %642 = vrot.lane.b32.xlu1 %v2222_v36, %s2008_s16  ;;  %640 = vrot.lane.b32.xlu0 %v2225_v37, %s2008_s16 }
 0x1dc   : > { %v3037_v32 = vpop.permute.xlu1 %530  ;;  %v3039_v33 = vpop.permute.xlu0 %528 }
 0x1dd   : > { %5748 = vst [vmem:[#allocation178_spill] sm:$0xff] %v3037_v32  ;;  %5749 = vst [vmem:[#allocation179_spill] sm:$0xff] %v3039_v33 }
 0x1de   : > { %646 = vrot.lane.b32.xlu1 %v2232_v38, %s2008_s16  ;;  %644 = vrot.lane.b32.xlu0 %v2235_v39, %s2008_s16 }
 0x1e0   : > { %v3045_v34 = vpop.permute.xlu1 %534  ;;  %v3047_v35 = vpop.permute.xlu0 %532 }
 0x1e1   : > { %5750 = vst [vmem:[#allocation180_spill] sm:$0xff] %v3045_v34  ;;  %5751 = vst [vmem:[#allocation181_spill] sm:$0xff] %v3047_v35  ;;  %v3202_v35 = vld [vmem:[%s2039_s12 + $0x48] sm:$0xff]  ;;  %v3207_v34 = vld [vmem:[%s2039_s12 + $0x40] sm:$0xff] }
 0x1e2   : > { %650 = vrot.lane.b32.xlu1 %v2242_v40, %s2008_s16  ;;  %648 = vrot.lane.b32.xlu0 %v2245_v41, %s2008_s16 }
 0x1e4   : > { %v3053_v36 = vpop.permute.xlu1 %538  ;;  %v3055_v37 = vpop.permute.xlu0 %536 }
 0x1e5   : > { %5752 = vst [vmem:[#allocation182_spill] sm:$0xff] %v3053_v36  ;;  %5753 = vst [vmem:[#allocation183_spill] sm:$0xff] %v3055_v37 }
 0x1e6   : > { %654 = vrot.lane.b32.xlu1 %v2252_v42, %s2008_s16  ;;  %652 = vrot.lane.b32.xlu0 %v2255_v43, %s2008_s16 }
 0x1e8   : > { %v3061_v38 = vpop.permute.xlu1 %542  ;;  %v3063_v39 = vpop.permute.xlu0 %540 }
 0x1e9   : > { %5754 = vst [vmem:[#allocation184_spill] sm:$0xff] %v3061_v38  ;;  %5755 = vst [vmem:[#allocation185_spill] sm:$0xff] %v3063_v39  ;;  %v5760_v39 = vld [vmem:[#allocation3_spill] sm:$0xff]  ;;  %v3193_v38 = vld [vmem:[%s2039_s12 + $0x30] sm:$0xff] }
 0x1ea   : > { %658 = vrot.lane.b32.xlu1 %v2262_v44, %s2008_s16  ;;  %656 = vrot.lane.b32.xlu0 %v2265_v45, %s2008_s16  ;;  %v5761_v44 = vld [vmem:[#allocation4_spill] sm:$0xff] }
 0x1ec   : > { %v3069_v40 = vpop.permute.xlu1 %546  ;;  %v3071_v41 = vpop.permute.xlu0 %544 }
 0x1ed   : > { %5756 = vst [vmem:[#allocation186_spill] sm:$0xff] %v3069_v40  ;;  %5757 = vst [vmem:[#allocation187_spill] sm:$0xff] %v3071_v41  ;;  %v5764_v41 = vld [vmem:[#allocation5_spill] sm:$0xff] }
 0x1ee   : > { %662 = vrot.lane.b32.xlu1 %v2272_v46, %s2008_s16  ;;  %660 = vrot.lane.b32.xlu0 %v2275_v47, %s2008_s16  ;;  %v5765_v46 = vld [vmem:[#allocation6_spill] sm:$0xff] }
 0x1f0   : > { %v3077_v42 = vpop.permute.xlu1 %550  ;;  %v3079_v43 = vpop.permute.xlu0 %548 }
 0x1f1   : > { %5758 = vst [vmem:[#allocation188_spill] sm:$0xff] %v3077_v42  ;;  %5759 = vst [vmem:[#allocation189_spill] sm:$0xff] %v3079_v43  ;;  %v3188_v43 = vld [vmem:[%s2039_s12 + $0x38] sm:$0xff] }
 0x1f2   : > { %666 = vrot.lane.b32.xlu1 %v5760_v39, %s2008_s16  ;;  %664 = vrot.lane.b32.xlu0 %v5761_v44, %s2008_s16 }
 0x1f4   : > { %v3085_v45 = vpop.permute.xlu1 %554  ;;  %v3087_v40 = vpop.permute.xlu0 %552 }
 0x1f5   : > { %5762 = vst [vmem:[#allocation3_spill] sm:$0xff] %v3085_v45  ;;  %5763 = vst [vmem:[#allocation4_spill] sm:$0xff] %v3087_v40 }
 0x1f6   : > { %670 = vrot.lane.b32.xlu1 %v5764_v41, %s2008_s16  ;;  %668 = vrot.lane.b32.xlu0 %v5765_v46, %s2008_s16 }
 0x1f8   : > { %v3093_v47 = vpop.permute.xlu1 %558  ;;  %v3095_v42 = vpop.permute.xlu0 %556 }
 0x1f9   : > { %5766 = vst [vmem:[#allocation5_spill] sm:$0xff] %v3093_v47  ;;  %5767 = vst [vmem:[#allocation6_spill] sm:$0xff] %v3095_v42  ;;  %v3174_v42 = vld [vmem:[%s2039_s12 + $0x28] sm:$0xff]  ;;  %v3179_v47 = vld [vmem:[%s2039_s12 + $0x20] sm:$0xff] }
 0x1fa   : > { %674 = vrot.lane.b32.xlu1 %v5695_v57, %s2008_s16  ;;  %672 = vrot.lane.b32.xlu0 %v5696_v48, %s2008_s16 }
 0x1fc   : > { %v3101_v39 = vpop.permute.xlu1 %562  ;;  %v3103_v44 = vpop.permute.xlu0 %560 }
 0x1fd   : > { %5768 = vst [vmem:[#allocation190_spill] sm:$0xff] %v3101_v39  ;;  %5769 = vst [vmem:[#allocation191_spill] sm:$0xff] %v3103_v44 }
 0x1fe   : > { %678 = vrot.lane.b32.xlu1 %v5699_v1, %s2008_s16  ;;  %676 = vrot.lane.b32.xlu0 %v5700_v50, %s2008_s16 }
 0x200   : > { %v3109_v41 = vpop.permute.xlu1 %566  ;;  %v3111_v46 = vpop.permute.xlu0 %564 }
 0x201   : > { %5770 = vst [vmem:[#allocation192_spill] sm:$0xff] %v3109_v41  ;;  %5771 = vst [vmem:[#allocation193_spill] sm:$0xff] %v3111_v46  ;;  %v3160_v46 = vld [vmem:[%s2039_s12 + $0x18] sm:$0xff]  ;;  %v3165_v41 = vld [vmem:[%s2039_s12 + $0x10] sm:$0xff] }
 0x202   : > { %682 = vrot.lane.b32.xlu1 %v5630_v59, %s2008_s16  ;;  %680 = vrot.lane.b32.xlu0 %v5631_v52, %s2008_s16 }
 0x204   : > { %v3117_v48 = vpop.permute.xlu1 %570  ;;  %v3119_v57 = vpop.permute.xlu0 %568 }
 0x205   : > { %5772 = vst [vmem:[#allocation194_spill] sm:$0xff] %v3117_v48  ;;  %5773 = vst [vmem:[#allocation195_spill] sm:$0xff] %v3119_v57 }
 0x206   : > { %686 = vrot.lane.b32.xlu1 %v5634_v56, %s2008_s16  ;;  %684 = vrot.lane.b32.xlu0 %v5635_v54, %s2008_s16 }
 0x208   : > { %v3125_v1 = vpop.permute.xlu1 %574  ;;  %v3127_v50 = vpop.permute.xlu0 %572 }
 0x209   : > { %5774 = vst [vmem:[#allocation196_spill] sm:$0xff] %v3125_v1  ;;  %5775 = vst [vmem:[#allocation197_spill] sm:$0xff] %v3127_v50 }
 0x20a   : > { %690 = vrot.lane.b32.xlu1 %v2346_v62, %s2008_s16  ;;  %688 = vrot.lane.b32.xlu0 %v2349_v63, %s2008_s16  ;;  %v3146_v62 = vld [vmem:[%s2039_s12 + $0x8] sm:$0xff]  ;;  %v3151_v63 = vld [vmem:[%s2039_s12] sm:$0xff] }
 0x20b   : > { %5780 = vst [vmem:[#allocation202_spill] sm:$0xff] %v3151_v63 }
 0x20c   : > { %v3133_v52 = vpop.permute.xlu1 %578  ;;  %v3135_v59 = vpop.permute.xlu0 %576 }
 0x20d   : > { %5776 = vst [vmem:[#allocation198_spill] sm:$0xff] %v3133_v52  ;;  %5777 = vst [vmem:[#allocation199_spill] sm:$0xff] %v3135_v59 }
 0x20e   : > { %694 = vrot.lane.b32.xlu1 %v2360_v61, %s2008_s16  ;;  %692 = vrot.lane.b32.xlu0 %v2363_v60, %s2008_s16 }
 0x210   : > { %v3141_v54 = vpop.permute.xlu1 %582  ;;  %v3143_v56 = vpop.permute.xlu0 %580 }
 0x211   : > { %5778 = vst [vmem:[#allocation200_spill] sm:$0xff] %v3141_v54  ;;  %5779 = vst [vmem:[#allocation201_spill] sm:$0xff] %v3143_v56 }
 0x212   : > { %698 = vrot.lane.b32.xlu1 %v3146_v62, %s2009_s17  ;;  %696 = vrot.lane.b32.xlu0 %v3151_v63, %s2009_s17 }
 0x214   : > { %v3155_v61 = vpop.permute.xlu1 %586  ;;  %v3157_v60 = vpop.permute.xlu0 %584 }
 0x215   : > { %5781 = vst [vmem:[#allocation203_spill] sm:$0xff] %v3155_v61  ;;  %5782 = vst [vmem:[#allocation204_spill] sm:$0xff] %v3157_v60 }
 0x216   : > { %702 = vrot.lane.b32.xlu1 %v3160_v46, %s2009_s17  ;;  %700 = vrot.lane.b32.xlu0 %v3165_v41, %s2009_s17 }
 0x218   : > { %v3169_v44 = vpop.permute.xlu1 %590  ;;  %v3171_v39 = vpop.permute.xlu0 %588 }
 0x219   : > { %5783 = vst [vmem:[#allocation205_spill] sm:$0xff] %v3169_v44  ;;  %5784 = vst [vmem:[#allocation206_spill] sm:$0xff] %v3171_v39 }
 0x21a   : > { %706 = vrot.lane.b32.xlu1 %v3174_v42, %s2009_s17  ;;  %704 = vrot.lane.b32.xlu0 %v3179_v47, %s2009_s17 }
 0x21c   : > { %v3183_v40 = vpop.permute.xlu1 %594  ;;  %v3185_v45 = vpop.permute.xlu0 %592 }
 0x21d   : > { %5785 = vst [vmem:[#allocation207_spill] sm:$0xff] %v3183_v40  ;;  %5786 = vst [vmem:[#allocation208_spill] sm:$0xff] %v3185_v45 }
 0x21e   : > { %710 = vrot.lane.b32.xlu1 %v3188_v43, %s2009_s17  ;;  %708 = vrot.lane.b32.xlu0 %v3193_v38, %s2009_s17 }
 0x220   : > { %v3197_v37 = vpop.permute.xlu1 %598  ;;  %v3199_v36 = vpop.permute.xlu0 %596 }
 0x221   : > { %5787 = vst [vmem:[#allocation209_spill] sm:$0xff] %v3197_v37  ;;  %5788 = vst [vmem:[#allocation210_spill] sm:$0xff] %v3199_v36 }
 0x222   : > { %714 = vrot.lane.b32.xlu1 %v3202_v35, %s2009_s17  ;;  %712 = vrot.lane.b32.xlu0 %v3207_v34, %s2009_s17 }
 0x224   : > { %v3211_v33 = vpop.permute.xlu1 %602  ;;  %v3213_v32 = vpop.permute.xlu0 %600 }
 0x225   : > { %5789 = vst [vmem:[#allocation211_spill] sm:$0xff] %v3211_v33  ;;  %5790 = vst [vmem:[#allocation212_spill] sm:$0xff] %v3213_v32 }
 0x226   : > { %718 = vrot.lane.b32.xlu1 %v3216_v31, %s2009_s17  ;;  %716 = vrot.lane.b32.xlu0 %v3221_v30, %s2009_s17 }
 0x228   : > { %v3225_v29 = vpop.permute.xlu1 %606  ;;  %v3227_v28 = vpop.permute.xlu0 %604 }
 0x229   : > { %5791 = vst [vmem:[#allocation213_spill] sm:$0xff] %v3225_v29  ;;  %5792 = vst [vmem:[#allocation214_spill] sm:$0xff] %v3227_v28 }
 0x22a   : > { %722 = vrot.lane.b32.xlu1 %v3230_v27, %s2009_s17  ;;  %720 = vrot.lane.b32.xlu0 %v3235_v26, %s2009_s17 }
 0x22c   : > { %v3239_v25 = vpop.permute.xlu1 %610  ;;  %v3241_v24 = vpop.permute.xlu0 %608 }
 0x22d   : > { %5793 = vst [vmem:[#allocation215_spill] sm:$0xff] %v3239_v25  ;;  %5794 = vst [vmem:[#allocation216_spill] sm:$0xff] %v3241_v24 }
 0x22e   : > { %726 = vrot.lane.b32.xlu1 %v3244_v23, %s2009_s17  ;;  %724 = vrot.lane.b32.xlu0 %v3249_v22, %s2009_s17 }
 0x230   : > { %v3253_v21 = vpop.permute.xlu1 %614  ;;  %v3255_v20 = vpop.permute.xlu0 %612 }
 0x231   : > { %5795 = vst [vmem:[#allocation217_spill] sm:$0xff] %v3253_v21  ;;  %5796 = vst [vmem:[#allocation218_spill] sm:$0xff] %v3255_v20 }
 0x232   : > { %730 = vrot.lane.b32.xlu1 %v3258_v19, %s2009_s17  ;;  %728 = vrot.lane.b32.xlu0 %v3263_v18, %s2009_s17 }
 0x234   : > { %v3267_v17 = vpop.permute.xlu1 %618  ;;  %v3269_v16 = vpop.permute.xlu0 %616 }
 0x235   : > { %5797 = vst [vmem:[#allocation219_spill] sm:$0xff] %v3267_v17  ;;  %5798 = vst [vmem:[#allocation220_spill] sm:$0xff] %v3269_v16  ;;  %v3286_v17 = vld [vmem:[%s2039_s12 + $0xa8] sm:$0xff]  ;;  %v3291_v16 = vld [vmem:[%s2039_s12 + $0xa0] sm:$0xff] }
 0x236   : > { %734 = vrot.lane.b32.xlu1 %v3272_v15, %s2009_s17  ;;  %732 = vrot.lane.b32.xlu0 %v3277_v14, %s2009_s17 }
 0x238   : > { %v3281_v13 = vpop.permute.xlu1 %622  ;;  %v3283_v12 = vpop.permute.xlu0 %620 }
 0x239   : > { %5799 = vst [vmem:[#allocation221_spill] sm:$0xff] %v3281_v13  ;;  %5800 = vst [vmem:[#allocation222_spill] sm:$0xff] %v3283_v12  ;;  %v3300_v13 = vld [vmem:[%s2039_s12 + $0xb8] sm:$0xff]  ;;  %v3305_v12 = vld [vmem:[%s2039_s12 + $0xb0] sm:$0xff] }
 0x23a   : > { %738 = vrot.lane.b32.xlu1 %v3286_v17, %s2009_s17  ;;  %736 = vrot.lane.b32.xlu0 %v3291_v16, %s2009_s17 }
 0x23c   : > { %v3295_v20 = vpop.permute.xlu1 %626  ;;  %v3297_v21 = vpop.permute.xlu0 %624 }
 0x23d   : > { %5801 = vst [vmem:[#allocation223_spill] sm:$0xff] %v3295_v20  ;;  %5802 = vst [vmem:[#allocation224_spill] sm:$0xff] %v3297_v21  ;;  %v3314_v20 = vld [vmem:[%s2039_s12 + $0xc8] sm:$0xff]  ;;  %v3319_v21 = vld [vmem:[%s2039_s12 + $0xc0] sm:$0xff] }
 0x23e   : > { %742 = vrot.lane.b32.xlu1 %v3300_v13, %s2009_s17  ;;  %740 = vrot.lane.b32.xlu0 %v3305_v12, %s2009_s17 }
 0x240   : > { %v3309_v11 = vpop.permute.xlu1 %630  ;;  %v3311_v10 = vpop.permute.xlu0 %628 }
 0x241   : > { %5803 = vst [vmem:[#allocation225_spill] sm:$0xff] %v3309_v11  ;;  %5804 = vst [vmem:[#allocation226_spill] sm:$0xff] %v3311_v10  ;;  %v3328_v11 = vld [vmem:[%s2039_s12 + $0xd8] sm:$0xff]  ;;  %v3333_v10 = vld [vmem:[%s2039_s12 + $0xd0] sm:$0xff] }
 0x242   : > { %746 = vrot.lane.b32.xlu1 %v3314_v20, %s2009_s17  ;;  %744 = vrot.lane.b32.xlu0 %v3319_v21, %s2009_s17 }
 0x244   : > { %v3323_v24 = vpop.permute.xlu1 %634  ;;  %v3325_v25 = vpop.permute.xlu0 %632 }
 0x245   : > { %5805 = vst [vmem:[#allocation227_spill] sm:$0xff] %v3323_v24  ;;  %5806 = vst [vmem:[#allocation228_spill] sm:$0xff] %v3325_v25  ;;  %v3342_v24 = vld [vmem:[%s2039_s12 + $0xe8] sm:$0xff]  ;;  %v3347_v25 = vld [vmem:[%s2039_s12 + $0xe0] sm:$0xff] }
 0x246   : > { %750 = vrot.lane.b32.xlu1 %v3328_v11, %s2009_s17  ;;  %748 = vrot.lane.b32.xlu0 %v3333_v10, %s2009_s17 }
 0x248   : > { %v3337_v9 = vpop.permute.xlu1 %638  ;;  %v3339_v8 = vpop.permute.xlu0 %636 }
 0x249   : > { %5807 = vst [vmem:[#allocation229_spill] sm:$0xff] %v3337_v9  ;;  %5808 = vst [vmem:[#allocation230_spill] sm:$0xff] %v3339_v8  ;;  %v3356_v9 = vld [vmem:[%s2039_s12 + $0xf8] sm:$0xff]  ;;  %v3361_v8 = vld [vmem:[%s2039_s12 + $0xf0] sm:$0xff] }
 0x24a   : > { %754 = vrot.lane.b32.xlu1 %v3342_v24, %s2009_s17  ;;  %752 = vrot.lane.b32.xlu0 %v3347_v25, %s2009_s17 }
 0x24c   : > { %v3351_v28 = vpop.permute.xlu1 %642  ;;  %v3353_v29 = vpop.permute.xlu0 %640 }
 0x24d   : > { %5809 = vst [vmem:[#allocation231_spill] sm:$0xff] %v3351_v28  ;;  %5810 = vst [vmem:[#allocation232_spill] sm:$0xff] %v3353_v29  ;;  %v3370_v28 = vld [vmem:[%s2039_s12 + $0x108] sm:$0xff]  ;;  %v3375_v29 = vld [vmem:[%s2039_s12 + $0x100] sm:$0xff] }
 0x24e   : > { %758 = vrot.lane.b32.xlu1 %v3356_v9, %s2009_s17  ;;  %756 = vrot.lane.b32.xlu0 %v3361_v8, %s2009_s17 }
 0x250   : > { %v3365_v7 = vpop.permute.xlu1 %646  ;;  %v3367_v6 = vpop.permute.xlu0 %644 }
 0x251   : > { %5811 = vst [vmem:[#allocation233_spill] sm:$0xff] %v3365_v7  ;;  %5812 = vst [vmem:[#allocation234_spill] sm:$0xff] %v3367_v6  ;;  %v3384_v7 = vld [vmem:[%s2039_s12 + $0x118] sm:$0xff]  ;;  %v3389_v6 = vld [vmem:[%s2039_s12 + $0x110] sm:$0xff] }
 0x252   : > { %762 = vrot.lane.b32.xlu1 %v3370_v28, %s2009_s17  ;;  %760 = vrot.lane.b32.xlu0 %v3375_v29, %s2009_s17 }
 0x254   : > { %v3379_v32 = vpop.permute.xlu1 %650  ;;  %v3381_v33 = vpop.permute.xlu0 %648 }
 0x255   : > { %5813 = vst [vmem:[#allocation235_spill] sm:$0xff] %v3379_v32  ;;  %5814 = vst [vmem:[#allocation236_spill] sm:$0xff] %v3381_v33  ;;  %v3398_v32 = vld [vmem:[%s2039_s12 + $0x128] sm:$0xff]  ;;  %v3403_v33 = vld [vmem:[%s2039_s12 + $0x120] sm:$0xff] }
 0x256   : > { %766 = vrot.lane.b32.xlu1 %v3384_v7, %s2009_s17  ;;  %764 = vrot.lane.b32.xlu0 %v3389_v6, %s2009_s17 }
 0x258   : > { %v3393_v5 = vpop.permute.xlu1 %654  ;;  %v3395_v4 = vpop.permute.xlu0 %652 }
 0x259   : > { %5815 = vst [vmem:[#allocation237_spill] sm:$0xff] %v3393_v5  ;;  %5816 = vst [vmem:[#allocation238_spill] sm:$0xff] %v3395_v4  ;;  %v3412_v5 = vld [vmem:[%s2039_s12 + $0x138] sm:$0xff]  ;;  %v3417_v4 = vld [vmem:[%s2039_s12 + $0x130] sm:$0xff] }
 0x25a   : > { %770 = vrot.lane.b32.xlu1 %v3398_v32, %s2009_s17  ;;  %768 = vrot.lane.b32.xlu0 %v3403_v33, %s2009_s17 }
 0x25c   : > { %v3407_v36 = vpop.permute.xlu1 %658  ;;  %v3409_v37 = vpop.permute.xlu0 %656 }
 0x25d   : > { %5817 = vst [vmem:[#allocation239_spill] sm:$0xff] %v3407_v36  ;;  %5818 = vst [vmem:[#allocation240_spill] sm:$0xff] %v3409_v37  ;;  %v3426_v36 = vld [vmem:[%s2039_s12 + $0x148] sm:$0xff]  ;;  %v3431_v37 = vld [vmem:[%s2039_s12 + $0x140] sm:$0xff] }
 0x25e   : > { %774 = vrot.lane.b32.xlu1 %v3412_v5, %s2009_s17  ;;  %772 = vrot.lane.b32.xlu0 %v3417_v4, %s2009_s17 }
 0x260   : > { %v3421_v2 = vpop.permute.xlu1 %662  ;;  %v3423_v0 = vpop.permute.xlu0 %660 }
 0x261   : > { %5819 = vst [vmem:[#allocation241_spill] sm:$0xff] %v3421_v2  ;;  %5820 = vst [vmem:[#allocation242_spill] sm:$0xff] %v3423_v0  ;;  %v3440_v2 = vld [vmem:[%s2039_s12 + $0x158] sm:$0xff]  ;;  %v3445_v0 = vld [vmem:[%s2039_s12 + $0x150] sm:$0xff] }
 0x262   : > { %778 = vrot.lane.b32.xlu1 %v3426_v36, %s2009_s17  ;;  %776 = vrot.lane.b32.xlu0 %v3431_v37, %s2009_s17 }
 0x264   : > { %v3435_v45 = vpop.permute.xlu1 %666  ;;  %v3437_v40 = vpop.permute.xlu0 %664 }
 0x265   : > { %5821 = vst [vmem:[#allocation243_spill] sm:$0xff] %v3435_v45  ;;  %5822 = vst [vmem:[#allocation244_spill] sm:$0xff] %v3437_v40  ;;  %v3454_v45 = vld [vmem:[%s2039_s12 + $0x168] sm:$0xff]  ;;  %v3459_v40 = vld [vmem:[%s2039_s12 + $0x160] sm:$0xff] }
 0x266   : > { %782 = vrot.lane.b32.xlu1 %v3440_v2, %s2009_s17  ;;  %780 = vrot.lane.b32.xlu0 %v3445_v0, %s2009_s17 }
 0x268   : > { %v3449_v51 = vpop.permute.xlu1 %670  ;;  %v3451_v3 = vpop.permute.xlu0 %668 }
 0x269   : > { %5823 = vst [vmem:[#allocation245_spill] sm:$0xff] %v3449_v51  ;;  %5824 = vst [vmem:[#allocation246_spill] sm:$0xff] %v3451_v3  ;;  %v3468_v51 = vld [vmem:[%s2039_s12 + $0x178] sm:$0xff]  ;;  %v3473_v3 = vld [vmem:[%s2039_s12 + $0x170] sm:$0xff] }
 0x26a   : > { %786 = vrot.lane.b32.xlu1 %v3454_v45, %s2009_s17  ;;  %784 = vrot.lane.b32.xlu0 %v3459_v40, %s2009_s17 }
 0x26c   : > { %v3463_v39 = vpop.permute.xlu1 %674  ;;  %v3465_v44 = vpop.permute.xlu0 %672 }
 0x26d   : > { %5825 = vst [vmem:[#allocation247_spill] sm:$0xff] %v3463_v39  ;;  %5826 = vst [vmem:[#allocation248_spill] sm:$0xff] %v3465_v44  ;;  %v3482_v39 = vld [vmem:[%s2039_s12 + $0x188] sm:$0xff]  ;;  %v3487_v44 = vld [vmem:[%s2039_s12 + $0x180] sm:$0xff] }
 0x26e   : > { %790 = vrot.lane.b32.xlu1 %v3468_v51, %s2009_s17  ;;  %788 = vrot.lane.b32.xlu0 %v3473_v3, %s2009_s17  ;;  %5829 = vst [vmem:[#allocation251_spill] sm:$0xff] %v3482_v39  ;;  %5830 = vst [vmem:[#allocation252_spill] sm:$0xff] %v3487_v44 }
 0x270   : > { %v3477_v55 = vpop.permute.xlu1 %678  ;;  %v3479_v49 = vpop.permute.xlu0 %676 }
 0x271   : > { %5827 = vst [vmem:[#allocation249_spill] sm:$0xff] %v3477_v55  ;;  %5828 = vst [vmem:[#allocation250_spill] sm:$0xff] %v3479_v49  ;;  %v3496_v55 = vld [vmem:[%s2039_s12 + $0x198] sm:$0xff]  ;;  %v3501_v49 = vld [vmem:[%s2039_s12 + $0x190] sm:$0xff] }
 0x272   : > { %794 = vrot.lane.b32.xlu1 %v3482_v39, %s2009_s17  ;;  %792 = vrot.lane.b32.xlu0 %v3487_v44, %s2009_s17  ;;  %5833 = vst [vmem:[#allocation255_spill] sm:$0xff] %v3501_v49 }
 0x274   : > { %v3491_v60 = vpop.permute.xlu1 %682  ;;  %v3493_v61 = vpop.permute.xlu0 %680 }
 0x275   : > { %5831 = vst [vmem:[#allocation253_spill] sm:$0xff] %v3491_v60  ;;  %5832 = vst [vmem:[#allocation254_spill] sm:$0xff] %v3493_v61  ;;  %v3510_v60 = vld [vmem:[%s2039_s12 + $0x1a8] sm:$0xff]  ;;  %v3515_v61 = vld [vmem:[%s2039_s12 + $0x1a0] sm:$0xff] }
 0x276   : > { %798 = vrot.lane.b32.xlu1 %v3496_v55, %s2009_s17  ;;  %796 = vrot.lane.b32.xlu0 %v3501_v49, %s2009_s17  ;;  %5836 = vst [vmem:[#allocation258_spill] sm:$0xff] %v3510_v60  ;;  %5837 = vst [vmem:[#allocation259_spill] sm:$0xff] %v3515_v61 }
 0x278   : > { %v3505_v53 = vpop.permute.xlu1 %686  ;;  %v3507_v58 = vpop.permute.xlu0 %684 }
 0x279   : > { %5834 = vst [vmem:[#allocation256_spill] sm:$0xff] %v3505_v53  ;;  %5835 = vst [vmem:[#allocation257_spill] sm:$0xff] %v3507_v58  ;;  %v3524_v53 = vld [vmem:[%s2039_s12 + $0x1b8] sm:$0xff]  ;;  %v3529_v58 = vld [vmem:[%s2039_s12 + $0x1b0] sm:$0xff] }
 0x27a   : > { %802 = vrot.lane.b32.xlu1 %v3510_v60, %s2009_s17  ;;  %800 = vrot.lane.b32.xlu0 %v3515_v61, %s2009_s17  ;;  %5840 = vst [vmem:[#allocation262_spill] sm:$0xff] %v3529_v58 }
 0x27c   : > { %v3519_v56 = vpop.permute.xlu1 %690  ;;  %v3521_v54 = vpop.permute.xlu0 %688 }
 0x27d   : > { %5838 = vst [vmem:[#allocation260_spill] sm:$0xff] %v3519_v56  ;;  %5839 = vst [vmem:[#allocation261_spill] sm:$0xff] %v3521_v54  ;;  %v3538_v56 = vld [vmem:[%s2039_s12 + $0x1c8] sm:$0xff]  ;;  %v3543_v54 = vld [vmem:[%s2039_s12 + $0x1c0] sm:$0xff] }
 0x27e   : > { %806 = vrot.lane.b32.xlu1 %v3524_v53, %s2009_s17  ;;  %804 = vrot.lane.b32.xlu0 %v3529_v58, %s2009_s17  ;;  %5843 = vst [vmem:[#allocation265_spill] sm:$0xff] %v3538_v56  ;;  %5844 = vst [vmem:[#allocation266_spill] sm:$0xff] %v3543_v54 }
 0x280   : > { %v3533_v59 = vpop.permute.xlu1 %694  ;;  %v3535_v52 = vpop.permute.xlu0 %692 }
 0x281   : > { %5841 = vst [vmem:[#allocation263_spill] sm:$0xff] %v3533_v59  ;;  %5842 = vst [vmem:[#allocation264_spill] sm:$0xff] %v3535_v52  ;;  %v3552_v59 = vld [vmem:[%s2039_s12 + $0x1d8] sm:$0xff]  ;;  %v3557_v52 = vld [vmem:[%s2039_s12 + $0x1d0] sm:$0xff] }
 0x282   : > { %810 = vrot.lane.b32.xlu1 %v3538_v56, %s2009_s17  ;;  %808 = vrot.lane.b32.xlu0 %v3543_v54, %s2009_s17  ;;  %5847 = vst [vmem:[#allocation269_spill] sm:$0xff] %v3552_v59  ;;  %5848 = vst [vmem:[#allocation270_spill] sm:$0xff] %v3557_v52  ;;  %v3566_v54 = vld [vmem:[%s2039_s12 + $0x1e8] sm:$0xff]  ;;  %v3580_v56 = vld [vmem:[%s2039_s12 + $0x1f8] sm:$0xff] }
 0x283   : > { %5851 = vst [vmem:[#allocation273_spill] sm:$0xff] %v3566_v54 }
 0x284   : > { %v3547_v50 = vpop.permute.xlu1 %698  ;;  %v3549_v1 = vpop.permute.xlu0 %696 }
 0x285   : > { %5845 = vst [vmem:[#allocation267_spill] sm:$0xff] %v3547_v50  ;;  %5846 = vst [vmem:[#allocation268_spill] sm:$0xff] %v3549_v1  ;;  %v3571_v1 = vld [vmem:[%s2039_s12 + $0x1e0] sm:$0xff] }
 0x286   : > { %814 = vrot.lane.b32.xlu1 %v3552_v59, %s2009_s17  ;;  %812 = vrot.lane.b32.xlu0 %v3557_v52, %s2009_s17  ;;  %5852 = vst [vmem:[#allocation274_spill] sm:$0xff] %v3571_v1 }
 0x288   : > { %v3561_v57 = vpop.permute.xlu1 %702  ;;  %v3563_v48 = vpop.permute.xlu0 %700 }
 0x289   : > { %5849 = vst [vmem:[#allocation271_spill] sm:$0xff] %v3561_v57  ;;  %5850 = vst [vmem:[#allocation272_spill] sm:$0xff] %v3563_v48  ;;  %v3585_v48 = vld [vmem:[%s2039_s12 + $0x1f0] sm:$0xff] }
 0x28a   : > { %818 = vrot.lane.b32.xlu1 %v3566_v54, %s2009_s17  ;;  %816 = vrot.lane.b32.xlu0 %v3571_v1, %s2009_s17  ;;  %5855 = vst [vmem:[#allocation277_spill] sm:$0xff] %v3585_v48 }
 0x28c   : > { %v3575_v50 = vpop.permute.xlu1 %706  ;;  %v3577_v59 = vpop.permute.xlu0 %704 }
 0x28d   : > { %5853 = vst [vmem:[#allocation275_spill] sm:$0xff] %v3575_v50  ;;  %5854 = vst [vmem:[#allocation276_spill] sm:$0xff] %v3577_v59 }
 0x28e   : > { %822 = vrot.lane.b32.xlu1 %v3580_v56, %s2009_s17  ;;  %820 = vrot.lane.b32.xlu0 %v3585_v48, %s2009_s17 }
 0x290   : > { %v3589_v57 = vpop.permute.xlu1 %710  ;;  %v3591_v54 = vpop.permute.xlu0 %708 }
 0x291   : > { %5856 = vst [vmem:[#allocation278_spill] sm:$0xff] %v3589_v57  ;;  %5857 = vst [vmem:[#allocation279_spill] sm:$0xff] %v3591_v54 }
 0x292   : > { %826 = vrot.lane.b32.xlu1 %v3146_v62, %s2010_s18  ;;  %824 = vrot.lane.b32.xlu0 %v3151_v63, %s2010_s18 }
 0x294   : > { %v3597_v59 = vpop.permute.xlu1 %714  ;;  %v3599_v50 = vpop.permute.xlu0 %712 }
 0x295   : > { %5858 = vst [vmem:[#allocation280_spill] sm:$0xff] %v3597_v59  ;;  %5859 = vst [vmem:[#allocation281_spill] sm:$0xff] %v3599_v50 }
 0x296   : > { %830 = vrot.lane.b32.xlu1 %v3160_v46, %s2010_s18  ;;  %828 = vrot.lane.b32.xlu0 %v3165_v41, %s2010_s18 }
 0x298   : > { %v3605_v57 = vpop.permute.xlu1 %718  ;;  %v3607_v54 = vpop.permute.xlu0 %716 }
 0x299   : > { %5860 = vst [vmem:[#allocation282_spill] sm:$0xff] %v3605_v57  ;;  %5861 = vst [vmem:[#allocation283_spill] sm:$0xff] %v3607_v54 }
 0x29a   : > { %834 = vrot.lane.b32.xlu1 %v3174_v42, %s2010_s18  ;;  %832 = vrot.lane.b32.xlu0 %v3179_v47, %s2010_s18 }
 0x29c   : > { %v3613_v63 = vpop.permute.xlu1 %722  ;;  %v3615_v59 = vpop.permute.xlu0 %720 }
 0x29d   : > { %5862 = vst [vmem:[#allocation284_spill] sm:$0xff] %v3613_v63  ;;  %5863 = vst [vmem:[#allocation285_spill] sm:$0xff] %v3615_v59 }
 0x29e   : > { %838 = vrot.lane.b32.xlu1 %v3188_v43, %s2010_s18  ;;  %836 = vrot.lane.b32.xlu0 %v3193_v38, %s2010_s18 }
 0x2a0   : > { %v3621_v50 = vpop.permute.xlu1 %726  ;;  %v3623_v57 = vpop.permute.xlu0 %724 }
 0x2a1   : > { %5864 = vst [vmem:[#allocation286_spill] sm:$0xff] %v3621_v50  ;;  %5865 = vst [vmem:[#allocation287_spill] sm:$0xff] %v3623_v57 }
 0x2a2   : > { %842 = vrot.lane.b32.xlu1 %v3202_v35, %s2010_s18  ;;  %840 = vrot.lane.b32.xlu0 %v3207_v34, %s2010_s18 }
 0x2a4   : > { %v3629_v54 = vpop.permute.xlu1 %730  ;;  %v3631_v63 = vpop.permute.xlu0 %728 }
 0x2a5   : > { %5866 = vst [vmem:[#allocation288_spill] sm:$0xff] %v3629_v54  ;;  %5867 = vst [vmem:[#allocation289_spill] sm:$0xff] %v3631_v63 }
 0x2a6   : > { %846 = vrot.lane.b32.xlu1 %v3216_v31, %s2010_s18  ;;  %844 = vrot.lane.b32.xlu0 %v3221_v30, %s2010_s18 }
 0x2a8   : > { %v3637_v59 = vpop.permute.xlu1 %734  ;;  %v3639_v50 = vpop.permute.xlu0 %732 }
 0x2a9   : > { %5868 = vst [vmem:[#allocation290_spill] sm:$0xff] %v3637_v59  ;;  %5869 = vst [vmem:[#allocation291_spill] sm:$0xff] %v3639_v50 }
 0x2aa   : > { %850 = vrot.lane.b32.xlu1 %v3230_v27, %s2010_s18  ;;  %848 = vrot.lane.b32.xlu0 %v3235_v26, %s2010_s18 }
 0x2ac   : > { %v3645_v57 = vpop.permute.xlu1 %738  ;;  %v3647_v54 = vpop.permute.xlu0 %736 }
 0x2ad   : > { %5870 = vst [vmem:[#allocation292_spill] sm:$0xff] %v3645_v57  ;;  %5871 = vst [vmem:[#allocation293_spill] sm:$0xff] %v3647_v54 }
 0x2ae   : > { %854 = vrot.lane.b32.xlu1 %v3244_v23, %s2010_s18  ;;  %852 = vrot.lane.b32.xlu0 %v3249_v22, %s2010_s18 }
 0x2b0   : > { %v3653_v63 = vpop.permute.xlu1 %742  ;;  %v3655_v59 = vpop.permute.xlu0 %740 }
 0x2b1   : > { %5872 = vst [vmem:[#allocation294_spill] sm:$0xff] %v3653_v63  ;;  %5873 = vst [vmem:[#allocation295_spill] sm:$0xff] %v3655_v59 }
 0x2b2   : > { %858 = vrot.lane.b32.xlu1 %v3258_v19, %s2010_s18  ;;  %856 = vrot.lane.b32.xlu0 %v3263_v18, %s2010_s18 }
 0x2b4   : > { %v3661_v50 = vpop.permute.xlu1 %746  ;;  %v3663_v57 = vpop.permute.xlu0 %744 }
 0x2b5   : > { %5874 = vst [vmem:[#allocation296_spill] sm:$0xff] %v3661_v50  ;;  %5875 = vst [vmem:[#allocation297_spill] sm:$0xff] %v3663_v57 }
 0x2b6   : > { %862 = vrot.lane.b32.xlu1 %v3272_v15, %s2010_s18  ;;  %860 = vrot.lane.b32.xlu0 %v3277_v14, %s2010_s18 }
 0x2b8   : > { %v3669_v54 = vpop.permute.xlu1 %750  ;;  %v3671_v63 = vpop.permute.xlu0 %748 }
 0x2b9   : > { %5876 = vst [vmem:[#allocation298_spill] sm:$0xff] %v3669_v54  ;;  %5877 = vst [vmem:[#allocation299_spill] sm:$0xff] %v3671_v63 }
 0x2ba   : > { %866 = vrot.lane.b32.xlu1 %v3286_v17, %s2010_s18  ;;  %864 = vrot.lane.b32.xlu0 %v3291_v16, %s2010_s18 }
 0x2bc   : > { %v3677_v59 = vpop.permute.xlu1 %754  ;;  %v3679_v50 = vpop.permute.xlu0 %752 }
 0x2bd   : > { %5878 = vst [vmem:[#allocation300_spill] sm:$0xff] %v3677_v59  ;;  %5879 = vst [vmem:[#allocation301_spill] sm:$0xff] %v3679_v50 }
 0x2be   : > { %870 = vrot.lane.b32.xlu1 %v3300_v13, %s2010_s18  ;;  %868 = vrot.lane.b32.xlu0 %v3305_v12, %s2010_s18 }
 0x2c0   : > { %v3685_v57 = vpop.permute.xlu1 %758  ;;  %v3687_v54 = vpop.permute.xlu0 %756 }
 0x2c1   : > { %5880 = vst [vmem:[#allocation302_spill] sm:$0xff] %v3685_v57  ;;  %5881 = vst [vmem:[#allocation303_spill] sm:$0xff] %v3687_v54 }
 0x2c2   : > { %874 = vrot.lane.b32.xlu1 %v3314_v20, %s2010_s18  ;;  %872 = vrot.lane.b32.xlu0 %v3319_v21, %s2010_s18 }
 0x2c4   : > { %v3693_v63 = vpop.permute.xlu1 %762  ;;  %v3695_v59 = vpop.permute.xlu0 %760 }
 0x2c5   : > { %5882 = vst [vmem:[#allocation304_spill] sm:$0xff] %v3693_v63  ;;  %5883 = vst [vmem:[#allocation305_spill] sm:$0xff] %v3695_v59 }
 0x2c6   : > { %878 = vrot.lane.b32.xlu1 %v3328_v11, %s2010_s18  ;;  %876 = vrot.lane.b32.xlu0 %v3333_v10, %s2010_s18 }
 0x2c8   : > { %v3701_v50 = vpop.permute.xlu1 %766  ;;  %v3703_v57 = vpop.permute.xlu0 %764 }
 0x2c9   : > { %5884 = vst [vmem:[#allocation306_spill] sm:$0xff] %v3701_v50  ;;  %5885 = vst [vmem:[#allocation307_spill] sm:$0xff] %v3703_v57 }
 0x2ca   : > { %882 = vrot.lane.b32.xlu1 %v3342_v24, %s2010_s18  ;;  %880 = vrot.lane.b32.xlu0 %v3347_v25, %s2010_s18 }
 0x2cc   : > { %v3709_v54 = vpop.permute.xlu1 %770  ;;  %v3711_v63 = vpop.permute.xlu0 %768 }
 0x2cd   : > { %5886 = vst [vmem:[#allocation308_spill] sm:$0xff] %v3709_v54  ;;  %5887 = vst [vmem:[#allocation309_spill] sm:$0xff] %v3711_v63 }
 0x2ce   : > { %886 = vrot.lane.b32.xlu1 %v3356_v9, %s2010_s18  ;;  %884 = vrot.lane.b32.xlu0 %v3361_v8, %s2010_s18 }
 0x2d0   : > { %v3717_v59 = vpop.permute.xlu1 %774  ;;  %v3719_v50 = vpop.permute.xlu0 %772 }
 0x2d1   : > { %5888 = vst [vmem:[#allocation310_spill] sm:$0xff] %v3717_v59  ;;  %5889 = vst [vmem:[#allocation311_spill] sm:$0xff] %v3719_v50 }
 0x2d2   : > { %890 = vrot.lane.b32.xlu1 %v3370_v28, %s2010_s18  ;;  %888 = vrot.lane.b32.xlu0 %v3375_v29, %s2010_s18 }
 0x2d4   : > { %v3725_v57 = vpop.permute.xlu1 %778  ;;  %v3727_v54 = vpop.permute.xlu0 %776 }
 0x2d5   : > { %5890 = vst [vmem:[#allocation312_spill] sm:$0xff] %v3725_v57  ;;  %5891 = vst [vmem:[#allocation313_spill] sm:$0xff] %v3727_v54 }
 0x2d6   : > { %894 = vrot.lane.b32.xlu1 %v3384_v7, %s2010_s18  ;;  %892 = vrot.lane.b32.xlu0 %v3389_v6, %s2010_s18 }
 0x2d8   : > { %v3733_v63 = vpop.permute.xlu1 %782  ;;  %v3735_v59 = vpop.permute.xlu0 %780 }
 0x2d9   : > { %5892 = vst [vmem:[#allocation314_spill] sm:$0xff] %v3733_v63  ;;  %5893 = vst [vmem:[#allocation315_spill] sm:$0xff] %v3735_v59 }
 0x2da   : > { %898 = vrot.lane.b32.xlu1 %v3398_v32, %s2010_s18  ;;  %896 = vrot.lane.b32.xlu0 %v3403_v33, %s2010_s18 }
 0x2dc   : > { %v3741_v50 = vpop.permute.xlu1 %786  ;;  %v3743_v57 = vpop.permute.xlu0 %784 }
 0x2dd   : > { %5894 = vst [vmem:[#allocation316_spill] sm:$0xff] %v3741_v50  ;;  %5895 = vst [vmem:[#allocation317_spill] sm:$0xff] %v3743_v57 }
 0x2de   : > { %902 = vrot.lane.b32.xlu1 %v3412_v5, %s2010_s18  ;;  %900 = vrot.lane.b32.xlu0 %v3417_v4, %s2010_s18 }
 0x2e0   : > { %v3749_v54 = vpop.permute.xlu1 %790  ;;  %v3751_v63 = vpop.permute.xlu0 %788 }
 0x2e1   : > { %5896 = vst [vmem:[#allocation318_spill] sm:$0xff] %v3749_v54  ;;  %5897 = vst [vmem:[#allocation319_spill] sm:$0xff] %v3751_v63 }
 0x2e2   : > { %906 = vrot.lane.b32.xlu1 %v3426_v36, %s2010_s18  ;;  %904 = vrot.lane.b32.xlu0 %v3431_v37, %s2010_s18 }
 0x2e4   : > { %v3757_v59 = vpop.permute.xlu1 %794  ;;  %v3759_v50 = vpop.permute.xlu0 %792 }
 0x2e5   : > { %5898 = vst [vmem:[#allocation320_spill] sm:$0xff] %v3757_v59  ;;  %5899 = vst [vmem:[#allocation321_spill] sm:$0xff] %v3759_v50 }
 0x2e6   : > { %910 = vrot.lane.b32.xlu1 %v3440_v2, %s2010_s18  ;;  %908 = vrot.lane.b32.xlu0 %v3445_v0, %s2010_s18 }
 0x2e8   : > { %v3765_v57 = vpop.permute.xlu1 %798  ;;  %v3767_v54 = vpop.permute.xlu0 %796 }
 0x2e9   : > { %5900 = vst [vmem:[#allocation322_spill] sm:$0xff] %v3765_v57  ;;  %5901 = vst [vmem:[#allocation323_spill] sm:$0xff] %v3767_v54 }
 0x2ea   : > { %914 = vrot.lane.b32.xlu1 %v3454_v45, %s2010_s18  ;;  %912 = vrot.lane.b32.xlu0 %v3459_v40, %s2010_s18 }
 0x2ec   : > { %v3773_v63 = vpop.permute.xlu1 %802  ;;  %v3775_v59 = vpop.permute.xlu0 %800 }
 0x2ed   : > { %5902 = vst [vmem:[#allocation324_spill] sm:$0xff] %v3773_v63  ;;  %5903 = vst [vmem:[#allocation325_spill] sm:$0xff] %v3775_v59 }
 0x2ee   : > { %918 = vrot.lane.b32.xlu1 %v3468_v51, %s2010_s18  ;;  %916 = vrot.lane.b32.xlu0 %v3473_v3, %s2010_s18 }
 0x2f0   : > { %v3781_v50 = vpop.permute.xlu1 %806  ;;  %v3783_v57 = vpop.permute.xlu0 %804 }
 0x2f1   : > { %5904 = vst [vmem:[#allocation326_spill] sm:$0xff] %v3781_v50  ;;  %5905 = vst [vmem:[#allocation327_spill] sm:$0xff] %v3783_v57 }
 0x2f2   : > { %922 = vrot.lane.b32.xlu1 %v3482_v39, %s2010_s18  ;;  %920 = vrot.lane.b32.xlu0 %v3487_v44, %s2010_s18 }
 0x2f4   : > { %v3789_v54 = vpop.permute.xlu1 %810  ;;  %v3791_v63 = vpop.permute.xlu0 %808 }
 0x2f5   : > { %5906 = vst [vmem:[#allocation328_spill] sm:$0xff] %v3789_v54  ;;  %5907 = vst [vmem:[#allocation329_spill] sm:$0xff] %v3791_v63 }
 0x2f6   : > { %926 = vrot.lane.b32.xlu1 %v3496_v55, %s2010_s18  ;;  %924 = vrot.lane.b32.xlu0 %v3501_v49, %s2010_s18 }
 0x2f8   : > { %v3797_v59 = vpop.permute.xlu1 %814  ;;  %v3799_v50 = vpop.permute.xlu0 %812 }
 0x2f9   : > { %5908 = vst [vmem:[#allocation330_spill] sm:$0xff] %v3797_v59  ;;  %5909 = vst [vmem:[#allocation331_spill] sm:$0xff] %v3799_v50  ;;  %v5914_v50 = vld [vmem:[#allocation265_spill] sm:$0xff] }
 0x2fa   : > { %930 = vrot.lane.b32.xlu1 %v3510_v60, %s2010_s18  ;;  %928 = vrot.lane.b32.xlu0 %v3515_v61, %s2010_s18  ;;  %v5915_v60 = vld [vmem:[#allocation266_spill] sm:$0xff] }
 0x2fc   : > { %v3805_v57 = vpop.permute.xlu1 %818  ;;  %v3807_v54 = vpop.permute.xlu0 %816 }
 0x2fd   : > { %5910 = vst [vmem:[#allocation332_spill] sm:$0xff] %v3805_v57  ;;  %5911 = vst [vmem:[#allocation333_spill] sm:$0xff] %v3807_v54  ;;  %v5918_v54 = vld [vmem:[#allocation269_spill] sm:$0xff] }
 0x2fe   : > { %934 = vrot.lane.b32.xlu1 %v3524_v53, %s2010_s18  ;;  %932 = vrot.lane.b32.xlu0 %v3529_v58, %s2010_s18 }
 0x300   : > { %v3813_v63 = vpop.permute.xlu1 %822  ;;  %v3815_v59 = vpop.permute.xlu0 %820 }
 0x301   : > { %5912 = vst [vmem:[#allocation334_spill] sm:$0xff] %v3813_v63  ;;  %5913 = vst [vmem:[#allocation335_spill] sm:$0xff] %v3815_v59  ;;  %v5921_v59 = vld [vmem:[#allocation273_spill] sm:$0xff] }
 0x302   : > { %938 = vrot.lane.b32.xlu1 %v5914_v50, %s2010_s18  ;;  %936 = vrot.lane.b32.xlu0 %v5915_v60, %s2010_s18 }
 0x304   : > { %v3821_v61 = vpop.permute.xlu1 %826  ;;  %v3823_v57 = vpop.permute.xlu0 %824 }
 0x305   : > { %5916 = vst [vmem:[#allocation265_spill] sm:$0xff] %v3821_v61  ;;  %5917 = vst [vmem:[#allocation336_spill] sm:$0xff] %v3823_v57 }
 0x306   : > { %942 = vrot.lane.b32.xlu1 %v5918_v54, %s2010_s18  ;;  %940 = vrot.lane.b32.xlu0 %v3557_v52, %s2010_s18 }
 0x308   : > { %v3829_v58 = vpop.permute.xlu1 %830  ;;  %v3831_v63 = vpop.permute.xlu0 %828 }
 0x309   : > { %5919 = vst [vmem:[#allocation269_spill] sm:$0xff] %v3829_v58  ;;  %5920 = vst [vmem:[#allocation337_spill] sm:$0xff] %v3831_v63  ;;  %v5926_v63 = vld [vmem:[#allocation202_spill] sm:$0xff] }
 0x30a   : > { %946 = vrot.lane.b32.xlu1 %v5921_v59, %s2010_s18  ;;  %944 = vrot.lane.b32.xlu0 %v3571_v1, %s2010_s18 }
 0x30c   : > { %v3837_v60 = vpop.permute.xlu1 %834  ;;  %v3839_v61 = vpop.permute.xlu0 %832 }
 0x30d   : > { %5922 = vst [vmem:[#allocation273_spill] sm:$0xff] %v3837_v60  ;;  %5923 = vst [vmem:[#allocation338_spill] sm:$0xff] %v3839_v61 }
 0x30e   : > { %950 = vrot.lane.b32.xlu1 %v3580_v56, %s2010_s18  ;;  %948 = vrot.lane.b32.xlu0 %v3585_v48, %s2010_s18 }
 0x310   : > { %v3845_v57 = vpop.permute.xlu1 %838  ;;  %v3847_v58 = vpop.permute.xlu0 %836 }
 0x311   : > { %5924 = vst [vmem:[#allocation339_spill] sm:$0xff] %v3845_v57  ;;  %5925 = vst [vmem:[#allocation340_spill] sm:$0xff] %v3847_v58 }
 0x312   : > { %954 = vrot.lane.b32.xlu1 %v3146_v62, %s2011_s19  ;;  %952 = vrot.lane.b32.xlu0 %v5926_v63, %s2011_s19 }
 0x314   : > { %v3853_v60 = vpop.permute.xlu1 %842  ;;  %v3855_v61 = vpop.permute.xlu0 %840 }
 0x315   : > { %5927 = vst [vmem:[#allocation341_spill] sm:$0xff] %v3853_v60  ;;  %5928 = vst [vmem:[#allocation342_spill] sm:$0xff] %v3855_v61 }
 0x316   : > { %958 = vrot.lane.b32.xlu1 %v3160_v46, %s2011_s19  ;;  %956 = vrot.lane.b32.xlu0 %v3165_v41, %s2011_s19 }
 0x318   : > { %v3861_v57 = vpop.permute.xlu1 %846  ;;  %v3863_v58 = vpop.permute.xlu0 %844 }
 0x319   : > { %5929 = vst [vmem:[#allocation343_spill] sm:$0xff] %v3861_v57  ;;  %5930 = vst [vmem:[#allocation344_spill] sm:$0xff] %v3863_v58 }
 0x31a   : > { %962 = vrot.lane.b32.xlu1 %v3174_v42, %s2011_s19  ;;  %960 = vrot.lane.b32.xlu0 %v3179_v47, %s2011_s19 }
 0x31c   : > { %v3869_v63 = vpop.permute.xlu1 %850  ;;  %v3871_v60 = vpop.permute.xlu0 %848 }
 0x31d   : > { %5931 = vst [vmem:[#allocation345_spill] sm:$0xff] %v3869_v63  ;;  %5932 = vst [vmem:[#allocation346_spill] sm:$0xff] %v3871_v60 }
 0x31e   : > { %966 = vrot.lane.b32.xlu1 %v3188_v43, %s2011_s19  ;;  %964 = vrot.lane.b32.xlu0 %v3193_v38, %s2011_s19 }
 0x320   : > { %v3877_v61 = vpop.permute.xlu1 %854  ;;  %v3879_v57 = vpop.permute.xlu0 %852 }
 0x321   : > { %5933 = vst [vmem:[#allocation347_spill] sm:$0xff] %v3877_v61  ;;  %5934 = vst [vmem:[#allocation348_spill] sm:$0xff] %v3879_v57 }
 0x322   : > { %970 = vrot.lane.b32.xlu1 %v3202_v35, %s2011_s19  ;;  %968 = vrot.lane.b32.xlu0 %v3207_v34, %s2011_s19 }
 0x324   : > { %v3885_v58 = vpop.permute.xlu1 %858  ;;  %v3887_v63 = vpop.permute.xlu0 %856 }
 0x325   : > { %5935 = vst [vmem:[#allocation349_spill] sm:$0xff] %v3885_v58  ;;  %5936 = vst [vmem:[#allocation350_spill] sm:$0xff] %v3887_v63 }
 0x326   : > { %974 = vrot.lane.b32.xlu1 %v3216_v31, %s2011_s19  ;;  %972 = vrot.lane.b32.xlu0 %v3221_v30, %s2011_s19 }
 0x328   : > { %v3893_v60 = vpop.permute.xlu1 %862  ;;  %v3895_v61 = vpop.permute.xlu0 %860 }
 0x329   : > { %5937 = vst [vmem:[#allocation351_spill] sm:$0xff] %v3893_v60  ;;  %5938 = vst [vmem:[#allocation352_spill] sm:$0xff] %v3895_v61 }
 0x32a   : > { %978 = vrot.lane.b32.xlu1 %v3230_v27, %s2011_s19  ;;  %976 = vrot.lane.b32.xlu0 %v3235_v26, %s2011_s19 }
 0x32c   : > { %v3901_v57 = vpop.permute.xlu1 %866  ;;  %v3903_v58 = vpop.permute.xlu0 %864 }
 0x32d   : > { %5939 = vst [vmem:[#allocation353_spill] sm:$0xff] %v3901_v57  ;;  %5940 = vst [vmem:[#allocation354_spill] sm:$0xff] %v3903_v58 }
 0x32e   : > { %982 = vrot.lane.b32.xlu1 %v3244_v23, %s2011_s19  ;;  %980 = vrot.lane.b32.xlu0 %v3249_v22, %s2011_s19 }
 0x330   : > { %v3909_v63 = vpop.permute.xlu1 %870  ;;  %v3911_v60 = vpop.permute.xlu0 %868 }
 0x331   : > { %5941 = vst [vmem:[#allocation355_spill] sm:$0xff] %v3909_v63  ;;  %5942 = vst [vmem:[#allocation356_spill] sm:$0xff] %v3911_v60 }
 0x332   : > { %986 = vrot.lane.b32.xlu1 %v3258_v19, %s2011_s19  ;;  %984 = vrot.lane.b32.xlu0 %v3263_v18, %s2011_s19 }
 0x334   : > { %v3917_v61 = vpop.permute.xlu1 %874  ;;  %v3919_v57 = vpop.permute.xlu0 %872 }
 0x335   : > { %5943 = vst [vmem:[#allocation357_spill] sm:$0xff] %v3917_v61  ;;  %5944 = vst [vmem:[#allocation358_spill] sm:$0xff] %v3919_v57 }
 0x336   : > { %990 = vrot.lane.b32.xlu1 %v3272_v15, %s2011_s19  ;;  %988 = vrot.lane.b32.xlu0 %v3277_v14, %s2011_s19 }
 0x338   : > { %v3925_v58 = vpop.permute.xlu1 %878  ;;  %v3927_v63 = vpop.permute.xlu0 %876 }
 0x339   : > { %5945 = vst [vmem:[#allocation359_spill] sm:$0xff] %v3925_v58  ;;  %5946 = vst [vmem:[#allocation360_spill] sm:$0xff] %v3927_v63 }
 0x33a   : > { %994 = vrot.lane.b32.xlu1 %v3286_v17, %s2011_s19  ;;  %992 = vrot.lane.b32.xlu0 %v3291_v16, %s2011_s19 }
 0x33c   : > { %v3933_v60 = vpop.permute.xlu1 %882  ;;  %v3935_v61 = vpop.permute.xlu0 %880 }
 0x33d   : > { %5947 = vst [vmem:[#allocation361_spill] sm:$0xff] %v3933_v60  ;;  %5948 = vst [vmem:[#allocation362_spill] sm:$0xff] %v3935_v61 }
 0x33e   : > { %998 = vrot.lane.b32.xlu1 %v3300_v13, %s2011_s19  ;;  %996 = vrot.lane.b32.xlu0 %v3305_v12, %s2011_s19 }
 0x340   : > { %v3941_v57 = vpop.permute.xlu1 %886  ;;  %v3943_v58 = vpop.permute.xlu0 %884 }
 0x341   : > { %5949 = vst [vmem:[#allocation363_spill] sm:$0xff] %v3941_v57  ;;  %5950 = vst [vmem:[#allocation364_spill] sm:$0xff] %v3943_v58 }
 0x342   : > { %1002 = vrot.lane.b32.xlu1 %v3314_v20, %s2011_s19  ;;  %1000 = vrot.lane.b32.xlu0 %v3319_v21, %s2011_s19 }
 0x344   : > { %v3949_v63 = vpop.permute.xlu1 %890  ;;  %v3951_v60 = vpop.permute.xlu0 %888 }
 0x345   : > { %5951 = vst [vmem:[#allocation365_spill] sm:$0xff] %v3949_v63  ;;  %5952 = vst [vmem:[#allocation366_spill] sm:$0xff] %v3951_v60 }
 0x346   : > { %1006 = vrot.lane.b32.xlu1 %v3328_v11, %s2011_s19  ;;  %1004 = vrot.lane.b32.xlu0 %v3333_v10, %s2011_s19 }
 0x348   : > { %v3957_v61 = vpop.permute.xlu1 %894  ;;  %v3959_v57 = vpop.permute.xlu0 %892 }
 0x349   : > { %5953 = vst [vmem:[#allocation367_spill] sm:$0xff] %v3957_v61  ;;  %5954 = vst [vmem:[#allocation368_spill] sm:$0xff] %v3959_v57 }
 0x34a   : > { %1010 = vrot.lane.b32.xlu1 %v3342_v24, %s2011_s19  ;;  %1008 = vrot.lane.b32.xlu0 %v3347_v25, %s2011_s19 }
 0x34c   : > { %v3965_v58 = vpop.permute.xlu1 %898  ;;  %v3967_v63 = vpop.permute.xlu0 %896 }
 0x34d   : > { %5955 = vst [vmem:[#allocation369_spill] sm:$0xff] %v3965_v58  ;;  %5956 = vst [vmem:[#allocation370_spill] sm:$0xff] %v3967_v63 }
 0x34e   : > { %1014 = vrot.lane.b32.xlu1 %v3356_v9, %s2011_s19  ;;  %1012 = vrot.lane.b32.xlu0 %v3361_v8, %s2011_s19 }
 0x350   : > { %v3973_v60 = vpop.permute.xlu1 %902  ;;  %v3975_v61 = vpop.permute.xlu0 %900 }
 0x351   : > { %5957 = vst [vmem:[#allocation371_spill] sm:$0xff] %v3973_v60  ;;  %5958 = vst [vmem:[#allocation372_spill] sm:$0xff] %v3975_v61 }
 0x352   : > { %1018 = vrot.lane.b32.xlu1 %v3370_v28, %s2011_s19  ;;  %1016 = vrot.lane.b32.xlu0 %v3375_v29, %s2011_s19 }
 0x354   : > { %v3981_v57 = vpop.permute.xlu1 %906  ;;  %v3983_v58 = vpop.permute.xlu0 %904 }
 0x355   : > { %5959 = vst [vmem:[#allocation373_spill] sm:$0xff] %v3981_v57  ;;  %5960 = vst [vmem:[#allocation374_spill] sm:$0xff] %v3983_v58 }
 0x356   : > { %1022 = vrot.lane.b32.xlu1 %v3384_v7, %s2011_s19  ;;  %1020 = vrot.lane.b32.xlu0 %v3389_v6, %s2011_s19 }
 0x358   : > { %v3989_v63 = vpop.permute.xlu1 %910  ;;  %v3991_v60 = vpop.permute.xlu0 %908 }
 0x359   : > { %5961 = vst [vmem:[#allocation375_spill] sm:$0xff] %v3989_v63  ;;  %5962 = vst [vmem:[#allocation376_spill] sm:$0xff] %v3991_v60 }
 0x35a   : > { %1026 = vrot.lane.b32.xlu1 %v3398_v32, %s2011_s19  ;;  %1024 = vrot.lane.b32.xlu0 %v3403_v33, %s2011_s19 }
 0x35c   : > { %v3997_v61 = vpop.permute.xlu1 %914  ;;  %v3999_v57 = vpop.permute.xlu0 %912 }
 0x35d   : > { %5963 = vst [vmem:[#allocation377_spill] sm:$0xff] %v3997_v61  ;;  %5964 = vst [vmem:[#allocation378_spill] sm:$0xff] %v3999_v57 }
 0x35e   : > { %1030 = vrot.lane.b32.xlu1 %v3412_v5, %s2011_s19  ;;  %1028 = vrot.lane.b32.xlu0 %v3417_v4, %s2011_s19 }
 0x360   : > { %v4005_v58 = vpop.permute.xlu1 %918  ;;  %v4007_v63 = vpop.permute.xlu0 %916 }
 0x361   : > { %5965 = vst [vmem:[#allocation379_spill] sm:$0xff] %v4005_v58  ;;  %5966 = vst [vmem:[#allocation380_spill] sm:$0xff] %v4007_v63 }
 0x362   : > { %1034 = vrot.lane.b32.xlu1 %v3426_v36, %s2011_s19  ;;  %1032 = vrot.lane.b32.xlu0 %v3431_v37, %s2011_s19 }
 0x364   : > { %v4013_v60 = vpop.permute.xlu1 %922  ;;  %v4015_v61 = vpop.permute.xlu0 %920 }
 0x365   : > { %5967 = vst [vmem:[#allocation381_spill] sm:$0xff] %v4013_v60  ;;  %5968 = vst [vmem:[#allocation382_spill] sm:$0xff] %v4015_v61 }
 0x366   : > { %1038 = vrot.lane.b32.xlu1 %v3440_v2, %s2011_s19  ;;  %1036 = vrot.lane.b32.xlu0 %v3445_v0, %s2011_s19 }
 0x368   : > { %v4021_v57 = vpop.permute.xlu1 %926  ;;  %v4023_v58 = vpop.permute.xlu0 %924 }
 0x369   : > { %5969 = vst [vmem:[#allocation383_spill] sm:$0xff] %v4021_v57  ;;  %5970 = vst [vmem:[#allocation384_spill] sm:$0xff] %v4023_v58 }
 0x36a   : > { %1042 = vrot.lane.b32.xlu1 %v3454_v45, %s2011_s19  ;;  %1040 = vrot.lane.b32.xlu0 %v3459_v40, %s2011_s19 }
 0x36c   : > { %v4029_v63 = vpop.permute.xlu1 %930  ;;  %v4031_v60 = vpop.permute.xlu0 %928 }
 0x36d   : > { %5971 = vst [vmem:[#allocation385_spill] sm:$0xff] %v4029_v63  ;;  %5972 = vst [vmem:[#allocation386_spill] sm:$0xff] %v4031_v60 }
 0x36e   : > { %1046 = vrot.lane.b32.xlu1 %v3468_v51, %s2011_s19  ;;  %1044 = vrot.lane.b32.xlu0 %v3473_v3, %s2011_s19 }
 0x370   : > { %v4037_v61 = vpop.permute.xlu1 %934  ;;  %v4039_v57 = vpop.permute.xlu0 %932 }
 0x371   : > { %5973 = vst [vmem:[#allocation387_spill] sm:$0xff] %v4037_v61  ;;  %5974 = vst [vmem:[#allocation388_spill] sm:$0xff] %v4039_v57  ;;  %v5979_v57 = vld [vmem:[#allocation258_spill] sm:$0xff] }
 0x372   : > { %1050 = vrot.lane.b32.xlu1 %v3482_v39, %s2011_s19  ;;  %1048 = vrot.lane.b32.xlu0 %v3487_v44, %s2011_s19  ;;  %v5980_v39 = vld [vmem:[#allocation259_spill] sm:$0xff] }
 0x374   : > { %v4045_v58 = vpop.permute.xlu1 %938  ;;  %v4047_v63 = vpop.permute.xlu0 %936 }
 0x375   : > { %5975 = vst [vmem:[#allocation389_spill] sm:$0xff] %v4045_v58  ;;  %5976 = vst [vmem:[#allocation390_spill] sm:$0xff] %v4047_v63  ;;  %v5983_v63 = vld [vmem:[#allocation262_spill] sm:$0xff] }
 0x376   : > { %1054 = vrot.lane.b32.xlu1 %v3496_v55, %s2011_s19  ;;  %1052 = vrot.lane.b32.xlu0 %v3501_v49, %s2011_s19 }
 0x378   : > { %v4053_v60 = vpop.permute.xlu1 %942  ;;  %v4055_v61 = vpop.permute.xlu0 %940 }
 0x379   : > { %5977 = vst [vmem:[#allocation391_spill] sm:$0xff] %v4053_v60  ;;  %5978 = vst [vmem:[#allocation392_spill] sm:$0xff] %v4055_v61  ;;  %v5986_v61 = vld [vmem:[#allocation266_spill] sm:$0xff] }
 0x37a   : > { %1058 = vrot.lane.b32.xlu1 %v5979_v57, %s2011_s19  ;;  %1056 = vrot.lane.b32.xlu0 %v5980_v39, %s2011_s19 }
 0x37c   : > { %v4061_v44 = vpop.permute.xlu1 %946  ;;  %v4063_v58 = vpop.permute.xlu0 %944 }
 0x37d   : > { %5981 = vst [vmem:[#allocation258_spill] sm:$0xff] %v4061_v44  ;;  %5982 = vst [vmem:[#allocation393_spill] sm:$0xff] %v4063_v58 }
 0x37e   : > { %1062 = vrot.lane.b32.xlu1 %v3524_v53, %s2011_s19  ;;  %1060 = vrot.lane.b32.xlu0 %v5983_v63, %s2011_s19 }
 0x380   : > { %v4069_v49 = vpop.permute.xlu1 %950  ;;  %v4071_v60 = vpop.permute.xlu0 %948 }
 0x381   : > { %5984 = vst [vmem:[#allocation262_spill] sm:$0xff] %v4069_v49  ;;  %5985 = vst [vmem:[#allocation394_spill] sm:$0xff] %v4071_v60 }
 0x382   : > { %1066 = vrot.lane.b32.xlu1 %v5914_v50, %s2011_s19  ;;  %1064 = vrot.lane.b32.xlu0 %v5986_v61, %s2011_s19 }
 0x384   : > { %v4077_v39 = vpop.permute.xlu1 %954  ;;  %v4079_v44 = vpop.permute.xlu0 %952 }
 0x385   : > { %5987 = vst [vmem:[#allocation266_spill] sm:$0xff] %v4077_v39 }
 0x386   : > { %1070 = vrot.lane.b32.xlu1 %v5918_v54, %s2011_s19  ;;  %1068 = vrot.lane.b32.xlu0 %v3557_v52, %s2011_s19 }
 0x388   : > { %v4085_v58 = vpop.permute.xlu1 %958  ;;  %v4087_v49 = vpop.permute.xlu0 %956 }
 0x389   : > { %5988 = vst [vmem:[#allocation395_spill] sm:$0xff] %v4085_v58 }
 0x38a   : > { %1074 = vrot.lane.b32.xlu1 %v5921_v59, %s2011_s19  ;;  %1072 = vrot.lane.b32.xlu0 %v3571_v1, %s2011_s19  ;;  %v5993_v1 = vld [vmem:[#allocation202_spill] sm:$0xff] }
 0x38c   : > { %v4093_v60 = vpop.permute.xlu1 %962  ;;  %v4095_v39 = vpop.permute.xlu0 %960 }
 0x38d   : > { %5989 = vst [vmem:[#allocation396_spill] sm:$0xff] %v4093_v60  ;;  %5990 = vst [vmem:[#allocation397_spill] sm:$0xff] %v4095_v39 }
 0x38e   : > { %1078 = vrot.lane.b32.xlu1 %v3580_v56, %s2011_s19  ;;  %1076 = vrot.lane.b32.xlu0 %v3585_v48, %s2011_s19 }
 0x390   : > { %v4101_v52 = vpop.permute.xlu1 %966  ;;  %v4103_v58 = vpop.permute.xlu0 %964 }
 0x391   : > { %5991 = vst [vmem:[#allocation398_spill] sm:$0xff] %v4101_v52  ;;  %5992 = vst [vmem:[#allocation399_spill] sm:$0xff] %v4103_v58 }
 0x392   : > { %1082 = vrot.lane.b32.xlu1 %v3146_v62, %s2012_s20  ;;  %1080 = vrot.lane.b32.xlu0 %v5993_v1, %s2012_s20 }
 0x394   : > { %v4109_v60 = vpop.permute.xlu1 %970  ;;  %v4111_v39 = vpop.permute.xlu0 %968 }
 0x395   : > { %5994 = vst [vmem:[#allocation202_spill] sm:$0xff] %v4109_v60  ;;  %5995 = vst [vmem:[#allocation400_spill] sm:$0xff] %v4111_v39 }
 0x396   : > { %1086 = vrot.lane.b32.xlu1 %v3160_v46, %s2012_s20  ;;  %1084 = vrot.lane.b32.xlu0 %v3165_v41, %s2012_s20 }
 0x398   : > { %v4117_v52 = vpop.permute.xlu1 %974  ;;  %v4119_v58 = vpop.permute.xlu0 %972 }
 0x399   : > { %5996 = vst [vmem:[#allocation401_spill] sm:$0xff] %v4117_v52  ;;  %5997 = vst [vmem:[#allocation402_spill] sm:$0xff] %v4119_v58 }
 0x39a   : > { %1090 = vrot.lane.b32.xlu1 %v3174_v42, %s2012_s20  ;;  %1088 = vrot.lane.b32.xlu0 %v3179_v47, %s2012_s20 }
 0x39c   : > { %v4125_v48 = vpop.permute.xlu1 %978  ;;  %v4127_v60 = vpop.permute.xlu0 %976 }
 0x39d   : > { %5998 = vst [vmem:[#allocation403_spill] sm:$0xff] %v4125_v48 }
 0x39e   : > { %1094 = vrot.lane.b32.xlu1 %v3188_v43, %s2012_s20  ;;  %1092 = vrot.lane.b32.xlu0 %v3193_v38, %s2012_s20 }
 0x3a0   : > { %v4133_v39 = vpop.permute.xlu1 %982  ;;  %v4135_v52 = vpop.permute.xlu0 %980 }
 0x3a1   : > { %5999 = vst [vmem:[#allocation404_spill] sm:$0xff] %v4133_v39 }
 0x3a2   : > { %1098 = vrot.lane.b32.xlu1 %v3202_v35, %s2012_s20  ;;  %1096 = vrot.lane.b32.xlu0 %v3207_v34, %s2012_s20 }
 0x3a4   : > { %v4141_v58 = vpop.permute.xlu1 %986  ;;  %v4143_v48 = vpop.permute.xlu0 %984 }
 0x3a6   : > { %1102 = vrot.lane.b32.xlu1 %v3216_v31, %s2012_s20  ;;  %1100 = vrot.lane.b32.xlu0 %v3221_v30, %s2012_s20 }
 0x3a8   : > { %v4149_v38 = vpop.permute.xlu1 %990  ;;  %v4151_v39 = vpop.permute.xlu0 %988 }
 0x3aa   : > { %1106 = vrot.lane.b32.xlu1 %v3230_v27, %s2012_s20  ;;  %1104 = vrot.lane.b32.xlu0 %v3235_v26, %s2012_s20 }
 0x3ac   : > { %v4157_v34 = vpop.permute.xlu1 %994  ;;  %v4159_v35 = vpop.permute.xlu0 %992 }
 0x3ae   : > { %1110 = vrot.lane.b32.xlu1 %v3244_v23, %s2012_s20  ;;  %1108 = vrot.lane.b32.xlu0 %v3249_v22, %s2012_s20 }
 0x3b0   : > { %v4165_v30 = vpop.permute.xlu1 %998  ;;  %v4167_v31 = vpop.permute.xlu0 %996 }
 0x3b2   : > { %1114 = vrot.lane.b32.xlu1 %v3258_v19, %s2012_s20  ;;  %1112 = vrot.lane.b32.xlu0 %v3263_v18, %s2012_s20 }
 0x3b4   : > { %v4173_v26 = vpop.permute.xlu1 %1002  ;;  %v4175_v27 = vpop.permute.xlu0 %1000 }
 0x3b6   : > { %1118 = vrot.lane.b32.xlu1 %v3272_v15, %s2012_s20  ;;  %1116 = vrot.lane.b32.xlu0 %v3277_v14, %s2012_s20 }
 0x3b8   : > { %v4181_v22 = vpop.permute.xlu1 %1006  ;;  %v4183_v23 = vpop.permute.xlu0 %1004 }
 0x3ba   : > { %1122 = vrot.lane.b32.xlu1 %v3286_v17, %s2012_s20  ;;  %1120 = vrot.lane.b32.xlu0 %v3291_v16, %s2012_s20 }
 0x3bc   : > { %v4189_v18 = vpop.permute.xlu1 %1010  ;;  %v4191_v19 = vpop.permute.xlu0 %1008 }
 0x3be   : > { %1126 = vrot.lane.b32.xlu1 %v3300_v13, %s2012_s20  ;;  %1124 = vrot.lane.b32.xlu0 %v3305_v12, %s2012_s20 }
 0x3c0   : > { %v4197_v14 = vpop.permute.xlu1 %1014  ;;  %v4199_v15 = vpop.permute.xlu0 %1012 }
 0x3c2   : > { %1130 = vrot.lane.b32.xlu1 %v3314_v20, %s2012_s20  ;;  %1128 = vrot.lane.b32.xlu0 %v3319_v21, %s2012_s20 }
 0x3c4   : > { %v4205_v16 = vpop.permute.xlu1 %1018  ;;  %v4207_v17 = vpop.permute.xlu0 %1016 }
 0x3c6   : > { %1134 = vrot.lane.b32.xlu1 %v3328_v11, %s2012_s20  ;;  %1132 = vrot.lane.b32.xlu0 %v3333_v10, %s2012_s20 }
 0x3c8   : > { %v4213_v12 = vpop.permute.xlu1 %1022  ;;  %v4215_v13 = vpop.permute.xlu0 %1020 }
 0x3ca   : > { %1138 = vrot.lane.b32.xlu1 %v3342_v24, %s2012_s20  ;;  %1136 = vrot.lane.b32.xlu0 %v3347_v25, %s2012_s20 }
 0x3cc   : > { %v4221_v20 = vpop.permute.xlu1 %1026  ;;  %v4223_v21 = vpop.permute.xlu0 %1024 }
 0x3ce   : > { %1142 = vrot.lane.b32.xlu1 %v3356_v9, %s2012_s20  ;;  %1140 = vrot.lane.b32.xlu0 %v3361_v8, %s2012_s20 }
 0x3d0   : > { %v4229_v10 = vpop.permute.xlu1 %1030  ;;  %v4231_v11 = vpop.permute.xlu0 %1028 }
 0x3d2   : > { %1146 = vrot.lane.b32.xlu1 %v3370_v28, %s2012_s20  ;;  %1144 = vrot.lane.b32.xlu0 %v3375_v29, %s2012_s20 }
 0x3d4   : > { %v4237_v24 = vpop.permute.xlu1 %1034  ;;  %v4239_v25 = vpop.permute.xlu0 %1032 }
 0x3d6   : > { %1150 = vrot.lane.b32.xlu1 %v3384_v7, %s2012_s20  ;;  %1148 = vrot.lane.b32.xlu0 %v3389_v6, %s2012_s20 }
 0x3d8   : > { %v4245_v8 = vpop.permute.xlu1 %1038  ;;  %v4247_v9 = vpop.permute.xlu0 %1036 }
 0x3da   : > { %1154 = vrot.lane.b32.xlu1 %v3398_v32, %s2012_s20  ;;  %1152 = vrot.lane.b32.xlu0 %v3403_v33, %s2012_s20 }
 0x3dc   : > { %v4253_v28 = vpop.permute.xlu1 %1042  ;;  %v4255_v29 = vpop.permute.xlu0 %1040 }
 0x3de   : > { %1158 = vrot.lane.b32.xlu1 %v3412_v5, %s2012_s20  ;;  %1156 = vrot.lane.b32.xlu0 %v3417_v4, %s2012_s20 }
 0x3e0   : > { %v4261_v6 = vpop.permute.xlu1 %1046  ;;  %v4263_v7 = vpop.permute.xlu0 %1044 }
 0x3e2   : > { %1162 = vrot.lane.b32.xlu1 %v3426_v36, %s2012_s20  ;;  %1160 = vrot.lane.b32.xlu0 %v3431_v37, %s2012_s20 }
 0x3e4   : > { %v4269_v32 = vpop.permute.xlu1 %1050  ;;  %v4271_v33 = vpop.permute.xlu0 %1048 }
 0x3e6   : > { %1166 = vrot.lane.b32.xlu1 %v3440_v2, %s2012_s20  ;;  %1164 = vrot.lane.b32.xlu0 %v3445_v0, %s2012_s20 }
 0x3e8   : > { %v4277_v4 = vpop.permute.xlu1 %1054  ;;  %v4279_v5 = vpop.permute.xlu0 %1052 }
 0x3e9   : > { %6000 = vst [vmem:[#allocation405_spill] sm:$0xff] %v4279_v5  ;;  %v6004_v5 = vld [vmem:[#allocation251_spill] sm:$0xff] }
 0x3ea   : > { %1170 = vrot.lane.b32.xlu1 %v3454_v45, %s2012_s20  ;;  %1168 = vrot.lane.b32.xlu0 %v3459_v40, %s2012_s20  ;;  %v6005_v45 = vld [vmem:[#allocation252_spill] sm:$0xff] }
 0x3ec   : > { %v4285_v36 = vpop.permute.xlu1 %1058  ;;  %v4287_v37 = vpop.permute.xlu0 %1056 }
 0x3ed   : > { %6001 = vst [vmem:[#allocation406_spill] sm:$0xff] %v4285_v36 }
 0x3ee   : > { %1174 = vrot.lane.b32.xlu1 %v3468_v51, %s2012_s20  ;;  %1172 = vrot.lane.b32.xlu0 %v3473_v3, %s2012_s20  ;;  %v6008_v51 = vld [vmem:[#allocation255_spill] sm:$0xff] }
 0x3f0   : > { %v4293_v0 = vpop.permute.xlu1 %1062  ;;  %v4295_v2 = vpop.permute.xlu0 %1060 }
 0x3f1   : > { %6002 = vst [vmem:[#allocation407_spill] sm:$0xff] %v4293_v0  ;;  %6003 = vst [vmem:[#allocation408_spill] sm:$0xff] %v4295_v2  ;;  %v6017_v2 = vld [vmem:[#allocation18_spill] sm:$0xff] }
 0x3f2   : > { %1178 = vrot.lane.b32.xlu1 %v6004_v5, %s2012_s20  ;;  %1176 = vrot.lane.b32.xlu0 %v6005_v45, %s2012_s20  ;;  %v6011_v5 = vld [vmem:[#allocation259_spill] sm:$0xff] }
 0x3f4   : > { %v4301_v40 = vpop.permute.xlu1 %1066  ;;  %v4303_v36 = vpop.permute.xlu0 %1064 }
 0x3f5   : > { %6006 = vst [vmem:[#allocation251_spill] sm:$0xff] %v4301_v40  ;;  %6007 = vst [vmem:[#allocation252_spill] sm:$0xff] %v4303_v36  ;;  %v6016_v40 = vld [vmem:[#allocation17_spill] sm:$0xff] }
 0x3f6   : > { %1182 = vrot.lane.b32.xlu1 %v3496_v55, %s2012_s20  ;;  %1180 = vrot.lane.b32.xlu0 %v6008_v51, %s2012_s20  ;;  %v6014_v55 = vld [vmem:[#allocation15_spill] sm:$0xff] }
 0x3f7   : > { %v1211_v51 = vsel %vm1208_vm0, %v3165_v41, %v6014_v55  ;;  %v6018_v41 = vld [vmem:[#allocation19_spill] sm:$0xff] }
 0x3f8   : > { %v4309_v3 = vpop.permute.xlu1 %1070  ;;  %v4311_v0 = vpop.permute.xlu0 %1068  ;;  %v1214_v55 = vsel %vm1208_vm0, %v3174_v42, %v6018_v41 }
 0x3f9   : > { %6009 = vst [vmem:[#allocation255_spill] sm:$0xff] %v4309_v3  ;;  %6010 = vst [vmem:[#allocation409_spill] sm:$0xff] %v4311_v0  ;;  %v6015_v3 = vld [vmem:[#allocation16_spill] sm:$0xff] }
 0x3fa   : > { %1186 = vrot.lane.b32.xlu1 %v5979_v57, %s2012_s20  ;;  %1184 = vrot.lane.b32.xlu0 %v6011_v5, %s2012_s20  ;;  %v1209_v0 = vsel %vm1208_vm0, %v5993_v1, %v6015_v3  ;;  %v1212_v57 = vsel %vm1208_vm0, %v3160_v46, %v6016_v40  ;;  %v1210_v5 = vsel %vm1208_vm0, %v3146_v62, %v6017_v2  ;;  %v6019_v1 = vld [vmem:[#allocation11_spill] sm:$0xff]  ;;  %v6021_v40 = vld [vmem:[#allocation20_spill] sm:$0xff] }
 0x3fb   : > { %v1275_v3 = vsel %vm1273_vm1, %v1210_v5, %v6019_v1  ;;  %v1213_v62 = vsel %vm1208_vm0, %v3179_v47, %v6021_v40  ;;  %v6022_v2 = vld [vmem:[#allocation135_spill] sm:$0xff]  ;;  %v6026_v5 = vld [vmem:[#allocation21_spill] sm:$0xff] }
 0x3fc   : > { %v4317_v45 = vpop.permute.xlu1 %1074  ;;  %v4319_v36 = vpop.permute.xlu0 %1072  ;;  %v6028_v47 = vld [vmem:[#allocation195_spill] sm:$0xff] }
 0x3fd   : > { %6012 = vst [vmem:[#allocation259_spill] sm:$0xff] %v4317_v45  ;;  %6013 = vst [vmem:[#allocation410_spill] sm:$0xff] %v4319_v36  ;;  %v6020_v36 = vld [vmem:[#allocation12_spill] sm:$0xff] }
 0x3fe   : > { %1190 = vrot.lane.b32.xlu1 %v3524_v53, %s2012_s20  ;;  %1188 = vrot.lane.b32.xlu0 %v5983_v63, %s2012_s20  ;;  %v1274_v46 = vsel %vm1273_vm1, %v1209_v0, %v6020_v36  ;;  %v1340_v53 = vsel %vm1338_vm2, %v1275_v3, %v6022_v2  ;;  %v6023_v45 = vld [vmem:[#allocation136_spill] sm:$0xff]  ;;  %v1216_v36 = vsel %vm1208_vm0, %v3188_v43, %v6026_v5  ;;  %v6027_v0 = vld [vmem:[#allocation194_spill] sm:$0xff]  ;;  %v6029_v3 = vld [vmem:[#allocation13_spill] sm:$0xff] }
 0x3ff   : > { %v1339_v63 = vsel %vm1338_vm2, %v1274_v46, %v6023_v45  ;;  %v1405_v1 = vsel %vm1403_vm3, %v1340_v53, %v6027_v0  ;;  %v1277_v45 = vsel %vm1273_vm1, %v1212_v57, %v6029_v3  ;;  %v6030_v46 = vld [vmem:[#allocation267_spill] sm:$0xff]  ;;  %v6032_v43 = vld [vmem:[#allocation14_spill] sm:$0xff]  ;;  %v6034_v5 = vld [vmem:[#allocation336_spill] sm:$0xff] }
 0x400   : > { %v4351_v42 = vpop.permute.xlu1 %1078  ;;  %v4353_v41 = vpop.permute.xlu0 %1076  ;;  %v1404_v40 = vsel %vm1403_vm3, %v1339_v63, %v6028_v47  ;;  %v1470_v2 = vsel %vm1468_vm4, %v1405_v1, %v6030_v46  ;;  %v1276_v53 = vsel %vm1273_vm1, %v1211_v51, %v6032_v43  ;;  %v6033_v63 = vld [vmem:[#allocation265_spill] sm:$0xff]  ;;  %v6037_v1 = vld [vmem:[#allocation266_spill] sm:$0xff]  ;;  %v6038_v46 = vld [vmem:[#allocation196_spill] sm:$0xff] }
 0x401   : > { %6024 = vst [vmem:[#allocation15_spill] sm:$0xff] %v4351_v42  ;;  %6025 = vst [vmem:[#allocation16_spill] sm:$0xff] %v4353_v41  ;;  %v6031_v42 = vld [vmem:[#allocation268_spill] sm:$0xff]  ;;  %v1535_v57 = vsel %vm1533_vm5, %v1470_v2, %v6033_v63  ;;  %v6039_v43 = vld [vmem:[#allocation197_spill] sm:$0xff] }
 0x402   : > { %v1469_v41 = vsel %vm1468_vm4, %v1404_v40, %v6031_v42  ;;  %1194 = vrot.lane.b32.xlu1 %v5914_v50, %s2012_s20  ;;  %1192 = vrot.lane.b32.xlu0 %v5986_v61, %s2012_s20  ;;  %v6035_v50 = vld [vmem:[#allocation137_spill] sm:$0xff]  ;;  %v6036_v42 = vld [vmem:[#allocation138_spill] sm:$0xff]  ;;  %v1600_v47 = vsel %vm1598_vm6, %v1535_v57, %v6037_v1  ;;  %v6041_v57 = vld [vmem:[#allocation271_spill] sm:$0xff] }
 0x403   : > { %v1534_v0 = vsel %vm1533_vm5, %v1469_v41, %v6034_v5  ;;  %v1342_v61 = vsel %vm1338_vm2, %v1277_v45, %v6035_v50  ;;  %v1341_v51 = vsel %vm1338_vm2, %v1276_v53, %v6036_v42  ;;  %v1940_v50 = vld [vmem:[%s2039_s12 + $0x30] sm:$0xff]  ;;  %v6040_v53 = vld [vmem:[#allocation22_spill] sm:$0xff] }
 0x404   : > { %v1599_v41 = vsel %vm1598_vm6, %v1534_v0, %v4079_v44  ;;  %v1083_v40 = vpop.permute.xlu1 %1082  ;;  %v1081_v3 = vpop.permute.xlu0 %1080  ;;  %v1407_v2 = vsel %vm1403_vm3, %v1342_v61, %v6038_v46  ;;  %v1406_v63 = vsel %vm1403_vm3, %v1341_v51, %v6039_v43  ;;  %v1215_v42 = vsel %vm1208_vm0, %v1940_v50, %v6040_v53  ;;  %v6042_v44 = vld [vmem:[#allocation272_spill] sm:$0xff]  ;;  %v6043_v61 = vld [vmem:[#allocation270_spill] sm:$0xff]  ;;  %v6044_v51 = vld [vmem:[#allocation79_spill] sm:$0xff] }
 0x405   : > { %v1665_v5 = vsel %vm1663_vm7, %v1600_v47, %v1083_v40  ;;  %v1664_v45 = vsel %vm1663_vm7, %v1599_v41, %v1081_v3  ;;  %v1472_v1 = vsel %vm1468_vm4, %v1407_v2, %v6041_v57  ;;  %v1471_v0 = vsel %vm1468_vm4, %v1406_v63, %v6042_v44  ;;  %v6045_v41 = vld [vmem:[#allocation80_spill] sm:$0xff]  ;;  %v6046_v3 = vld [vmem:[#allocation269_spill] sm:$0xff]  ;;  %v6048_v63 = vld [vmem:[#allocation139_spill] sm:$0xff] }
 0x406   : > { %1730 = vst.msk [vmem:[%s4383_s23 + $0x8] sm:$0xff] %vm1728_vm8, %v1665_v5  ;;  %1729 = vst.msk [vmem:[%s4383_s23] sm:$0xff] %vm1728_vm8, %v1664_v45  ;;  %1198 = vrot.lane.b32.xlu1 %v5918_v54, %s2012_s20  ;;  %1196 = vrot.lane.b32.xlu0 %v6043_v61, %s2012_s20  ;;  %v1279_v47 = vsel %vm1273_vm1, %v1214_v55, %v6044_v51  ;;  %v1278_v40 = vsel %vm1273_vm1, %v1213_v62, %v6045_v41  ;;  %v6047_v2 = vld [vmem:[#allocation337_spill] sm:$0xff]  ;;  %v6049_v5 = vld [vmem:[#allocation140_spill] sm:$0xff] }
 0x407   : > { %v1537_v46 = vsel %vm1533_vm5, %v1472_v1, %v6046_v3  ;;  %v1536_v43 = vsel %vm1533_vm5, %v1471_v0, %v6047_v2  ;;  %v1344_v54 = vsel %vm1338_vm2, %v1279_v47, %v6048_v63  ;;  %v1343_v45 = vsel %vm1338_vm2, %v1278_v40, %v6049_v5  ;;  %v6050_v50 = vld [vmem:[#allocation395_spill] sm:$0xff]  ;;  %v6051_v1 = vld [vmem:[#allocation198_spill] sm:$0xff] }
 0x408   : > { %v1602_v55 = vsel %vm1598_vm6, %v1537_v46, %v6050_v50  ;;  %v1601_v62 = vsel %vm1598_vm6, %v1536_v43, %v4087_v49  ;;  %v1087_v53 = vpop.permute.xlu1 %1086  ;;  %v1085_v57 = vpop.permute.xlu0 %1084  ;;  %v1409_v44 = vsel %vm1403_vm3, %v1344_v54, %v6051_v1  ;;  %v6052_v61 = vld [vmem:[#allocation199_spill] sm:$0xff]  ;;  %v6055_v49 = vld [vmem:[#allocation276_spill] sm:$0xff]  ;;  %v6056_v63 = vld [vmem:[#allocation274_spill] sm:$0xff] }
 0x409   : > { %v1408_v0 = vsel %vm1403_vm3, %v1343_v45, %v6052_v61  ;;  %v1667_v51 = vsel %vm1663_vm7, %v1602_v55, %v1087_v53  ;;  %v1666_v47 = vsel %vm1663_vm7, %v1601_v62, %v1085_v57  ;;  %v1941_v41 = vld [vmem:[%s2039_s12 + $0x48] sm:$0xff]  ;;  %v6057_v54 = vld [vmem:[#allocation81_spill] sm:$0xff]  ;;  %v6058_v45 = vld [vmem:[#allocation82_spill] sm:$0xff] }
 0x40a   : > { %v6053_v40 = vld [vmem:[#allocation23_spill] sm:$0xff]  ;;  %v1473_v43 = vsel %vm1468_vm4, %v1408_v0, %v6055_v49  ;;  %1732 = vst.msk [vmem:[%s4383_s23 + $0x18] sm:$0xff] %vm1728_vm8, %v1667_v51  ;;  %1731 = vst.msk [vmem:[%s4383_s23 + $0x10] sm:$0xff] %vm1728_vm8, %v1666_v47  ;;  %1202 = vrot.lane.b32.xlu1 %v5921_v59, %s2012_s20  ;;  %1200 = vrot.lane.b32.xlu0 %v6056_v63, %s2012_s20  ;;  %v1281_v5 = vsel %vm1273_vm1, %v1216_v36, %v6057_v54  ;;  %v6059_v55 = vld [vmem:[#allocation273_spill] sm:$0xff] }
 0x40b   : > { %v1218_v3 = vsel %vm1208_vm0, %v1941_v41, %v6053_v40  ;;  %v6054_v46 = vld [vmem:[#allocation275_spill] sm:$0xff]  ;;  %v1280_v50 = vsel %vm1273_vm1, %v1215_v42, %v6058_v45  ;;  %v6060_v53 = vld [vmem:[#allocation338_spill] sm:$0xff]  ;;  %v6061_v1 = vld [vmem:[#allocation141_spill] sm:$0xff] }
 0x40c   : > { %v1474_v2 = vsel %vm1468_vm4, %v1409_v44, %v6054_v46  ;;  %v1538_v57 = vsel %vm1533_vm5, %v1473_v43, %v6060_v53  ;;  %v1346_v59 = vsel %vm1338_vm2, %v1281_v5, %v6061_v1  ;;  %v6062_v44 = vld [vmem:[#allocation142_spill] sm:$0xff]  ;;  %v6063_v0 = vld [vmem:[#allocation396_spill] sm:$0xff]  ;;  %v6064_v51 = vld [vmem:[#allocation397_spill] sm:$0xff]  ;;  %v1091_v47 = vpop.permute.xlu1 %1090  ;;  %v1089_v41 = vpop.permute.xlu0 %1088 }
 0x40d   : > { %v1539_v62 = vsel %vm1533_vm5, %v1474_v2, %v6059_v55  ;;  %v1345_v61 = vsel %vm1338_vm2, %v1280_v50, %v6062_v44  ;;  %v1603_v42 = vsel %vm1598_vm6, %v1538_v57, %v6064_v51  ;;  %v6065_v40 = vld [vmem:[#allocation200_spill] sm:$0xff]  ;;  %v6066_v2 = vld [vmem:[#allocation201_spill] sm:$0xff]  ;;  %v1942_v54 = vld [vmem:[%s2039_s12 + $0x40] sm:$0xff] }
 0x40e   : > { %v1604_v36 = vsel %vm1598_vm6, %v1539_v62, %v6063_v0  ;;  %v1411_v46 = vsel %vm1403_vm3, %v1346_v59, %v6065_v40  ;;  %v1410_v49 = vsel %vm1403_vm3, %v1345_v61, %v6066_v2  ;;  %v1668_v63 = vsel %vm1663_vm7, %v1603_v42, %v1089_v41  ;;  %v6067_v5 = vld [vmem:[#allocation24_spill] sm:$0xff]  ;;  %v6068_v50 = vld [vmem:[#allocation278_spill] sm:$0xff]  ;;  %v6069_v62 = vld [vmem:[#allocation279_spill] sm:$0xff]  ;;  %1206 = vrot.lane.b32.xlu1 %v3580_v56, %s2012_s20 }
 0x40f   : > { %v1669_v43 = vsel %vm1663_vm7, %v1604_v36, %v1091_v47  ;;  %v1217_v45 = vsel %vm1208_vm0, %v1942_v54, %v6067_v5  ;;  %v1476_v55 = vsel %vm1468_vm4, %v1411_v46, %v6068_v50  ;;  %v1475_v53 = vsel %vm1468_vm4, %v1410_v49, %v6069_v62  ;;  %1733 = vst.msk [vmem:[%s4383_s23 + $0x20] sm:$0xff] %vm1728_vm8, %v1668_v63  ;;  %v6070_v57 = vld [vmem:[#allocation277_spill] sm:$0xff]  ;;  %v6071_v1 = vld [vmem:[#allocation83_spill] sm:$0xff]  ;;  %v6072_v44 = vld [vmem:[#allocation84_spill] sm:$0xff] }
 0x410   : > { %1734 = vst.msk [vmem:[%s4383_s23 + $0x28] sm:$0xff] %vm1728_vm8, %v1669_v43  ;;  %1204 = vrot.lane.b32.xlu0 %v6070_v57, %s2012_s20  ;;  %v1283_v59 = vsel %vm1273_vm1, %v1218_v3, %v6071_v1  ;;  %v1282_v61 = vsel %vm1273_vm1, %v1217_v45, %v6072_v44  ;;  %v6073_v0 = vld [vmem:[#allocation339_spill] sm:$0xff]  ;;  %v6074_v51 = vld [vmem:[#allocation340_spill] sm:$0xff]  ;;  %v6075_v47 = vld [vmem:[#allocation2_spill] sm:$0xff]  ;;  %v1095_v43 = vpop.permute.xlu1 %1094  ;;  %v1093_v63 = vpop.permute.xlu0 %1092 }
 0x411   : > { %v1541_v36 = vsel %vm1533_vm5, %v1476_v55, %v6073_v0  ;;  %v1540_v42 = vsel %vm1533_vm5, %v1475_v53, %v6074_v51  ;;  %v1348_v56 = vsel %vm1338_vm2, %v1283_v59, %v6075_v47  ;;  %v6076_v41 = vld [vmem:[#allocation143_spill] sm:$0xff]  ;;  %v6077_v46 = vld [vmem:[#allocation398_spill] sm:$0xff]  ;;  %v6080_v45 = vld [vmem:[#allocation204_spill] sm:$0xff] }
 0x412   : > { %v1347_v40 = vsel %vm1338_vm2, %v1282_v61, %v6076_v41  ;;  %v1606_v3 = vsel %vm1598_vm6, %v1541_v36, %v6077_v46  ;;  %v6078_v2 = vld [vmem:[#allocation399_spill] sm:$0xff]  ;;  %v1943_v53 = vld [vmem:[%s2039_s12 + $0x58] sm:$0xff]  ;;  %v1944_v59 = vld [vmem:[%s2039_s12 + $0x50] sm:$0xff] }
 0x413   : > { %v1605_v49 = vsel %vm1598_vm6, %v1540_v42, %v6078_v2  ;;  %v6079_v54 = vld [vmem:[#allocation203_spill] sm:$0xff]  ;;  %v1412_v50 = vsel %vm1403_vm3, %v1347_v40, %v6080_v45  ;;  %v1671_v55 = vsel %vm1663_vm7, %v1606_v3, %v1095_v43  ;;  %v6081_v57 = vld [vmem:[#allocation25_spill] sm:$0xff]  ;;  %v6082_v44 = vld [vmem:[#allocation26_spill] sm:$0xff] }
 0x414   : > { %v1413_v5 = vsel %vm1403_vm3, %v1348_v56, %v6079_v54  ;;  %v1670_v62 = vsel %vm1663_vm7, %v1605_v49, %v1093_v63  ;;  %v1220_v1 = vsel %vm1208_vm0, %v1943_v53, %v6081_v57  ;;  %v1219_v61 = vsel %vm1208_vm0, %v1944_v59, %v6082_v44  ;;  %v6083_v0 = vld [vmem:[#allocation280_spill] sm:$0xff]  ;;  %v6084_v51 = vld [vmem:[#allocation281_spill] sm:$0xff]  ;;  %1736 = vst.msk [vmem:[%s4383_s23 + $0x38] sm:$0xff] %vm1728_vm8, %v1671_v55  ;;  %v6086_v41 = vld [vmem:[#allocation86_spill] sm:$0xff]  ;;  %v1099_v53 = vpop.permute.xlu1 %1098  ;;  %v1097_v57 = vpop.permute.xlu0 %1096 }
 0x415   : > { %v1478_v36 = vsel %vm1468_vm4, %v1413_v5, %v6083_v0  ;;  %v1477_v42 = vsel %vm1468_vm4, %v1412_v50, %v6084_v51  ;;  %1735 = vst.msk [vmem:[%s4383_s23 + $0x30] sm:$0xff] %vm1728_vm8, %v1670_v62  ;;  %v6085_v47 = vld [vmem:[#allocation85_spill] sm:$0xff]  ;;  %v1284_v40 = vsel %vm1273_vm1, %v1219_v61, %v6086_v41  ;;  %v6088_v2 = vld [vmem:[#allocation342_spill] sm:$0xff]  ;;  %v6089_v43 = vld [vmem:[#allocation144_spill] sm:$0xff] }
 0x416   : > { %v1285_v56 = vsel %vm1273_vm1, %v1220_v1, %v6085_v47  ;;  %v6087_v46 = vld [vmem:[#allocation341_spill] sm:$0xff]  ;;  %v1542_v49 = vsel %vm1533_vm5, %v1477_v42, %v6088_v2  ;;  %v6091_v45 = vld [vmem:[#allocation202_spill] sm:$0xff]  ;;  %v6092_v55 = vld [vmem:[#allocation400_spill] sm:$0xff] }
 0x417   : > { %v1543_v3 = vsel %vm1533_vm5, %v1478_v36, %v6087_v46  ;;  %v1350_v63 = vsel %vm1338_vm2, %v1285_v56, %v6089_v43  ;;  %v6090_v54 = vld [vmem:[#allocation145_spill] sm:$0xff]  ;;  %v1607_v62 = vsel %vm1598_vm6, %v1542_v49, %v6092_v55  ;;  %v6094_v44 = vld [vmem:[#allocation206_spill] sm:$0xff]  ;;  %v1945_v51 = vld [vmem:[%s2039_s12 + $0x68] sm:$0xff] }
 0x418   : > { %v1349_v5 = vsel %vm1338_vm2, %v1284_v40, %v6090_v54  ;;  %v1608_v50 = vsel %vm1598_vm6, %v1543_v3, %v6091_v45  ;;  %v6093_v1 = vld [vmem:[#allocation205_spill] sm:$0xff]  ;;  %v1672_v36 = vsel %vm1663_vm7, %v1607_v62, %v1097_v57  ;;  %v6095_v42 = vld [vmem:[#allocation27_spill] sm:$0xff]  ;;  %v1946_v56 = vld [vmem:[%s2039_s12 + $0x60] sm:$0xff] }
 0x419   : > { %v1415_v59 = vsel %vm1403_vm3, %v1350_v63, %v6093_v1  ;;  %v1414_v61 = vsel %vm1403_vm3, %v1349_v5, %v6094_v44  ;;  %v1673_v0 = vsel %vm1663_vm7, %v1608_v50, %v1099_v53  ;;  %v1222_v47 = vsel %vm1208_vm0, %v1945_v51, %v6095_v42  ;;  %v6096_v41 = vld [vmem:[#allocation28_spill] sm:$0xff]  ;;  %v6097_v46 = vld [vmem:[#allocation282_spill] sm:$0xff]  ;;  %v6098_v2 = vld [vmem:[#allocation283_spill] sm:$0xff]  ;;  %1737 = vst.msk [vmem:[%s4383_s23 + $0x40] sm:$0xff] %vm1728_vm8, %v1672_v36  ;;  %v1103_v51 = vpop.permute.xlu1 %1102  ;;  %v1101_v42 = vpop.permute.xlu0 %1100 }
 0x41a   : > { %v1221_v40 = vsel %vm1208_vm0, %v1946_v56, %v6096_v41  ;;  %v1480_v3 = vsel %vm1468_vm4, %v1415_v59, %v6097_v46  ;;  %v1479_v49 = vsel %vm1468_vm4, %v1414_v61, %v6098_v2  ;;  %1738 = vst.msk [vmem:[%s4383_s23 + $0x48] sm:$0xff] %vm1728_vm8, %v1673_v0  ;;  %v6099_v43 = vld [vmem:[#allocation87_spill] sm:$0xff]  ;;  %v6100_v54 = vld [vmem:[#allocation88_spill] sm:$0xff]  ;;  %v6103_v53 = vld [vmem:[#allocation146_spill] sm:$0xff] }
 0x41b   : > { %v1287_v63 = vsel %vm1273_vm1, %v1222_v47, %v6099_v43  ;;  %v1286_v5 = vsel %vm1273_vm1, %v1221_v40, %v6100_v54  ;;  %v6101_v45 = vld [vmem:[#allocation343_spill] sm:$0xff]  ;;  %v6102_v55 = vld [vmem:[#allocation344_spill] sm:$0xff]  ;;  %v6105_v44 = vld [vmem:[#allocation401_spill] sm:$0xff] }
 0x41c   : > { %v1545_v50 = vsel %vm1533_vm5, %v1480_v3, %v6101_v45  ;;  %v1544_v62 = vsel %vm1533_vm5, %v1479_v49, %v6102_v55  ;;  %v1352_v57 = vsel %vm1338_vm2, %v1287_v63, %v6103_v53  ;;  %v6104_v1 = vld [vmem:[#allocation147_spill] sm:$0xff]  ;;  %v6106_v0 = vld [vmem:[#allocation402_spill] sm:$0xff]  ;;  %v6108_v41 = vld [vmem:[#allocation208_spill] sm:$0xff] }
 0x41d   : > { %v1351_v59 = vsel %vm1338_vm2, %v1286_v5, %v6104_v1  ;;  %v1610_v61 = vsel %vm1598_vm6, %v1545_v50, %v6105_v44  ;;  %v1609_v36 = vsel %vm1598_vm6, %v1544_v62, %v6106_v0  ;;  %v6107_v47 = vld [vmem:[#allocation207_spill] sm:$0xff]  ;;  %v1947_v2 = vld [vmem:[%s2039_s12 + $0x78] sm:$0xff]  ;;  %v1948_v63 = vld [vmem:[%s2039_s12 + $0x70] sm:$0xff] }
 0x41e   : > { %v1417_v56 = vsel %vm1403_vm3, %v1352_v57, %v6107_v47  ;;  %v1416_v40 = vsel %vm1403_vm3, %v1351_v59, %v6108_v41  ;;  %v1675_v46 = vsel %vm1663_vm7, %v1610_v61, %v1103_v51  ;;  %v1674_v3 = vsel %vm1663_vm7, %v1609_v36, %v1101_v42  ;;  %v6109_v49 = vld [vmem:[#allocation29_spill] sm:$0xff]  ;;  %v6110_v54 = vld [vmem:[#allocation30_spill] sm:$0xff]  ;;  %v6111_v45 = vld [vmem:[#allocation284_spill] sm:$0xff] }
 0x41f   : > { %v1224_v43 = vsel %vm1208_vm0, %v1947_v2, %v6109_v49  ;;  %v1223_v5 = vsel %vm1208_vm0, %v1948_v63, %v6110_v54  ;;  %v1482_v50 = vsel %vm1468_vm4, %v1417_v56, %v6111_v45  ;;  %v6112_v55 = vld [vmem:[#allocation285_spill] sm:$0xff]  ;;  %1740 = vst.msk [vmem:[%s4383_s23 + $0x58] sm:$0xff] %vm1728_vm8, %v1675_v46  ;;  %1739 = vst.msk [vmem:[%s4383_s23 + $0x50] sm:$0xff] %vm1728_vm8, %v1674_v3  ;;  %v6114_v1 = vld [vmem:[#allocation90_spill] sm:$0xff]  ;;  %v1107_v3 = vpop.permute.xlu1 %1106  ;;  %v1105_v2 = vpop.permute.xlu0 %1104 }
 0x420   : > { %v1481_v62 = vsel %vm1468_vm4, %v1416_v40, %v6112_v55  ;;  %v6113_v53 = vld [vmem:[#allocation89_spill] sm:$0xff]  ;;  %v1288_v59 = vsel %vm1273_vm1, %v1223_v5, %v6114_v1  ;;  %v6116_v0 = vld [vmem:[#allocation346_spill] sm:$0xff]  ;;  %v6117_v51 = vld [vmem:[#allocation148_spill] sm:$0xff] }
 0x421   : > { %v1289_v57 = vsel %vm1273_vm1, %v1224_v43, %v6113_v53  ;;  %v6115_v44 = vld [vmem:[#allocation345_spill] sm:$0xff]  ;;  %v1546_v36 = vsel %vm1533_vm5, %v1481_v62, %v6116_v0  ;;  %v6119_v41 = vld [vmem:[#allocation403_spill] sm:$0xff]  ;;  %v6121_v63 = vld [vmem:[#allocation210_spill] sm:$0xff] }
 0x422   : > { %v1547_v61 = vsel %vm1533_vm5, %v1482_v50, %v6115_v44  ;;  %v1354_v42 = vsel %vm1338_vm2, %v1289_v57, %v6117_v51  ;;  %v6118_v47 = vld [vmem:[#allocation149_spill] sm:$0xff]  ;;  %v1611_v46 = vsel %vm1598_vm6, %v1546_v36, %v4127_v60  ;;  %v1949_v50 = vld [vmem:[%s2039_s12 + $0x88] sm:$0xff]  ;;  %v1950_v53 = vld [vmem:[%s2039_s12 + $0x80] sm:$0xff] }
 0x423   : > { %v1353_v56 = vsel %vm1338_vm2, %v1288_v59, %v6118_v47  ;;  %v1612_v40 = vsel %vm1598_vm6, %v1547_v61, %v6119_v41  ;;  %v6120_v49 = vld [vmem:[#allocation209_spill] sm:$0xff]  ;;  %v1676_v45 = vsel %vm1663_vm7, %v1611_v46, %v1105_v2  ;;  %v6122_v55 = vld [vmem:[#allocation31_spill] sm:$0xff]  ;;  %v6123_v57 = vld [vmem:[#allocation32_spill] sm:$0xff] }
 0x424   : > { %v1419_v43 = vsel %vm1403_vm3, %v1354_v42, %v6120_v49  ;;  %v1418_v54 = vsel %vm1403_vm3, %v1353_v56, %v6121_v63  ;;  %v1677_v5 = vsel %vm1663_vm7, %v1612_v40, %v1107_v3  ;;  %v1226_v62 = vsel %vm1208_vm0, %v1949_v50, %v6122_v55  ;;  %v6124_v1 = vld [vmem:[#allocation286_spill] sm:$0xff]  ;;  %v6125_v44 = vld [vmem:[#allocation287_spill] sm:$0xff]  ;;  %1741 = vst.msk [vmem:[%s4383_s23 + $0x60] sm:$0xff] %vm1728_vm8, %v1676_v45  ;;  %v6127_v51 = vld [vmem:[#allocation92_spill] sm:$0xff]  ;;  %v1109_v45 = vpop.permute.xlu0 %1108 }
 0x425   : > { %v1225_v60 = vsel %vm1208_vm0, %v1950_v53, %v6123_v57  ;;  %v1484_v59 = vsel %vm1468_vm4, %v1419_v43, %v6124_v1  ;;  %v1483_v61 = vsel %vm1468_vm4, %v1418_v54, %v6125_v44  ;;  %1742 = vst.msk [vmem:[%s4383_s23 + $0x68] sm:$0xff] %vm1728_vm8, %v1677_v5  ;;  %v6126_v0 = vld [vmem:[#allocation91_spill] sm:$0xff]  ;;  %v6129_v41 = vld [vmem:[#allocation348_spill] sm:$0xff]  ;;  %v6130_v46 = vld [vmem:[#allocation150_spill] sm:$0xff]  ;;  %v1111_v5 = vpop.permute.xlu1 %1110 }
 0x426   : > { %v1291_v36 = vsel %vm1273_vm1, %v1226_v62, %v6126_v0  ;;  %v1290_v42 = vsel %vm1273_vm1, %v1225_v60, %v6127_v51  ;;  %v6128_v47 = vld [vmem:[#allocation347_spill] sm:$0xff]  ;;  %v1548_v40 = vsel %vm1533_vm5, %v1483_v61, %v6129_v41  ;;  %v6132_v43 = vld [vmem:[#allocation404_spill] sm:$0xff]  ;;  %v1951_v1 = vld [vmem:[%s2039_s12 + $0x98] sm:$0xff] }
 0x427   : > { %v1549_v56 = vsel %vm1533_vm5, %v1484_v59, %v6128_v47  ;;  %v1356_v3 = vsel %vm1338_vm2, %v1291_v36, %v6130_v46  ;;  %v6131_v2 = vld [vmem:[#allocation151_spill] sm:$0xff]  ;;  %v1613_v54 = vsel %vm1598_vm6, %v1548_v40, %v4135_v52  ;;  %v6134_v62 = vld [vmem:[#allocation212_spill] sm:$0xff]  ;;  %v6135_v59 = vld [vmem:[#allocation33_spill] sm:$0xff] }
 0x428   : > { %v1355_v49 = vsel %vm1338_vm2, %v1290_v42, %v6131_v2  ;;  %v1614_v63 = vsel %vm1598_vm6, %v1549_v56, %v6132_v43  ;;  %v6133_v50 = vld [vmem:[#allocation211_spill] sm:$0xff]  ;;  %v1678_v60 = vsel %vm1663_vm7, %v1613_v54, %v1109_v45  ;;  %v1228_v44 = vsel %vm1208_vm0, %v1951_v1, %v6135_v59  ;;  %v1952_v61 = vld [vmem:[%s2039_s12 + $0x90] sm:$0xff]  ;;  %v6136_v0 = vld [vmem:[#allocation34_spill] sm:$0xff] }
 0x429   : > { %v1421_v55 = vsel %vm1403_vm3, %v1356_v3, %v6133_v50  ;;  %v1420_v53 = vsel %vm1403_vm3, %v1355_v49, %v6134_v62  ;;  %v1679_v57 = vsel %vm1663_vm7, %v1614_v63, %v1111_v5  ;;  %v1227_v52 = vsel %vm1208_vm0, %v1952_v61, %v6136_v0  ;;  %v6137_v36 = vld [vmem:[#allocation288_spill] sm:$0xff]  ;;  %v6138_v42 = vld [vmem:[#allocation289_spill] sm:$0xff]  ;;  %1743 = vst.msk [vmem:[%s4383_s23 + $0x70] sm:$0xff] %vm1728_vm8, %v1678_v60  ;;  %v6140_v40 = vld [vmem:[#allocation94_spill] sm:$0xff]  ;;  %v1115_v62 = vpop.permute.xlu1 %1114 }
 0x42a   : > { %v1486_v51 = vsel %vm1468_vm4, %v1421_v55, %v6137_v36  ;;  %v1485_v47 = vsel %vm1468_vm4, %v1420_v53, %v6138_v42  ;;  %1744 = vst.msk [vmem:[%s4383_s23 + $0x78] sm:$0xff] %vm1728_vm8, %v1679_v57  ;;  %v6139_v56 = vld [vmem:[#allocation93_spill] sm:$0xff]  ;;  %v1292_v46 = vsel %vm1273_vm1, %v1227_v52, %v6140_v40  ;;  %v6142_v49 = vld [vmem:[#allocation350_spill] sm:$0xff]  ;;  %v6143_v63 = vld [vmem:[#allocation152_spill] sm:$0xff]  ;;  %v1113_v53 = vpop.permute.xlu0 %1112 }
 0x42b   : > { %v1293_v41 = vsel %vm1273_vm1, %v1228_v44, %v6139_v56  ;;  %v6141_v3 = vld [vmem:[#allocation349_spill] sm:$0xff]  ;;  %v1550_v43 = vsel %vm1533_vm5, %v1485_v47, %v6142_v49  ;;  %v6146_v1 = vld [vmem:[#allocation214_spill] sm:$0xff]  ;;  %v1953_v0 = vld [vmem:[%s2039_s12 + $0xa8] sm:$0xff] }
 0x42c   : > { %v1551_v2 = vsel %vm1533_vm5, %v1486_v51, %v6141_v3  ;;  %v1358_v54 = vsel %vm1338_vm2, %v1293_v41, %v6143_v63  ;;  %v6144_v5 = vld [vmem:[#allocation153_spill] sm:$0xff]  ;;  %v1615_v55 = vsel %vm1598_vm6, %v1550_v43, %v4143_v48  ;;  %v6147_v52 = vld [vmem:[#allocation35_spill] sm:$0xff]  ;;  %v6148_v51 = vld [vmem:[#allocation36_spill] sm:$0xff] }
 0x42d   : > { %v1357_v45 = vsel %vm1338_vm2, %v1292_v46, %v6144_v5  ;;  %v1616_v50 = vsel %vm1598_vm6, %v1551_v2, %v4141_v58  ;;  %v6145_v57 = vld [vmem:[#allocation213_spill] sm:$0xff]  ;;  %v1680_v61 = vsel %vm1663_vm7, %v1615_v55, %v1113_v53  ;;  %v1230_v36 = vsel %vm1208_vm0, %v1953_v0, %v6147_v52  ;;  %v1954_v58 = vld [vmem:[%s2039_s12 + $0xa0] sm:$0xff]  ;;  %v6150_v56 = vld [vmem:[#allocation291_spill] sm:$0xff] }
 0x42e   : > { %v1423_v60 = vsel %vm1403_vm3, %v1358_v54, %v6145_v57  ;;  %v1422_v59 = vsel %vm1403_vm3, %v1357_v45, %v6146_v1  ;;  %v1681_v44 = vsel %vm1663_vm7, %v1616_v50, %v1115_v62  ;;  %v1229_v48 = vsel %vm1208_vm0, %v1954_v58, %v6148_v51  ;;  %v6149_v42 = vld [vmem:[#allocation290_spill] sm:$0xff]  ;;  %1745 = vst.msk [vmem:[%s4383_s23 + $0x80] sm:$0xff] %vm1728_vm8, %v1680_v61  ;;  %v6151_v40 = vld [vmem:[#allocation95_spill] sm:$0xff]  ;;  %v6152_v3 = vld [vmem:[#allocation96_spill] sm:$0xff]  ;;  %v1119_v57 = vpop.permute.xlu1 %1118 }
 0x42f   : > { %v1488_v47 = vsel %vm1468_vm4, %v1423_v60, %v6149_v42  ;;  %v1487_v41 = vsel %vm1468_vm4, %v1422_v59, %v6150_v56  ;;  %1746 = vst.msk [vmem:[%s4383_s23 + $0x88] sm:$0xff] %vm1728_vm8, %v1681_v44  ;;  %v1295_v46 = vsel %vm1273_vm1, %v1230_v36, %v6151_v40  ;;  %v1294_v2 = vsel %vm1273_vm1, %v1229_v48, %v6152_v3  ;;  %v6153_v49 = vld [vmem:[#allocation351_spill] sm:$0xff]  ;;  %v6154_v63 = vld [vmem:[#allocation352_spill] sm:$0xff]  ;;  %v6155_v5 = vld [vmem:[#allocation154_spill] sm:$0xff]  ;;  %v1117_v60 = vpop.permute.xlu0 %1116 }
 0x430   : > { %v1553_v43 = vsel %vm1533_vm5, %v1488_v47, %v6153_v49  ;;  %v1552_v54 = vsel %vm1533_vm5, %v1487_v41, %v6154_v63  ;;  %v1360_v45 = vsel %vm1338_vm2, %v1295_v46, %v6155_v5  ;;  %v6156_v50 = vld [vmem:[#allocation155_spill] sm:$0xff]  ;;  %v6158_v44 = vld [vmem:[#allocation216_spill] sm:$0xff]  ;;  %v1955_v36 = vld [vmem:[%s2039_s12 + $0xb8] sm:$0xff] }
 0x431   : > { %v1359_v55 = vsel %vm1338_vm2, %v1294_v2, %v6156_v50  ;;  %v1618_v62 = vsel %vm1598_vm6, %v1553_v43, %v4149_v38  ;;  %v1617_v53 = vsel %vm1598_vm6, %v1552_v54, %v4151_v39  ;;  %v6157_v1 = vld [vmem:[#allocation215_spill] sm:$0xff]  ;;  %v6159_v58 = vld [vmem:[#allocation37_spill] sm:$0xff]  ;;  %v1956_v38 = vld [vmem:[%s2039_s12 + $0xb0] sm:$0xff] }
 0x432   : > { %v1425_v59 = vsel %vm1403_vm3, %v1360_v45, %v6157_v1  ;;  %v1424_v61 = vsel %vm1403_vm3, %v1359_v55, %v6158_v44  ;;  %v1683_v0 = vsel %vm1663_vm7, %v1618_v62, %v1119_v57  ;;  %v1682_v52 = vsel %vm1663_vm7, %v1617_v53, %v1117_v60  ;;  %v6160_v48 = vld [vmem:[#allocation38_spill] sm:$0xff]  ;;  %v6161_v42 = vld [vmem:[#allocation292_spill] sm:$0xff]  ;;  %v6162_v56 = vld [vmem:[#allocation293_spill] sm:$0xff]  ;;  %v1123_v57 = vpop.permute.xlu1 %1122 }
 0x433   : > { %v1232_v51 = vsel %vm1208_vm0, %v1955_v36, %v6159_v58  ;;  %v1231_v39 = vsel %vm1208_vm0, %v1956_v38, %v6160_v48  ;;  %v1490_v47 = vsel %vm1468_vm4, %v1425_v59, %v6161_v42  ;;  %v1489_v41 = vsel %vm1468_vm4, %v1424_v61, %v6162_v56  ;;  %1748 = vst.msk [vmem:[%s4383_s23 + $0x98] sm:$0xff] %vm1728_vm8, %v1683_v0  ;;  %v6163_v40 = vld [vmem:[#allocation97_spill] sm:$0xff]  ;;  %v6164_v3 = vld [vmem:[#allocation98_spill] sm:$0xff]  ;;  %v6167_v5 = vld [vmem:[#allocation156_spill] sm:$0xff]  ;;  %v1121_v60 = vpop.permute.xlu0 %1120 }
 0x434   : > { %1747 = vst.msk [vmem:[%s4383_s23 + $0x90] sm:$0xff] %vm1728_vm8, %v1682_v52  ;;  %v1297_v46 = vsel %vm1273_vm1, %v1232_v51, %v6163_v40  ;;  %v1296_v2 = vsel %vm1273_vm1, %v1231_v39, %v6164_v3  ;;  %v6165_v49 = vld [vmem:[#allocation353_spill] sm:$0xff]  ;;  %v6166_v63 = vld [vmem:[#allocation354_spill] sm:$0xff]  ;;  %v1957_v36 = vld [vmem:[%s2039_s12 + $0xc8] sm:$0xff] }
 0x435   : > { %v1555_v43 = vsel %vm1533_vm5, %v1490_v47, %v6165_v49  ;;  %v1554_v54 = vsel %vm1533_vm5, %v1489_v41, %v6166_v63  ;;  %v1362_v45 = vsel %vm1338_vm2, %v1297_v46, %v6167_v5  ;;  %v6168_v50 = vld [vmem:[#allocation157_spill] sm:$0xff]  ;;  %v6170_v44 = vld [vmem:[#allocation218_spill] sm:$0xff]  ;;  %v6171_v58 = vld [vmem:[#allocation39_spill] sm:$0xff] }
 0x436   : > { %v1361_v55 = vsel %vm1338_vm2, %v1296_v2, %v6168_v50  ;;  %v1620_v62 = vsel %vm1598_vm6, %v1555_v43, %v4157_v34  ;;  %v1619_v53 = vsel %vm1598_vm6, %v1554_v54, %v4159_v35  ;;  %v6169_v1 = vld [vmem:[#allocation217_spill] sm:$0xff]  ;;  %v1234_v51 = vsel %vm1208_vm0, %v1957_v36, %v6171_v58  ;;  %v1958_v34 = vld [vmem:[%s2039_s12 + $0xc0] sm:$0xff]  ;;  %v6172_v38 = vld [vmem:[#allocation40_spill] sm:$0xff] }
 0x437   : > { %v1427_v59 = vsel %vm1403_vm3, %v1362_v45, %v6169_v1  ;;  %v1426_v61 = vsel %vm1403_vm3, %v1361_v55, %v6170_v44  ;;  %v1685_v0 = vsel %vm1663_vm7, %v1620_v62, %v1123_v57  ;;  %v1684_v52 = vsel %vm1663_vm7, %v1619_v53, %v1121_v60  ;;  %v6173_v48 = vld [vmem:[#allocation294_spill] sm:$0xff]  ;;  %v6174_v42 = vld [vmem:[#allocation295_spill] sm:$0xff]  ;;  %v6176_v40 = vld [vmem:[#allocation100_spill] sm:$0xff]  ;;  %v1127_v62 = vpop.permute.xlu1 %1126  ;;  %v1125_v53 = vpop.permute.xlu0 %1124 }
 0x438   : > { %v1233_v35 = vsel %vm1208_vm0, %v1958_v34, %v6172_v38  ;;  %v1492_v39 = vsel %vm1468_vm4, %v1427_v59, %v6173_v48  ;;  %v1491_v47 = vsel %vm1468_vm4, %v1426_v61, %v6174_v42  ;;  %1750 = vst.msk [vmem:[%s4383_s23 + $0xa8] sm:$0xff] %vm1728_vm8, %v1685_v0  ;;  %1749 = vst.msk [vmem:[%s4383_s23 + $0xa0] sm:$0xff] %vm1728_vm8, %v1684_v52  ;;  %v6175_v56 = vld [vmem:[#allocation99_spill] sm:$0xff]  ;;  %v6178_v49 = vld [vmem:[#allocation356_spill] sm:$0xff] }
 0x439   : > { %v1299_v41 = vsel %vm1273_vm1, %v1234_v51, %v6175_v56  ;;  %v1298_v46 = vsel %vm1273_vm1, %v1233_v35, %v6176_v40  ;;  %v6177_v3 = vld [vmem:[#allocation355_spill] sm:$0xff]  ;;  %v1556_v43 = vsel %vm1533_vm5, %v1491_v47, %v6178_v49  ;;  %v6179_v63 = vld [vmem:[#allocation158_spill] sm:$0xff]  ;;  %v6182_v1 = vld [vmem:[#allocation220_spill] sm:$0xff] }
 0x43a   : > { %v1557_v2 = vsel %vm1533_vm5, %v1492_v39, %v6177_v3  ;;  %v1364_v54 = vsel %vm1338_vm2, %v1299_v41, %v6179_v63  ;;  %v6180_v5 = vld [vmem:[#allocation159_spill] sm:$0xff]  ;;  %v1621_v55 = vsel %vm1598_vm6, %v1556_v43, %v4167_v31  ;;  %v1959_v0 = vld [vmem:[%s2039_s12 + $0xd8] sm:$0xff]  ;;  %v6184_v58 = vld [vmem:[#allocation42_spill] sm:$0xff] }
 0x43b   : > { %v1363_v45 = vsel %vm1338_vm2, %v1298_v46, %v6180_v5  ;;  %v1622_v50 = vsel %vm1598_vm6, %v1557_v2, %v4165_v30  ;;  %v6181_v57 = vld [vmem:[#allocation219_spill] sm:$0xff]  ;;  %v1686_v61 = vsel %vm1663_vm7, %v1621_v55, %v1125_v53  ;;  %v6183_v52 = vld [vmem:[#allocation41_spill] sm:$0xff]  ;;  %v1960_v30 = vld [vmem:[%s2039_s12 + $0xd0] sm:$0xff]  ;;  %v1131_v5 = vpop.permute.xlu1 %1130 }
 0x43c   : > { %v1429_v60 = vsel %vm1403_vm3, %v1364_v54, %v6181_v57  ;;  %v1428_v59 = vsel %vm1403_vm3, %v1363_v45, %v6182_v1  ;;  %v1687_v44 = vsel %vm1663_vm7, %v1622_v50, %v1127_v62  ;;  %v1236_v36 = vsel %vm1208_vm0, %v1959_v0, %v6183_v52  ;;  %v6185_v51 = vld [vmem:[#allocation296_spill] sm:$0xff]  ;;  %v6186_v38 = vld [vmem:[#allocation297_spill] sm:$0xff]  ;;  %1751 = vst.msk [vmem:[%s4383_s23 + $0xb0] sm:$0xff] %vm1728_vm8, %v1686_v61  ;;  %v6188_v42 = vld [vmem:[#allocation102_spill] sm:$0xff]  ;;  %v1129_v45 = vpop.permute.xlu0 %1128 }
 0x43d   : > { %v1235_v31 = vsel %vm1208_vm0, %v1960_v30, %v6184_v58  ;;  %v1494_v34 = vsel %vm1468_vm4, %v1429_v60, %v6185_v51  ;;  %v1493_v35 = vsel %vm1468_vm4, %v1428_v59, %v6186_v38  ;;  %1752 = vst.msk [vmem:[%s4383_s23 + $0xb8] sm:$0xff] %vm1728_vm8, %v1687_v44  ;;  %v6187_v48 = vld [vmem:[#allocation101_spill] sm:$0xff]  ;;  %v6190_v40 = vld [vmem:[#allocation358_spill] sm:$0xff]  ;;  %v6191_v3 = vld [vmem:[#allocation160_spill] sm:$0xff] }
 0x43e   : > { %v1301_v39 = vsel %vm1273_vm1, %v1236_v36, %v6187_v48  ;;  %v1300_v47 = vsel %vm1273_vm1, %v1235_v31, %v6188_v42  ;;  %v6189_v56 = vld [vmem:[#allocation357_spill] sm:$0xff]  ;;  %v1558_v46 = vsel %vm1533_vm5, %v1493_v35, %v6190_v40  ;;  %v6194_v62 = vld [vmem:[#allocation222_spill] sm:$0xff]  ;;  %v1961_v1 = vld [vmem:[%s2039_s12 + $0xe8] sm:$0xff] }
 0x43f   : > { %v1559_v41 = vsel %vm1533_vm5, %v1494_v34, %v6189_v56  ;;  %v1366_v2 = vsel %vm1338_vm2, %v1301_v39, %v6191_v3  ;;  %v6192_v49 = vld [vmem:[#allocation161_spill] sm:$0xff]  ;;  %v1623_v54 = vsel %vm1598_vm6, %v1558_v46, %v4175_v27  ;;  %v6195_v59 = vld [vmem:[#allocation43_spill] sm:$0xff]  ;;  %v6196_v61 = vld [vmem:[#allocation44_spill] sm:$0xff]  ;;  %v1135_v3 = vpop.permute.xlu1 %1134 }
 0x440   : > { %v1365_v43 = vsel %vm1338_vm2, %v1300_v47, %v6192_v49  ;;  %v1624_v63 = vsel %vm1598_vm6, %v1559_v41, %v4173_v26  ;;  %v6193_v50 = vld [vmem:[#allocation221_spill] sm:$0xff]  ;;  %v1688_v60 = vsel %vm1663_vm7, %v1623_v54, %v1129_v45  ;;  %v1238_v44 = vsel %vm1208_vm0, %v1961_v1, %v6195_v59  ;;  %v1962_v26 = vld [vmem:[%s2039_s12 + $0xe0] sm:$0xff]  ;;  %v6198_v36 = vld [vmem:[#allocation299_spill] sm:$0xff] }
 0x441   : > { %v1431_v55 = vsel %vm1403_vm3, %v1366_v2, %v6193_v50  ;;  %v1430_v53 = vsel %vm1403_vm3, %v1365_v43, %v6194_v62  ;;  %v1689_v57 = vsel %vm1663_vm7, %v1624_v63, %v1131_v5  ;;  %v1237_v27 = vsel %vm1208_vm0, %v1962_v26, %v6196_v61  ;;  %v6197_v0 = vld [vmem:[#allocation298_spill] sm:$0xff]  ;;  %1753 = vst.msk [vmem:[%s4383_s23 + $0xc0] sm:$0xff] %vm1728_vm8, %v1688_v60  ;;  %v6199_v58 = vld [vmem:[#allocation103_spill] sm:$0xff]  ;;  %v6200_v51 = vld [vmem:[#allocation104_spill] sm:$0xff]  ;;  %v1133_v2 = vpop.permute.xlu0 %1132 }
 0x442   : > { %v1496_v52 = vsel %vm1468_vm4, %v1431_v55, %v6197_v0  ;;  %v1495_v30 = vsel %vm1468_vm4, %v1430_v53, %v6198_v36  ;;  %1754 = vst.msk [vmem:[%s4383_s23 + $0xc8] sm:$0xff] %vm1728_vm8, %v1689_v57  ;;  %v1303_v31 = vsel %vm1273_vm1, %v1238_v44, %v6199_v58  ;;  %v1302_v34 = vsel %vm1273_vm1, %v1237_v27, %v6200_v51  ;;  %v6201_v38 = vld [vmem:[#allocation359_spill] sm:$0xff]  ;;  %v6202_v48 = vld [vmem:[#allocation360_spill] sm:$0xff]  ;;  %v6203_v42 = vld [vmem:[#allocation162_spill] sm:$0xff] }
 0x443   : > { %v1561_v35 = vsel %vm1533_vm5, %v1496_v52, %v6201_v38  ;;  %v1560_v39 = vsel %vm1533_vm5, %v1495_v30, %v6202_v48  ;;  %v1368_v47 = vsel %vm1338_vm2, %v1303_v31, %v6203_v42  ;;  %v6204_v56 = vld [vmem:[#allocation163_spill] sm:$0xff]  ;;  %v6206_v63 = vld [vmem:[#allocation224_spill] sm:$0xff]  ;;  %v1963_v50 = vld [vmem:[%s2039_s12 + $0xf8] sm:$0xff]  ;;  %v1139_v48 = vpop.permute.xlu1 %1138 }
 0x444   : > { %v1367_v41 = vsel %vm1338_vm2, %v1302_v34, %v6204_v56  ;;  %v1626_v40 = vsel %vm1598_vm6, %v1561_v35, %v4181_v22  ;;  %v1625_v46 = vsel %vm1598_vm6, %v1560_v39, %v4183_v23  ;;  %v6205_v49 = vld [vmem:[#allocation223_spill] sm:$0xff]  ;;  %v6207_v55 = vld [vmem:[#allocation45_spill] sm:$0xff]  ;;  %v1964_v22 = vld [vmem:[%s2039_s12 + $0xf0] sm:$0xff] }
 0x445   : > { %v1433_v43 = vsel %vm1403_vm3, %v1368_v47, %v6205_v49  ;;  %v1432_v54 = vsel %vm1403_vm3, %v1367_v41, %v6206_v63  ;;  %v1691_v5 = vsel %vm1663_vm7, %v1626_v40, %v1135_v3  ;;  %v1690_v45 = vsel %vm1663_vm7, %v1625_v46, %v1133_v2  ;;  %v6208_v53 = vld [vmem:[#allocation46_spill] sm:$0xff]  ;;  %v6209_v57 = vld [vmem:[#allocation300_spill] sm:$0xff]  ;;  %v6210_v1 = vld [vmem:[#allocation301_spill] sm:$0xff]  ;;  %v1137_v39 = vpop.permute.xlu0 %1136 }
 0x446   : > { %v1240_v62 = vsel %vm1208_vm0, %v1963_v50, %v6207_v55  ;;  %v1239_v23 = vsel %vm1208_vm0, %v1964_v22, %v6208_v53  ;;  %v1498_v60 = vsel %vm1468_vm4, %v1433_v43, %v6209_v57  ;;  %v1497_v59 = vsel %vm1468_vm4, %v1432_v54, %v6210_v1  ;;  %1756 = vst.msk [vmem:[%s4383_s23 + $0xd8] sm:$0xff] %vm1728_vm8, %v1691_v5  ;;  %v6211_v44 = vld [vmem:[#allocation105_spill] sm:$0xff]  ;;  %v6212_v61 = vld [vmem:[#allocation106_spill] sm:$0xff]  ;;  %v6215_v58 = vld [vmem:[#allocation164_spill] sm:$0xff] }
 0x447   : > { %1755 = vst.msk [vmem:[%s4383_s23 + $0xd0] sm:$0xff] %vm1728_vm8, %v1690_v45  ;;  %v1305_v26 = vsel %vm1273_vm1, %v1240_v62, %v6211_v44  ;;  %v1304_v27 = vsel %vm1273_vm1, %v1239_v23, %v6212_v61  ;;  %v6213_v0 = vld [vmem:[#allocation361_spill] sm:$0xff]  ;;  %v6214_v36 = vld [vmem:[#allocation362_spill] sm:$0xff]  ;;  %v1965_v3 = vld [vmem:[%s2039_s12 + $0x108] sm:$0xff] }
 0x448   : > { %v1563_v52 = vsel %vm1533_vm5, %v1498_v60, %v6213_v0  ;;  %v1562_v30 = vsel %vm1533_vm5, %v1497_v59, %v6214_v36  ;;  %v1370_v31 = vsel %vm1338_vm2, %v1305_v26, %v6215_v58  ;;  %v6216_v51 = vld [vmem:[#allocation165_spill] sm:$0xff]  ;;  %v6218_v56 = vld [vmem:[#allocation226_spill] sm:$0xff]  ;;  %v6219_v2 = vld [vmem:[#allocation47_spill] sm:$0xff]  ;;  %v1143_v0 = vpop.permute.xlu1 %1142 }
 0x449   : > { %v1369_v34 = vsel %vm1338_vm2, %v1304_v27, %v6216_v51  ;;  %v1628_v38 = vsel %vm1598_vm6, %v1563_v52, %v4189_v18  ;;  %v1627_v35 = vsel %vm1598_vm6, %v1562_v30, %v4191_v19  ;;  %v6217_v42 = vld [vmem:[#allocation225_spill] sm:$0xff]  ;;  %v1242_v49 = vsel %vm1208_vm0, %v1965_v3, %v6219_v2  ;;  %v1966_v18 = vld [vmem:[%s2039_s12 + $0x100] sm:$0xff]  ;;  %v6220_v43 = vld [vmem:[#allocation48_spill] sm:$0xff]  ;;  %v1141_v52 = vpop.permute.xlu0 %1140 }
 0x44a   : > { %v1435_v47 = vsel %vm1403_vm3, %v1370_v31, %v6217_v42  ;;  %v1434_v41 = vsel %vm1403_vm3, %v1369_v34, %v6218_v56  ;;  %v1693_v40 = vsel %vm1663_vm7, %v1628_v38, %v1139_v48  ;;  %v1692_v46 = vsel %vm1663_vm7, %v1627_v35, %v1137_v39  ;;  %v6221_v63 = vld [vmem:[#allocation302_spill] sm:$0xff]  ;;  %v6222_v5 = vld [vmem:[#allocation303_spill] sm:$0xff]  ;;  %v6224_v62 = vld [vmem:[#allocation108_spill] sm:$0xff] }
 0x44b   : > { %v1241_v19 = vsel %vm1208_vm0, %v1966_v18, %v6220_v43  ;;  %v1500_v54 = vsel %vm1468_vm4, %v1435_v47, %v6221_v63  ;;  %v1499_v45 = vsel %vm1468_vm4, %v1434_v41, %v6222_v5  ;;  %1758 = vst.msk [vmem:[%s4383_s23 + $0xe8] sm:$0xff] %vm1728_vm8, %v1693_v40  ;;  %1757 = vst.msk [vmem:[%s4383_s23 + $0xe0] sm:$0xff] %vm1728_vm8, %v1692_v46  ;;  %v6223_v50 = vld [vmem:[#allocation107_spill] sm:$0xff]  ;;  %v6226_v57 = vld [vmem:[#allocation364_spill] sm:$0xff] }
 0x44c   : > { %v1307_v55 = vsel %vm1273_vm1, %v1242_v49, %v6223_v50  ;;  %v1306_v22 = vsel %vm1273_vm1, %v1241_v19, %v6224_v62  ;;  %v6225_v53 = vld [vmem:[#allocation363_spill] sm:$0xff]  ;;  %v1564_v60 = vsel %vm1533_vm5, %v1499_v45, %v6226_v57  ;;  %v6227_v1 = vld [vmem:[#allocation166_spill] sm:$0xff]  ;;  %v6230_v58 = vld [vmem:[#allocation228_spill] sm:$0xff]  ;;  %v1147_v62 = vpop.permute.xlu1 %1146 }
 0x44d   : > { %v1565_v23 = vsel %vm1533_vm5, %v1500_v54, %v6225_v53  ;;  %v1372_v59 = vsel %vm1338_vm2, %v1307_v55, %v6227_v1  ;;  %v6228_v44 = vld [vmem:[#allocation167_spill] sm:$0xff]  ;;  %v1629_v27 = vsel %vm1598_vm6, %v1564_v60, %v4199_v15  ;;  %v1967_v38 = vld [vmem:[%s2039_s12 + $0x118] sm:$0xff]  ;;  %v6232_v39 = vld [vmem:[#allocation50_spill] sm:$0xff] }
 0x44e   : > { %v1371_v26 = vsel %vm1338_vm2, %v1306_v22, %v6228_v44  ;;  %v1630_v61 = vsel %vm1598_vm6, %v1565_v23, %v4197_v14  ;;  %v6229_v36 = vld [vmem:[#allocation227_spill] sm:$0xff]  ;;  %v1694_v34 = vsel %vm1663_vm7, %v1629_v27, %v1141_v52  ;;  %v6231_v35 = vld [vmem:[#allocation49_spill] sm:$0xff]  ;;  %v1968_v14 = vld [vmem:[%s2039_s12 + $0x110] sm:$0xff]  ;;  %v1145_v22 = vpop.permute.xlu0 %1144 }
 0x44f   : > { %v1437_v30 = vsel %vm1403_vm3, %v1372_v59, %v6229_v36  ;;  %v1436_v31 = vsel %vm1403_vm3, %v1371_v26, %v6230_v58  ;;  %v1695_v51 = vsel %vm1663_vm7, %v1630_v61, %v1143_v0  ;;  %v1244_v48 = vsel %vm1208_vm0, %v1967_v38, %v6231_v35  ;;  %v6233_v42 = vld [vmem:[#allocation304_spill] sm:$0xff]  ;;  %v6234_v56 = vld [vmem:[#allocation305_spill] sm:$0xff]  ;;  %1759 = vst.msk [vmem:[%s4383_s23 + $0xf0] sm:$0xff] %vm1728_vm8, %v1694_v34  ;;  %v6236_v3 = vld [vmem:[#allocation110_spill] sm:$0xff] }
 0x450   : > { %v1243_v15 = vsel %vm1208_vm0, %v1968_v14, %v6232_v39  ;;  %v1502_v47 = vsel %vm1468_vm4, %v1437_v30, %v6233_v42  ;;  %v1501_v41 = vsel %vm1468_vm4, %v1436_v31, %v6234_v56  ;;  %1760 = vst.msk [vmem:[%s4383_s23 + $0xf8] sm:$0xff] %vm1728_vm8, %v1695_v51  ;;  %v6235_v40 = vld [vmem:[#allocation109_spill] sm:$0xff]  ;;  %v6238_v43 = vld [vmem:[#allocation366_spill] sm:$0xff]  ;;  %v6239_v63 = vld [vmem:[#allocation168_spill] sm:$0xff] }
 0x451   : > { %v1309_v46 = vsel %vm1273_vm1, %v1244_v48, %v6235_v40  ;;  %v1308_v2 = vsel %vm1273_vm1, %v1243_v15, %v6236_v3  ;;  %v6237_v49 = vld [vmem:[#allocation365_spill] sm:$0xff]  ;;  %v1566_v19 = vsel %vm1533_vm5, %v1501_v41, %v6238_v43  ;;  %v6242_v57 = vld [vmem:[#allocation230_spill] sm:$0xff]  ;;  %v1969_v44 = vld [vmem:[%s2039_s12 + $0x128] sm:$0xff]  ;;  %v1151_v40 = vpop.permute.xlu1 %1150 }
 0x452   : > { %v1567_v18 = vsel %vm1533_vm5, %v1502_v47, %v6237_v49  ;;  %v1374_v54 = vsel %vm1338_vm2, %v1309_v46, %v6239_v63  ;;  %v6240_v5 = vld [vmem:[#allocation169_spill] sm:$0xff]  ;;  %v1631_v55 = vsel %vm1598_vm6, %v1566_v19, %v4207_v17  ;;  %v6243_v26 = vld [vmem:[#allocation51_spill] sm:$0xff]  ;;  %v6244_v27 = vld [vmem:[#allocation52_spill] sm:$0xff]  ;;  %v1149_v46 = vpop.permute.xlu0 %1148 }
 0x453   : > { %v1373_v45 = vsel %vm1338_vm2, %v1308_v2, %v6240_v5  ;;  %v1632_v50 = vsel %vm1598_vm6, %v1567_v18, %v4205_v16  ;;  %v6241_v53 = vld [vmem:[#allocation229_spill] sm:$0xff]  ;;  %v1696_v59 = vsel %vm1663_vm7, %v1631_v55, %v1145_v22  ;;  %v1246_v61 = vsel %vm1208_vm0, %v1969_v44, %v6243_v26  ;;  %v1970_v16 = vld [vmem:[%s2039_s12 + $0x120] sm:$0xff]  ;;  %v6246_v36 = vld [vmem:[#allocation307_spill] sm:$0xff] }
 0x454   : > { %v1439_v23 = vsel %vm1403_vm3, %v1374_v54, %v6241_v53  ;;  %v1438_v60 = vsel %vm1403_vm3, %v1373_v45, %v6242_v57  ;;  %v1697_v1 = vsel %vm1663_vm7, %v1632_v50, %v1147_v62  ;;  %v1245_v17 = vsel %vm1208_vm0, %v1970_v16, %v6244_v27  ;;  %v6245_v0 = vld [vmem:[#allocation306_spill] sm:$0xff]  ;;  %1761 = vst.msk [vmem:[%s4383_s23 + $0x100] sm:$0xff] %vm1728_vm8, %v1696_v59  ;;  %v6247_v58 = vld [vmem:[#allocation111_spill] sm:$0xff]  ;;  %v6248_v51 = vld [vmem:[#allocation112_spill] sm:$0xff] }
 0x455   : > { %v1504_v52 = vsel %vm1468_vm4, %v1439_v23, %v6245_v0  ;;  %v1503_v30 = vsel %vm1468_vm4, %v1438_v60, %v6246_v36  ;;  %1762 = vst.msk [vmem:[%s4383_s23 + $0x108] sm:$0xff] %vm1728_vm8, %v1697_v1  ;;  %v1311_v31 = vsel %vm1273_vm1, %v1246_v61, %v6247_v58  ;;  %v1310_v34 = vsel %vm1273_vm1, %v1245_v17, %v6248_v51  ;;  %v6249_v38 = vld [vmem:[#allocation367_spill] sm:$0xff]  ;;  %v6250_v48 = vld [vmem:[#allocation368_spill] sm:$0xff]  ;;  %v6251_v39 = vld [vmem:[#allocation170_spill] sm:$0xff]  ;;  %v1155_v36 = vpop.permute.xlu1 %1154 }
 0x456   : > { %v1569_v35 = vsel %vm1533_vm5, %v1504_v52, %v6249_v38  ;;  %v1568_v14 = vsel %vm1533_vm5, %v1503_v30, %v6250_v48  ;;  %v1376_v15 = vsel %vm1338_vm2, %v1311_v31, %v6251_v39  ;;  %v6252_v42 = vld [vmem:[#allocation171_spill] sm:$0xff]  ;;  %v6254_v49 = vld [vmem:[#allocation232_spill] sm:$0xff]  ;;  %v1971_v63 = vld [vmem:[%s2039_s12 + $0x138] sm:$0xff]  ;;  %v1153_v30 = vpop.permute.xlu0 %1152 }
 0x457   : > { %v1375_v47 = vsel %vm1338_vm2, %v1310_v34, %v6252_v42  ;;  %v1634_v56 = vsel %vm1598_vm6, %v1569_v35, %v4213_v12  ;;  %v1633_v41 = vsel %vm1598_vm6, %v1568_v14, %v4215_v13  ;;  %v6253_v3 = vld [vmem:[#allocation231_spill] sm:$0xff]  ;;  %v6255_v54 = vld [vmem:[#allocation53_spill] sm:$0xff]  ;;  %v1972_v12 = vld [vmem:[%s2039_s12 + $0x130] sm:$0xff] }
 0x458   : > { %v1441_v2 = vsel %vm1403_vm3, %v1376_v15, %v6253_v3  ;;  %v1440_v18 = vsel %vm1403_vm3, %v1375_v47, %v6254_v49  ;;  %v1699_v43 = vsel %vm1663_vm7, %v1634_v56, %v1151_v40  ;;  %v1698_v19 = vsel %vm1663_vm7, %v1633_v41, %v1149_v46  ;;  %v6256_v45 = vld [vmem:[#allocation54_spill] sm:$0xff]  ;;  %v6257_v50 = vld [vmem:[#allocation308_spill] sm:$0xff]  ;;  %v6258_v62 = vld [vmem:[#allocation309_spill] sm:$0xff] }
 0x459   : > { %v1248_v5 = vsel %vm1208_vm0, %v1971_v63, %v6255_v54  ;;  %v1247_v13 = vsel %vm1208_vm0, %v1972_v12, %v6256_v45  ;;  %v1506_v55 = vsel %vm1468_vm4, %v1441_v2, %v6257_v50  ;;  %v1505_v22 = vsel %vm1468_vm4, %v1440_v18, %v6258_v62  ;;  %1764 = vst.msk [vmem:[%s4383_s23 + $0x118] sm:$0xff] %vm1728_vm8, %v1699_v43  ;;  %v6259_v53 = vld [vmem:[#allocation113_spill] sm:$0xff]  ;;  %v6260_v57 = vld [vmem:[#allocation114_spill] sm:$0xff]  ;;  %v6263_v61 = vld [vmem:[#allocation172_spill] sm:$0xff]  ;;  %v1159_v50 = vpop.permute.xlu1 %1158 }
 0x45a   : > { %1763 = vst.msk [vmem:[%s4383_s23 + $0x110] sm:$0xff] %vm1728_vm8, %v1698_v19  ;;  %v1313_v23 = vsel %vm1273_vm1, %v1248_v5, %v6259_v53  ;;  %v1312_v60 = vsel %vm1273_vm1, %v1247_v13, %v6260_v57  ;;  %v6261_v1 = vld [vmem:[#allocation369_spill] sm:$0xff]  ;;  %v6262_v44 = vld [vmem:[#allocation370_spill] sm:$0xff]  ;;  %v1973_v48 = vld [vmem:[%s2039_s12 + $0x148] sm:$0xff] }
 0x45b   : > { %v1571_v59 = vsel %vm1533_vm5, %v1506_v55, %v6261_v1  ;;  %v1570_v26 = vsel %vm1533_vm5, %v1505_v22, %v6262_v44  ;;  %v1378_v16 = vsel %vm1338_vm2, %v1313_v23, %v6263_v61  ;;  %v6264_v27 = vld [vmem:[#allocation173_spill] sm:$0xff]  ;;  %v6266_v51 = vld [vmem:[#allocation234_spill] sm:$0xff]  ;;  %v6267_v14 = vld [vmem:[#allocation55_spill] sm:$0xff]  ;;  %v1157_v55 = vpop.permute.xlu0 %1156 }
 0x45c   : > { %v1377_v17 = vsel %vm1338_vm2, %v1312_v60, %v6264_v27  ;;  %v1636_v0 = vsel %vm1598_vm6, %v1571_v59, %v4221_v20  ;;  %v1635_v52 = vsel %vm1598_vm6, %v1570_v26, %v4223_v21  ;;  %v6265_v58 = vld [vmem:[#allocation233_spill] sm:$0xff]  ;;  %v1250_v39 = vsel %vm1208_vm0, %v1973_v48, %v6267_v14  ;;  %v1974_v20 = vld [vmem:[%s2039_s12 + $0x140] sm:$0xff]  ;;  %v6268_v15 = vld [vmem:[#allocation56_spill] sm:$0xff] }
 0x45d   : > { %v1443_v31 = vsel %vm1403_vm3, %v1378_v16, %v6265_v58  ;;  %v1442_v34 = vsel %vm1403_vm3, %v1377_v17, %v6266_v51  ;;  %v1701_v38 = vsel %vm1663_vm7, %v1636_v0, %v1155_v36  ;;  %v1700_v35 = vsel %vm1663_vm7, %v1635_v52, %v1153_v30  ;;  %v6269_v42 = vld [vmem:[#allocation310_spill] sm:$0xff]  ;;  %v6270_v56 = vld [vmem:[#allocation311_spill] sm:$0xff]  ;;  %v6272_v3 = vld [vmem:[#allocation116_spill] sm:$0xff] }
 0x45e   : > { %v1249_v21 = vsel %vm1208_vm0, %v1974_v20, %v6268_v15  ;;  %v1508_v47 = vsel %vm1468_vm4, %v1443_v31, %v6269_v42  ;;  %v1507_v41 = vsel %vm1468_vm4, %v1442_v34, %v6270_v56  ;;  %1766 = vst.msk [vmem:[%s4383_s23 + $0x128] sm:$0xff] %vm1728_vm8, %v1701_v38  ;;  %1765 = vst.msk [vmem:[%s4383_s23 + $0x120] sm:$0xff] %vm1728_vm8, %v1700_v35  ;;  %v6271_v40 = vld [vmem:[#allocation115_spill] sm:$0xff]  ;;  %v6274_v43 = vld [vmem:[#allocation372_spill] sm:$0xff]  ;;  %v1163_v15 = vpop.permute.xlu1 %1162 }
 0x45f   : > { %v1315_v46 = vsel %vm1273_vm1, %v1250_v39, %v6271_v40  ;;  %v1314_v2 = vsel %vm1273_vm1, %v1249_v21, %v6272_v3  ;;  %v6273_v49 = vld [vmem:[#allocation371_spill] sm:$0xff]  ;;  %v1572_v19 = vsel %vm1533_vm5, %v1507_v41, %v6274_v43  ;;  %v6275_v63 = vld [vmem:[#allocation174_spill] sm:$0xff]  ;;  %v6278_v53 = vld [vmem:[#allocation236_spill] sm:$0xff]  ;;  %v1161_v21 = vpop.permute.xlu0 %1160 }
 0x460   : > { %v1573_v18 = vsel %vm1533_vm5, %v1508_v47, %v6273_v49  ;;  %v1380_v54 = vsel %vm1338_vm2, %v1315_v46, %v6275_v63  ;;  %v6276_v5 = vld [vmem:[#allocation175_spill] sm:$0xff]  ;;  %v1637_v13 = vsel %vm1598_vm6, %v1572_v19, %v4231_v11  ;;  %v1975_v1 = vld [vmem:[%s2039_s12 + $0x158] sm:$0xff]  ;;  %v6280_v26 = vld [vmem:[#allocation58_spill] sm:$0xff] }
 0x461   : > { %v1379_v12 = vsel %vm1338_vm2, %v1314_v2, %v6276_v5  ;;  %v1638_v45 = vsel %vm1598_vm6, %v1573_v18, %v4229_v10  ;;  %v6277_v62 = vld [vmem:[#allocation235_spill] sm:$0xff]  ;;  %v1702_v60 = vsel %vm1663_vm7, %v1637_v13, %v1157_v55  ;;  %v6279_v59 = vld [vmem:[#allocation57_spill] sm:$0xff]  ;;  %v1976_v10 = vld [vmem:[%s2039_s12 + $0x150] sm:$0xff] }
 0x462   : > { %v1445_v22 = vsel %vm1403_vm3, %v1380_v54, %v6277_v62  ;;  %v1444_v23 = vsel %vm1403_vm3, %v1379_v12, %v6278_v53  ;;  %v1703_v57 = vsel %vm1663_vm7, %v1638_v45, %v1159_v50  ;;  %v1252_v44 = vsel %vm1208_vm0, %v1975_v1, %v6279_v59  ;;  %v6281_v61 = vld [vmem:[#allocation312_spill] sm:$0xff]  ;;  %v6282_v27 = vld [vmem:[#allocation313_spill] sm:$0xff]  ;;  %1767 = vst.msk [vmem:[%s4383_s23 + $0x130] sm:$0xff] %vm1728_vm8, %v1702_v60  ;;  %v6284_v36 = vld [vmem:[#allocation118_spill] sm:$0xff] }
 0x463   : > { %v1251_v11 = vsel %vm1208_vm0, %v1976_v10, %v6280_v26  ;;  %v1510_v16 = vsel %vm1468_vm4, %v1445_v22, %v6281_v61  ;;  %v1509_v17 = vsel %vm1468_vm4, %v1444_v23, %v6282_v27  ;;  %1768 = vst.msk [vmem:[%s4383_s23 + $0x138] sm:$0xff] %vm1728_vm8, %v1703_v57  ;;  %v6283_v0 = vld [vmem:[#allocation117_spill] sm:$0xff]  ;;  %v6286_v51 = vld [vmem:[#allocation374_spill] sm:$0xff]  ;;  %v6287_v38 = vld [vmem:[#allocation176_spill] sm:$0xff]  ;;  %v1165_v10 = vpop.permute.xlu0 %1164 }
 0x464   : > { %v1317_v52 = vsel %vm1273_vm1, %v1252_v44, %v6283_v0  ;;  %v1316_v30 = vsel %vm1273_vm1, %v1251_v11, %v6284_v36  ;;  %v6285_v58 = vld [vmem:[#allocation373_spill] sm:$0xff]  ;;  %v1574_v34 = vsel %vm1533_vm5, %v1509_v17, %v6286_v51  ;;  %v6290_v56 = vld [vmem:[#allocation238_spill] sm:$0xff]  ;;  %v1977_v3 = vld [vmem:[%s2039_s12 + $0x168] sm:$0xff]  ;;  %v1167_v44 = vpop.permute.xlu1 %1166 }
 0x465   : > { %v1575_v31 = vsel %vm1533_vm5, %v1510_v16, %v6285_v58  ;;  %v1382_v35 = vsel %vm1338_vm2, %v1317_v52, %v6287_v38  ;;  %v6288_v48 = vld [vmem:[#allocation177_spill] sm:$0xff]  ;;  %v1639_v20 = vsel %vm1598_vm6, %v1574_v34, %v4239_v25  ;;  %v6291_v2 = vld [vmem:[#allocation59_spill] sm:$0xff]  ;;  %v6292_v18 = vld [vmem:[#allocation60_spill] sm:$0xff] }
 0x466   : > { %v1381_v14 = vsel %vm1338_vm2, %v1316_v30, %v6288_v48  ;;  %v1640_v39 = vsel %vm1598_vm6, %v1575_v31, %v4237_v24  ;;  %v6289_v42 = vld [vmem:[#allocation237_spill] sm:$0xff]  ;;  %v1704_v46 = vsel %vm1663_vm7, %v1639_v20, %v1161_v21  ;;  %v1254_v49 = vsel %vm1208_vm0, %v1977_v3, %v6291_v2  ;;  %v1978_v24 = vld [vmem:[%s2039_s12 + $0x160] sm:$0xff]  ;;  %v6294_v63 = vld [vmem:[#allocation315_spill] sm:$0xff] }
 0x467   : > { %v1447_v47 = vsel %vm1403_vm3, %v1382_v35, %v6289_v42  ;;  %v1446_v41 = vsel %vm1403_vm3, %v1381_v14, %v6290_v56  ;;  %v1705_v40 = vsel %vm1663_vm7, %v1640_v39, %v1163_v15  ;;  %v1253_v25 = vsel %vm1208_vm0, %v1978_v24, %v6292_v18  ;;  %v6293_v43 = vld [vmem:[#allocation314_spill] sm:$0xff]  ;;  %1769 = vst.msk [vmem:[%s4383_s23 + $0x140] sm:$0xff] %vm1728_vm8, %v1704_v46  ;;  %v6295_v5 = vld [vmem:[#allocation119_spill] sm:$0xff]  ;;  %v6296_v45 = vld [vmem:[#allocation120_spill] sm:$0xff]  ;;  %v1169_v2 = vpop.permute.xlu0 %1168 }
 0x468   : > { %v1512_v19 = vsel %vm1468_vm4, %v1447_v47, %v6293_v43  ;;  %v1511_v54 = vsel %vm1468_vm4, %v1446_v41, %v6294_v63  ;;  %1770 = vst.msk [vmem:[%s4383_s23 + $0x148] sm:$0xff] %vm1728_vm8, %v1705_v40  ;;  %v1319_v12 = vsel %vm1273_vm1, %v1254_v49, %v6295_v5  ;;  %v1318_v13 = vsel %vm1273_vm1, %v1253_v25, %v6296_v45  ;;  %v6297_v50 = vld [vmem:[#allocation375_spill] sm:$0xff]  ;;  %v6298_v62 = vld [vmem:[#allocation376_spill] sm:$0xff]  ;;  %v6299_v53 = vld [vmem:[#allocation178_spill] sm:$0xff]  ;;  %v1171_v3 = vpop.permute.xlu1 %1170 }
 0x469   : > { %v1577_v55 = vsel %vm1533_vm5, %v1512_v19, %v6297_v50  ;;  %v1576_v22 = vsel %vm1533_vm5, %v1511_v54, %v6298_v62  ;;  %v1384_v23 = vsel %vm1338_vm2, %v1319_v12, %v6299_v53  ;;  %v6300_v57 = vld [vmem:[#allocation179_spill] sm:$0xff]  ;;  %v6302_v61 = vld [vmem:[#allocation240_spill] sm:$0xff]  ;;  %v1979_v0 = vld [vmem:[%s2039_s12 + $0x178] sm:$0xff] }
 0x46a   : > { %v1383_v60 = vsel %vm1338_vm2, %v1318_v13, %v6300_v57  ;;  %v1642_v1 = vsel %vm1598_vm6, %v1577_v55, %v4245_v8  ;;  %v1641_v59 = vsel %vm1598_vm6, %v1576_v22, %v4247_v9  ;;  %v6301_v26 = vld [vmem:[#allocation239_spill] sm:$0xff]  ;;  %v6303_v52 = vld [vmem:[#allocation61_spill] sm:$0xff]  ;;  %v1980_v8 = vld [vmem:[%s2039_s12 + $0x170] sm:$0xff] }
 0x46b   : > { %v1449_v11 = vsel %vm1403_vm3, %v1384_v23, %v6301_v26  ;;  %v1448_v16 = vsel %vm1403_vm3, %v1383_v60, %v6302_v61  ;;  %v1707_v27 = vsel %vm1663_vm7, %v1642_v1, %v1167_v44  ;;  %v1706_v17 = vsel %vm1663_vm7, %v1641_v59, %v1165_v10  ;;  %v6304_v30 = vld [vmem:[#allocation62_spill] sm:$0xff]  ;;  %v6305_v58 = vld [vmem:[#allocation316_spill] sm:$0xff]  ;;  %v6306_v51 = vld [vmem:[#allocation317_spill] sm:$0xff] }
 0x46c   : > { %v1256_v36 = vsel %vm1208_vm0, %v1979_v0, %v6303_v52  ;;  %v1255_v9 = vsel %vm1208_vm0, %v1980_v8, %v6304_v30  ;;  %v1514_v31 = vsel %vm1468_vm4, %v1449_v11, %v6305_v58  ;;  %v1513_v34 = vsel %vm1468_vm4, %v1448_v16, %v6306_v51  ;;  %1772 = vst.msk [vmem:[%s4383_s23 + $0x158] sm:$0xff] %vm1728_vm8, %v1707_v27  ;;  %v6307_v38 = vld [vmem:[#allocation121_spill] sm:$0xff]  ;;  %v6308_v48 = vld [vmem:[#allocation122_spill] sm:$0xff]  ;;  %v6311_v42 = vld [vmem:[#allocation180_spill] sm:$0xff]  ;;  %v1175_v27 = vpop.permute.xlu1 %1174 }
 0x46d   : > { %1771 = vst.msk [vmem:[%s4383_s23 + $0x150] sm:$0xff] %vm1728_vm8, %v1706_v17  ;;  %v1321_v35 = vsel %vm1273_vm1, %v1256_v36, %v6307_v38  ;;  %v1320_v14 = vsel %vm1273_vm1, %v1255_v9, %v6308_v48  ;;  %v6309_v39 = vld [vmem:[#allocation377_spill] sm:$0xff]  ;;  %v6310_v15 = vld [vmem:[#allocation378_spill] sm:$0xff]  ;;  %v1981_v63 = vld [vmem:[%s2039_s12 + $0x188] sm:$0xff]  ;;  %v1173_v17 = vpop.permute.xlu0 %1172 }
 0x46e   : > { %v1579_v20 = vsel %vm1533_vm5, %v1514_v31, %v6309_v39  ;;  %v1578_v21 = vsel %vm1533_vm5, %v1513_v34, %v6310_v15  ;;  %v1386_v47 = vsel %vm1338_vm2, %v1321_v35, %v6311_v42  ;;  %v6312_v56 = vld [vmem:[#allocation181_spill] sm:$0xff]  ;;  %v6314_v18 = vld [vmem:[#allocation242_spill] sm:$0xff]  ;;  %v6315_v54 = vld [vmem:[#allocation63_spill] sm:$0xff] }
 0x46f   : > { %v1385_v41 = vsel %vm1338_vm2, %v1320_v14, %v6312_v56  ;;  %v1644_v40 = vsel %vm1598_vm6, %v1579_v20, %v4253_v28  ;;  %v1643_v46 = vsel %vm1598_vm6, %v1578_v21, %v4255_v29  ;;  %v6313_v49 = vld [vmem:[#allocation241_spill] sm:$0xff]  ;;  %v1258_v5 = vsel %vm1208_vm0, %v1981_v63, %v6315_v54  ;;  %v1982_v28 = vld [vmem:[%s2039_s12 + $0x180] sm:$0xff]  ;;  %v6316_v12 = vld [vmem:[#allocation64_spill] sm:$0xff] }
 0x470   : > { %v1451_v24 = vsel %vm1403_vm3, %v1386_v47, %v6313_v49  ;;  %v1450_v25 = vsel %vm1403_vm3, %v1385_v41, %v6314_v18  ;;  %v1709_v43 = vsel %vm1663_vm7, %v1644_v40, %v1171_v3  ;;  %v1708_v19 = vsel %vm1663_vm7, %v1643_v46, %v1169_v2  ;;  %v6317_v45 = vld [vmem:[#allocation318_spill] sm:$0xff]  ;;  %v6318_v50 = vld [vmem:[#allocation319_spill] sm:$0xff]  ;;  %v6320_v53 = vld [vmem:[#allocation124_spill] sm:$0xff]  ;;  %v1179_v18 = vpop.permute.xlu1 %1178 }
 0x471   : > { %v1257_v29 = vsel %vm1208_vm0, %v1982_v28, %v6316_v12  ;;  %v1516_v13 = vsel %vm1468_vm4, %v1451_v24, %v6317_v45  ;;  %v1515_v55 = vsel %vm1468_vm4, %v1450_v25, %v6318_v50  ;;  %1774 = vst.msk [vmem:[%s4383_s23 + $0x168] sm:$0xff] %vm1728_vm8, %v1709_v43  ;;  %1773 = vst.msk [vmem:[%s4383_s23 + $0x160] sm:$0xff] %vm1728_vm8, %v1708_v19  ;;  %v6319_v62 = vld [vmem:[#allocation123_spill] sm:$0xff]  ;;  %v6322_v1 = vld [vmem:[#allocation380_spill] sm:$0xff]  ;;  %v1177_v25 = vpop.permute.xlu0 %1176 }
 0x472   : > { %v1323_v22 = vsel %vm1273_vm1, %v1258_v5, %v6319_v62  ;;  %v1322_v23 = vsel %vm1273_vm1, %v1257_v29, %v6320_v53  ;;  %v6321_v57 = vld [vmem:[#allocation379_spill] sm:$0xff]  ;;  %v1580_v59 = vsel %vm1533_vm5, %v1515_v55, %v6322_v1  ;;  %v6323_v44 = vld [vmem:[#allocation182_spill] sm:$0xff]  ;;  %v6326_v36 = vld [vmem:[#allocation244_spill] sm:$0xff] }
 0x473   : > { %v1581_v60 = vsel %vm1533_vm5, %v1516_v13, %v6321_v57  ;;  %v1388_v10 = vsel %vm1338_vm2, %v1323_v22, %v6323_v44  ;;  %v6324_v26 = vld [vmem:[#allocation183_spill] sm:$0xff]  ;;  %v1645_v16 = vsel %vm1598_vm6, %v1580_v59, %v4263_v7  ;;  %v1983_v58 = vld [vmem:[%s2039_s12 + $0x198] sm:$0xff]  ;;  %v6328_v34 = vld [vmem:[#allocation66_spill] sm:$0xff] }
 0x474   : > { %v1387_v11 = vsel %vm1338_vm2, %v1322_v23, %v6324_v26  ;;  %v1646_v61 = vsel %vm1598_vm6, %v1581_v60, %v4261_v6  ;;  %v6325_v0 = vld [vmem:[#allocation243_spill] sm:$0xff]  ;;  %v1710_v9 = vsel %vm1663_vm7, %v1645_v16, %v1173_v17  ;;  %v6327_v31 = vld [vmem:[#allocation65_spill] sm:$0xff]  ;;  %v1984_v6 = vld [vmem:[%s2039_s12 + $0x190] sm:$0xff] }
 0x475   : > { %v1453_v52 = vsel %vm1403_vm3, %v1388_v10, %v6325_v0  ;;  %v1452_v8 = vsel %vm1403_vm3, %v1387_v11, %v6326_v36  ;;  %v1711_v30 = vsel %vm1663_vm7, %v1646_v61, %v1175_v27  ;;  %v1260_v51 = vsel %vm1208_vm0, %v1983_v58, %v6327_v31  ;;  %v6329_v38 = vld [vmem:[#allocation320_spill] sm:$0xff]  ;;  %v6330_v48 = vld [vmem:[#allocation321_spill] sm:$0xff]  ;;  %1775 = vst.msk [vmem:[%s4383_s23 + $0x170] sm:$0xff] %vm1728_vm8, %v1710_v9  ;;  %v6332_v15 = vld [vmem:[#allocation126_spill] sm:$0xff]  ;;  %v1181_v36 = vpop.permute.xlu0 %1180 }
 0x476   : > { %v1259_v7 = vsel %vm1208_vm0, %v1984_v6, %v6328_v34  ;;  %v1518_v35 = vsel %vm1468_vm4, %v1453_v52, %v6329_v38  ;;  %v1517_v14 = vsel %vm1468_vm4, %v1452_v8, %v6330_v48  ;;  %1776 = vst.msk [vmem:[%s4383_s23 + $0x178] sm:$0xff] %vm1728_vm8, %v1711_v30  ;;  %v6331_v39 = vld [vmem:[#allocation125_spill] sm:$0xff]  ;;  %v6334_v56 = vld [vmem:[#allocation382_spill] sm:$0xff]  ;;  %v6335_v40 = vld [vmem:[#allocation184_spill] sm:$0xff]  ;;  %v1183_v52 = vpop.permute.xlu1 %1182 }
 0x477   : > { %v1325_v20 = vsel %vm1273_vm1, %v1260_v51, %v6331_v39  ;;  %v1324_v21 = vsel %vm1273_vm1, %v1259_v7, %v6332_v15  ;;  %v6333_v42 = vld [vmem:[#allocation381_spill] sm:$0xff]  ;;  %v1582_v41 = vsel %vm1533_vm5, %v1517_v14, %v6334_v56  ;;  %v6338_v63 = vld [vmem:[#allocation246_spill] sm:$0xff]  ;;  %v1985_v12 = vld [vmem:[%s2039_s12 + $0x1a8] sm:$0xff] }
 0x478   : > { %v1583_v47 = vsel %vm1533_vm5, %v1518_v35, %v6333_v42  ;;  %v1390_v46 = vsel %vm1338_vm2, %v1325_v20, %v6335_v40  ;;  %v6336_v3 = vld [vmem:[#allocation185_spill] sm:$0xff]  ;;  %v1647_v24 = vsel %vm1598_vm6, %v1582_v41, %v4271_v33  ;;  %v6339_v29 = vld [vmem:[#allocation67_spill] sm:$0xff]  ;;  %v6340_v13 = vld [vmem:[#allocation68_spill] sm:$0xff] }
 0x479   : > { %v1389_v2 = vsel %vm1338_vm2, %v1324_v21, %v6336_v3  ;;  %v1648_v49 = vsel %vm1598_vm6, %v1583_v47, %v4269_v32  ;;  %v6337_v43 = vld [vmem:[#allocation245_spill] sm:$0xff]  ;;  %v1712_v28 = vsel %vm1663_vm7, %v1647_v24, %v1177_v25  ;;  %v1262_v45 = vsel %vm1208_vm0, %v1985_v12, %v6339_v29  ;;  %v1986_v32 = vld [vmem:[%s2039_s12 + $0x1a0] sm:$0xff]  ;;  %v6342_v62 = vld [vmem:[#allocation323_spill] sm:$0xff] }
 0x47a   : > { %v1455_v19 = vsel %vm1403_vm3, %v1390_v46, %v6337_v43  ;;  %v1454_v54 = vsel %vm1403_vm3, %v1389_v2, %v6338_v63  ;;  %v1713_v5 = vsel %vm1663_vm7, %v1648_v49, %v1179_v18  ;;  %v1261_v33 = vsel %vm1208_vm0, %v1986_v32, %v6340_v13  ;;  %v6341_v50 = vld [vmem:[#allocation322_spill] sm:$0xff]  ;;  %1777 = vst.msk [vmem:[%s4383_s23 + $0x180] sm:$0xff] %vm1728_vm8, %v1712_v28  ;;  %v6343_v53 = vld [vmem:[#allocation127_spill] sm:$0xff]  ;;  %v6344_v57 = vld [vmem:[#allocation128_spill] sm:$0xff]  ;;  %v1185_v63 = vpop.permute.xlu0 %1184 }
 0x47b   : > { %v1520_v55 = vsel %vm1468_vm4, %v1455_v19, %v6341_v50  ;;  %v1519_v22 = vsel %vm1468_vm4, %v1454_v54, %v6342_v62  ;;  %1778 = vst.msk [vmem:[%s4383_s23 + $0x188] sm:$0xff] %vm1728_vm8, %v1713_v5  ;;  %v1327_v23 = vsel %vm1273_vm1, %v1262_v45, %v6343_v53  ;;  %v1326_v60 = vsel %vm1273_vm1, %v1261_v33, %v6344_v57  ;;  %v6345_v1 = vld [vmem:[#allocation383_spill] sm:$0xff]  ;;  %v6346_v44 = vld [vmem:[#allocation384_spill] sm:$0xff]  ;;  %v6347_v26 = vld [vmem:[#allocation186_spill] sm:$0xff]  ;;  %v1187_v19 = vpop.permute.xlu1 %1186 }
 0x47c   : > { %v1585_v59 = vsel %vm1533_vm5, %v1520_v55, %v6345_v1  ;;  %v1584_v10 = vsel %vm1533_vm5, %v1519_v22, %v6346_v44  ;;  %v1392_v11 = vsel %vm1338_vm2, %v1327_v23, %v6347_v26  ;;  %v6348_v61 = vld [vmem:[#allocation187_spill] sm:$0xff]  ;;  %v6349_v17 = vld [vmem:[#allocation405_spill] sm:$0xff]  ;;  %v6351_v9 = vld [vmem:[#allocation248_spill] sm:$0xff] }
 0x47d   : > { %v1391_v16 = vsel %vm1338_vm2, %v1326_v60, %v6348_v61  ;;  %v1650_v27 = vsel %vm1598_vm6, %v1585_v59, %v4277_v4  ;;  %v1649_v0 = vsel %vm1598_vm6, %v1584_v10, %v6349_v17  ;;  %v6350_v8 = vld [vmem:[#allocation247_spill] sm:$0xff]  ;;  %v1987_v6 = vld [vmem:[%s2039_s12 + $0x1b8] sm:$0xff]  ;;  %v1988_v4 = vld [vmem:[%s2039_s12 + $0x1b0] sm:$0xff] }
 0x47e   : > { %v1457_v30 = vsel %vm1403_vm3, %v1392_v11, %v6350_v8  ;;  %v1456_v58 = vsel %vm1403_vm3, %v1391_v16, %v6351_v9  ;;  %v1715_v31 = vsel %vm1663_vm7, %v1650_v27, %v1183_v52  ;;  %v1714_v51 = vsel %vm1663_vm7, %v1649_v0, %v1181_v36  ;;  %v6352_v34 = vld [vmem:[#allocation69_spill] sm:$0xff]  ;;  %v6353_v38 = vld [vmem:[#allocation70_spill] sm:$0xff]  ;;  %v6354_v48 = vld [vmem:[#allocation324_spill] sm:$0xff]  ;;  %v1189_v9 = vpop.permute.xlu0 %1188 }
 0x47f   : > { %v1264_v7 = vsel %vm1208_vm0, %v1987_v6, %v6352_v34  ;;  %v1263_v35 = vsel %vm1208_vm0, %v1988_v4, %v6353_v38  ;;  %v1522_v14 = vsel %vm1468_vm4, %v1457_v30, %v6354_v48  ;;  %v6355_v39 = vld [vmem:[#allocation325_spill] sm:$0xff]  ;;  %1780 = vst.msk [vmem:[%s4383_s23 + $0x198] sm:$0xff] %vm1728_vm8, %v1715_v31  ;;  %1779 = vst.msk [vmem:[%s4383_s23 + $0x190] sm:$0xff] %vm1728_vm8, %v1714_v51  ;;  %v6357_v42 = vld [vmem:[#allocation130_spill] sm:$0xff]  ;;  %v1191_v30 = vpop.permute.xlu1 %1190 }
 0x480   : > { %v1521_v20 = vsel %vm1468_vm4, %v1456_v58, %v6355_v39  ;;  %v6356_v15 = vld [vmem:[#allocation129_spill] sm:$0xff]  ;;  %v1328_v47 = vsel %vm1273_vm1, %v1263_v35, %v6357_v42  ;;  %v6359_v40 = vld [vmem:[#allocation386_spill] sm:$0xff]  ;;  %v6360_v3 = vld [vmem:[#allocation188_spill] sm:$0xff] }
 0x481   : > { %v1329_v21 = vsel %vm1273_vm1, %v1264_v7, %v6356_v15  ;;  %v6358_v56 = vld [vmem:[#allocation385_spill] sm:$0xff]  ;;  %v1586_v46 = vsel %vm1533_vm5, %v1521_v20, %v6359_v40  ;;  %v6362_v18 = vld [vmem:[#allocation406_spill] sm:$0xff]  ;;  %v1989_v32 = vld [vmem:[%s2039_s12 + $0x1c8] sm:$0xff] }
 0x482   : > { %v1587_v41 = vsel %vm1533_vm5, %v1522_v14, %v6358_v56  ;;  %v1394_v2 = vsel %vm1338_vm2, %v1329_v21, %v6360_v3  ;;  %v6361_v49 = vld [vmem:[#allocation189_spill] sm:$0xff]  ;;  %v1651_v43 = vsel %vm1598_vm6, %v1586_v46, %v4287_v37  ;;  %v6364_v28 = vld [vmem:[#allocation250_spill] sm:$0xff]  ;;  %v6365_v13 = vld [vmem:[#allocation71_spill] sm:$0xff] }
 0x483   : > { %v1393_v24 = vsel %vm1338_vm2, %v1328_v47, %v6361_v49  ;;  %v1652_v25 = vsel %vm1598_vm6, %v1587_v41, %v6362_v18  ;;  %v6363_v54 = vld [vmem:[#allocation249_spill] sm:$0xff]  ;;  %v1716_v45 = vsel %vm1663_vm7, %v1651_v43, %v1185_v63  ;;  %v1266_v33 = vsel %vm1208_vm0, %v1989_v32, %v6365_v13  ;;  %v1990_v50 = vld [vmem:[%s2039_s12 + $0x1c0] sm:$0xff]  ;;  %v6366_v55 = vld [vmem:[#allocation72_spill] sm:$0xff] }
 0x484   : > { %v1459_v5 = vsel %vm1403_vm3, %v1394_v2, %v6363_v54  ;;  %v1458_v12 = vsel %vm1403_vm3, %v1393_v24, %v6364_v28  ;;  %v1717_v29 = vsel %vm1663_vm7, %v1652_v25, %v1187_v19  ;;  %v1265_v37 = vsel %vm1208_vm0, %v1990_v50, %v6366_v55  ;;  %v6367_v62 = vld [vmem:[#allocation326_spill] sm:$0xff]  ;;  %v6368_v53 = vld [vmem:[#allocation327_spill] sm:$0xff]  ;;  %1781 = vst.msk [vmem:[%s4383_s23 + $0x1a0] sm:$0xff] %vm1728_vm8, %v1716_v45  ;;  %v6370_v1 = vld [vmem:[#allocation132_spill] sm:$0xff]  ;;  %v1195_v28 = vpop.permute.xlu1 %1194 }
 0x485   : > { %v1524_v22 = vsel %vm1468_vm4, %v1459_v5, %v6367_v62  ;;  %v1523_v23 = vsel %vm1468_vm4, %v1458_v12, %v6368_v53  ;;  %1782 = vst.msk [vmem:[%s4383_s23 + $0x1a8] sm:$0xff] %vm1728_vm8, %v1717_v29  ;;  %v6369_v57 = vld [vmem:[#allocation131_spill] sm:$0xff]  ;;  %v1330_v59 = vsel %vm1273_vm1, %v1265_v37, %v6370_v1  ;;  %v6372_v26 = vld [vmem:[#allocation388_spill] sm:$0xff]  ;;  %v6377_v58 = vld [vmem:[#allocation253_spill] sm:$0xff]  ;;  %v1193_v12 = vpop.permute.xlu0 %1192 }
 0x486   : > { %v1331_v60 = vsel %vm1273_vm1, %v1266_v33, %v6369_v57  ;;  %v6371_v44 = vld [vmem:[#allocation387_spill] sm:$0xff]  ;;  %v1588_v11 = vsel %vm1533_vm5, %v1523_v23, %v6372_v26  ;;  %v6374_v27 = vld [vmem:[#allocation4_spill] sm:$0xff]  ;;  %v6378_v51 = vld [vmem:[#allocation254_spill] sm:$0xff] }
 0x487   : > { %v1589_v10 = vsel %vm1533_vm5, %v1524_v22, %v6371_v44  ;;  %v6373_v61 = vld [vmem:[#allocation3_spill] sm:$0xff]  ;;  %v1395_v17 = vsel %vm1338_vm2, %v1330_v59, %v6374_v27  ;;  %v6376_v36 = vld [vmem:[#allocation408_spill] sm:$0xff]  ;;  %v1991_v4 = vld [vmem:[%s2039_s12 + $0x1d8] sm:$0xff] }
 0x488   : > { %v1396_v16 = vsel %vm1338_vm2, %v1331_v60, %v6373_v61  ;;  %v6375_v0 = vld [vmem:[#allocation407_spill] sm:$0xff]  ;;  %v1653_v8 = vsel %vm1598_vm6, %v1588_v11, %v6376_v36  ;;  %v1460_v6 = vsel %vm1403_vm3, %v1395_v17, %v6378_v51  ;;  %v6379_v38 = vld [vmem:[#allocation73_spill] sm:$0xff]  ;;  %v1992_v48 = vld [vmem:[%s2039_s12 + $0x1d0] sm:$0xff]  ;;  %v1199_v51 = vpop.permute.xlu1 %1198 }
 0x489   : > { %v1654_v52 = vsel %vm1598_vm6, %v1589_v10, %v6375_v0  ;;  %v1461_v31 = vsel %vm1403_vm3, %v1396_v16, %v6377_v58  ;;  %v1718_v7 = vsel %vm1663_vm7, %v1653_v8, %v1189_v9  ;;  %v1268_v35 = vsel %vm1208_vm0, %v1991_v4, %v6379_v38  ;;  %v6380_v14 = vld [vmem:[#allocation74_spill] sm:$0xff]  ;;  %v6381_v20 = vld [vmem:[#allocation328_spill] sm:$0xff]  ;;  %v6382_v21 = vld [vmem:[#allocation329_spill] sm:$0xff] }
 0x48a   : > { %v1719_v34 = vsel %vm1663_vm7, %v1654_v52, %v1191_v30  ;;  %v1267_v39 = vsel %vm1208_vm0, %v1992_v48, %v6380_v14  ;;  %v1526_v15 = vsel %vm1468_vm4, %v1461_v31, %v6381_v20  ;;  %v1525_v42 = vsel %vm1468_vm4, %v1460_v6, %v6382_v21  ;;  %1783 = vst.msk [vmem:[%s4383_s23 + $0x1b0] sm:$0xff] %vm1728_vm8, %v1718_v7  ;;  %v6383_v47 = vld [vmem:[#allocation133_spill] sm:$0xff]  ;;  %v6384_v41 = vld [vmem:[#allocation134_spill] sm:$0xff]  ;;  %v6389_v19 = vld [vmem:[#allocation251_spill] sm:$0xff]  ;;  %v1197_v6 = vpop.permute.xlu0 %1196 }
 0x48b   : > { %1784 = vst.msk [vmem:[%s4383_s23 + $0x1b8] sm:$0xff] %vm1728_vm8, %v1719_v34  ;;  %v1333_v56 = vsel %vm1273_vm1, %v1268_v35, %v6383_v47  ;;  %v1332_v40 = vsel %vm1273_vm1, %v1267_v39, %v6384_v41  ;;  %v6385_v46 = vld [vmem:[#allocation389_spill] sm:$0xff]  ;;  %v6386_v2 = vld [vmem:[#allocation390_spill] sm:$0xff]  ;;  %v6390_v54 = vld [vmem:[#allocation252_spill] sm:$0xff] }
 0x48c   : > { %v1591_v3 = vsel %vm1533_vm5, %v1526_v15, %v6385_v46  ;;  %v1590_v49 = vsel %vm1533_vm5, %v1525_v42, %v6386_v2  ;;  %v6387_v24 = vld [vmem:[#allocation5_spill] sm:$0xff]  ;;  %v6388_v25 = vld [vmem:[#allocation6_spill] sm:$0xff]  ;;  %v6391_v29 = vld [vmem:[#allocation256_spill] sm:$0xff] }
 0x48d   : > { %v1398_v18 = vsel %vm1338_vm2, %v1333_v56, %v6387_v24  ;;  %v1397_v43 = vsel %vm1338_vm2, %v1332_v40, %v6388_v25  ;;  %v1656_v63 = vsel %vm1598_vm6, %v1591_v3, %v6389_v19  ;;  %v1655_v5 = vsel %vm1598_vm6, %v1590_v49, %v6390_v54  ;;  %v6392_v32 = vld [vmem:[#allocation257_spill] sm:$0xff]  ;;  %v1993_v55 = vld [vmem:[%s2039_s12 + $0x1e8] sm:$0xff]  ;;  %v1994_v22 = vld [vmem:[%s2039_s12 + $0x1e0] sm:$0xff] }
 0x48e   : > { %v1463_v45 = vsel %vm1403_vm3, %v1398_v18, %v6391_v29  ;;  %v1462_v13 = vsel %vm1403_vm3, %v1397_v43, %v6392_v32  ;;  %v1721_v33 = vsel %vm1663_vm7, %v1656_v63, %v1195_v28  ;;  %v1720_v50 = vsel %vm1663_vm7, %v1655_v5, %v1193_v12  ;;  %v6393_v37 = vld [vmem:[#allocation75_spill] sm:$0xff]  ;;  %v6394_v53 = vld [vmem:[#allocation76_spill] sm:$0xff]  ;;  %v6395_v57 = vld [vmem:[#allocation330_spill] sm:$0xff]  ;;  %v1203_v32 = vpop.permute.xlu1 %1202 }
 0x48f   : > { %v1270_v62 = vsel %vm1208_vm0, %v1993_v55, %v6393_v37  ;;  %v1269_v23 = vsel %vm1208_vm0, %v1994_v22, %v6394_v53  ;;  %v1528_v60 = vsel %vm1468_vm4, %v1463_v45, %v6395_v57  ;;  %v6396_v1 = vld [vmem:[#allocation331_spill] sm:$0xff]  ;;  %1786 = vst.msk [vmem:[%s4383_s23 + $0x1c8] sm:$0xff] %vm1728_vm8, %v1721_v33  ;;  %1785 = vst.msk [vmem:[%s4383_s23 + $0x1c0] sm:$0xff] %vm1728_vm8, %v1720_v50  ;;  %v6398_v26 = vld [vmem:[#allocation8_spill] sm:$0xff] }
 0x490   : > { %v1527_v59 = vsel %vm1468_vm4, %v1462_v13, %v6396_v1  ;;  %v6397_v44 = vld [vmem:[#allocation7_spill] sm:$0xff]  ;;  %v1334_v11 = vsel %vm1273_vm1, %v1269_v23, %v6398_v26  ;;  %v6400_v27 = vld [vmem:[#allocation392_spill] sm:$0xff]  ;;  %v6401_v0 = vld [vmem:[#allocation190_spill] sm:$0xff]  ;;  %v1201_v13 = vpop.permute.xlu0 %1200 }
 0x491   : > { %v1335_v10 = vsel %vm1273_vm1, %v1270_v62, %v6397_v44  ;;  %v6399_v61 = vld [vmem:[#allocation391_spill] sm:$0xff]  ;;  %v1592_v17 = vsel %vm1533_vm5, %v1527_v59, %v6400_v27  ;;  %v6404_v58 = vld [vmem:[#allocation409_spill] sm:$0xff]  ;;  %v6405_v34 = vld [vmem:[#allocation260_spill] sm:$0xff] }
 0x492   : > { %v1593_v16 = vsel %vm1533_vm5, %v1528_v60, %v6399_v61  ;;  %v1400_v52 = vsel %vm1338_vm2, %v1335_v10, %v6401_v0  ;;  %v6402_v36 = vld [vmem:[#allocation191_spill] sm:$0xff]  ;;  %v1657_v31 = vsel %vm1598_vm6, %v1592_v17, %v6404_v58  ;;  %v6406_v4 = vld [vmem:[#allocation261_spill] sm:$0xff]  ;;  %v1996_v15 = vld [vmem:[%s2039_s12 + $0x1f0] sm:$0xff]  ;;  %v1207_v27 = vpop.permute.xlu1 %1206 }
 0x493   : > { %v1399_v8 = vsel %vm1338_vm2, %v1334_v11, %v6402_v36  ;;  %v6403_v30 = vld [vmem:[#allocation255_spill] sm:$0xff]  ;;  %v1465_v7 = vsel %vm1403_vm3, %v1400_v52, %v6405_v34  ;;  %v1722_v48 = vsel %vm1663_vm7, %v1657_v31, %v1197_v6  ;;  %v1995_v14 = vld [vmem:[%s2039_s12 + $0x1f8] sm:$0xff]  ;;  %v6408_v21 = vld [vmem:[#allocation78_spill] sm:$0xff] }
 0x494   : > { %v1658_v9 = vsel %vm1598_vm6, %v1593_v16, %v6403_v30  ;;  %v1464_v38 = vsel %vm1403_vm3, %v1399_v8, %v6406_v4  ;;  %v6407_v39 = vld [vmem:[#allocation77_spill] sm:$0xff]  ;;  %v1271_v42 = vsel %vm1208_vm0, %v1996_v15, %v6408_v21  ;;  %v6409_v47 = vld [vmem:[#allocation332_spill] sm:$0xff]  ;;  %1787 = vst.msk [vmem:[%s4383_s23 + $0x1d0] sm:$0xff] %vm1728_vm8, %v1722_v48  ;;  %v6412_v2 = vld [vmem:[#allocation10_spill] sm:$0xff]  ;;  %v1205_v17 = vpop.permute.xlu0 %1204 }
 0x495   : > { %v1723_v35 = vsel %vm1663_vm7, %v1658_v9, %v1199_v51  ;;  %v1272_v20 = vsel %vm1208_vm0, %v1995_v14, %v6407_v39  ;;  %v1530_v56 = vsel %vm1468_vm4, %v1465_v7, %v6409_v47  ;;  %v6410_v41 = vld [vmem:[#allocation333_spill] sm:$0xff]  ;;  %v1336_v49 = vsel %vm1273_vm1, %v1271_v42, %v6412_v2  ;;  %v6413_v24 = vld [vmem:[#allocation258_spill] sm:$0xff]  ;;  %v6415_v19 = vld [vmem:[#allocation192_spill] sm:$0xff] }
 0x496   : > { %v1529_v40 = vsel %vm1468_vm4, %v1464_v38, %v6410_v41  ;;  %1788 = vst.msk [vmem:[%s4383_s23 + $0x1d8] sm:$0xff] %vm1728_vm8, %v1723_v35  ;;  %v6411_v46 = vld [vmem:[#allocation9_spill] sm:$0xff]  ;;  %v1595_v18 = vsel %vm1533_vm5, %v1530_v56, %v6413_v24  ;;  %v6417_v28 = vld [vmem:[#allocation259_spill] sm:$0xff]  ;;  %v6418_v29 = vld [vmem:[#allocation410_spill] sm:$0xff] }
 0x497   : > { %v1337_v3 = vsel %vm1273_vm1, %v1272_v20, %v6411_v46  ;;  %v6414_v25 = vld [vmem:[#allocation393_spill] sm:$0xff]  ;;  %v1660_v12 = vsel %vm1598_vm6, %v1595_v18, %v6417_v28  ;;  %v6419_v33 = vld [vmem:[#allocation263_spill] sm:$0xff]  ;;  %v6420_v55 = vld [vmem:[#allocation264_spill] sm:$0xff] }
 0x498   : > { %v1594_v43 = vsel %vm1533_vm5, %v1529_v40, %v6414_v25  ;;  %v1402_v63 = vsel %vm1338_vm2, %v1337_v3, %v6415_v19  ;;  %v6416_v54 = vld [vmem:[#allocation193_spill] sm:$0xff]  ;;  %v1725_v62 = vsel %vm1663_vm7, %v1660_v12, %v1203_v32  ;;  %v6421_v53 = vld [vmem:[#allocation334_spill] sm:$0xff]  ;;  %v6422_v57 = vld [vmem:[#allocation335_spill] sm:$0xff] }
 0x499   : > { %v1401_v5 = vsel %vm1338_vm2, %v1336_v49, %v6416_v54  ;;  %v1659_v45 = vsel %vm1598_vm6, %v1594_v43, %v6418_v29  ;;  %v1467_v50 = vsel %vm1403_vm3, %v1402_v63, %v6419_v33  ;;  %1790 = vst.msk [vmem:[%s4383_s23 + $0x1e8] sm:$0xff] %vm1728_vm8, %v1725_v62  ;;  %v6423_v1 = vld [vmem:[#allocation262_spill] sm:$0xff]  ;;  %v6425_v26 = vld [vmem:[#allocation15_spill] sm:$0xff]  ;;  %v6426_v61 = vld [vmem:[#allocation16_spill] sm:$0xff] }
 0x49a   : > { %v1466_v37 = vsel %vm1403_vm3, %v1401_v5, %v6420_v55  ;;  %v1724_v22 = vsel %vm1663_vm7, %v1659_v45, %v1201_v13  ;;  %v1532_v23 = vsel %vm1468_vm4, %v1467_v50, %v6421_v53  ;;  %v6424_v44 = vld [vmem:[#allocation394_spill] sm:$0xff] }
 0x49b   : > { %v1531_v60 = vsel %vm1468_vm4, %v1466_v37, %v6422_v57  ;;  %1789 = vst.msk [vmem:[%s4383_s23 + $0x1e0] sm:$0xff] %vm1728_vm8, %v1724_v22  ;;  %v1597_v59 = vsel %vm1533_vm5, %v1532_v23, %v6423_v1 }
 0x49c   : > { %v1596_v10 = vsel %vm1533_vm5, %v1531_v60, %v6424_v44  ;;  %v1662_v11 = vsel %vm1598_vm6, %v1597_v59, %v6425_v26 }
 0x49d   : > { %v1661_v16 = vsel %vm1598_vm6, %v1596_v10, %v6426_v61  ;;  %v1727_v0 = vsel %vm1663_vm7, %v1662_v11, %v1207_v27 }
 0x49e   : > { %v1726_v52 = vsel %vm1663_vm7, %v1661_v16, %v1205_v17  ;;  %1792 = vst.msk [vmem:[%s4383_s23 + $0x1f8] sm:$0xff] %vm1728_vm8, %v1727_v0 }
 0x49f   : > { %1791 = vst.msk [vmem:[%s4383_s23 + $0x1f0] sm:$0xff] %vm1728_vm8, %v1726_v52 }
 0x4a0 PF: > { %s11_s6 = sadd.s32 1, %s2003_s6  }
 0x4a1   : > { %p8_p4 = scmp.ge.s32.totalorder %s11_s6, 6  }
 0x4a3   :  { %10 = sbr.rel (!%p8_p4) target bundleno = 1 (0x1), region = 54 }

</bundles_post_ra>
